<compile_context>
chip_gen: v6e
topology: v6e:2x2x1
jax: 0.10.0
libtpu: 0.0.40
codegen_flags: <defaults>
</compile_context>

<pallas_src>
import numpy as np
import jax
import jax.numpy as jnp
from jax.experimental import pallas as pl
from jax.experimental.pallas import tpu as pltpu

# ----------------------------- configuration (small) -----------------------------
B = 2              # batch
IMG_SIZE = 32      # args.image_size
PATCH = 4
H = IMG_SIZE // PATCH      # sqrt(L) = 8
L = H * H                  # number of patch tokens = 64
D_IMG = 768                # CLIP feature dim (fn_linear out_features)
D_MAP = 1024               # multi-scale fused dim (fn_linear in_features)
N_NORMAL = 8               # number of normal text prompts
N_ABNORM = 8               # number of abnormal text prompts
C_PAD = 128                # pad the 2 text classes to one full lane tile
N_MAPS = B * 2             # B x {normal, abnormal} anomaly maps

_VMEM = pl.BlockSpec(memory_space=pltpu.MemorySpace.VMEM)


# ------------------------------- Pallas kernels ----------------------------------
def _fused_head_kernel(nt_ref, at_ref, wfn_ref, bfn_ref, img_ref, maps_ref,
                       tp_ref, sc_ref):
    """Fused single-invocation kernel:
       text aggregation -> lane-dense text slab t_pad [D_IMG, C_PAD]
       -> image-feature L2 norm + text_probs
       -> fn_linear folded into the text contraction:
            (maps @ W^T + b) @ t  ==  maps @ (W^T @ t) + (b @ t)
       bf16 MXU operands, f32 accumulation; elementwise math in f32."""
    # ---- text-feature aggregation (row norm -> mean -> norm -> stack -> global norm)
    n = nt_ref[...]                                               # [Nn, D_IMG] f32
    a = at_ref[...]                                               # [Na, D_IMG] f32
    n = n * jax.lax.rsqrt(jnp.sum(n * n, axis=-1, keepdims=True))
    a = a * jax.lax.rsqrt(jnp.sum(a * a, axis=-1, keepdims=True))
    n_mean = jnp.mean(n, axis=0, keepdims=True)                   # [1, D_IMG]
    n_mean = n_mean * jax.lax.rsqrt(jnp.sum(n_mean * n_mean))
    a_mean = jnp.mean(a, axis=0, keepdims=True)                   # [1, D_IMG]
    a_mean = a_mean * jax.lax.rsqrt(jnp.sum(a_mean * a_mean))

    # padded stack [C_PAD, D_IMG]: row0 = normal, row1 = abnormal, rest zero
    row = jax.lax.broadcasted_iota(jnp.int32, (C_PAD, D_IMG), 0)
    stacked = jnp.where(row == 0, n_mean, jnp.where(row == 1, a_mean, 0.0))
    # whole-tensor norm (torch .norm()); zero padding does not change the sum
    stacked = stacked * jax.lax.rsqrt(jnp.sum(stacked * stacked))
    t_pad = stacked.T                                             # [D_IMG, C_PAD] lane-dense
    t_pad_bf = t_pad.astype(jnp.bfloat16)

    # ---- image features -> text_probs
    x = img_ref[...]                                              # [B, D_IMG] f32
    xn = x * jax.lax.rsqrt(jnp.sum(x * x, axis=-1, keepdims=True))
    tp_ref[...] = jnp.dot(xn.astype(jnp.bfloat16), t_pad_bf,
                          preferred_element_type=jnp.float32)     # [B, C_PAD]

    # ---- fn_linear folded into the text contraction (y = maps @ W^T + b never exposed)
    wt = jnp.dot(wfn_ref[...], t_pad_bf,
                 preferred_element_type=jnp.float32)              # [D_MAP, C_PAD]
    bt = jnp.dot(bfn_ref[...], t_pad,
                 preferred_element_type=jnp.float32)              # [1, C_PAD]
    sc_ref[...] = jnp.dot(maps_ref[...], wt.astype(jnp.bfloat16),
                          preferred_element_type=jnp.float32) + bt   # [B*L, C_PAD]


def _upsample_kernel(a_ref, m_ref, mtbd_ref, o_ref):
    """Bilinear (align_corners=True) upsample of all B*2 maps in one shot:
       O[p, m*S+q] = (M @ A_wide @ blockdiag(M^T, ..., M^T))[p, m*S+q]."""
    tmp = jnp.dot(m_ref[...], a_ref[...], preferred_element_type=jnp.float32)   # [S, N_MAPS*H]
    o_ref[...] = jnp.dot(tmp, mtbd_ref[...], preferred_element_type=jnp.float32)  # [S, N_MAPS*S]


# ------------------------------- Pallas wrappers ----------------------------------
def fused_head(normal_raw, abnormal_raw, w_fn_bf16, b_fn, image_features, maps_flat_bf16):
    # normal_raw/abnormal_raw: [N, D_IMG] f32; w_fn_bf16: [D_MAP, D_IMG] bf16 (weight.T)
    # b_fn: [1, D_IMG] f32; image_features: [B, D_IMG] f32; maps_flat_bf16: [B*L, D_MAP] bf16
    return pl.pallas_call(
        _fused_head_kernel,
        in_specs=[_VMEM] * 6,
        out_specs=[_VMEM, _VMEM],
        out_shape=[
            jax.ShapeDtypeStruct((B, C_PAD), jnp.float32),       # padded text_probs
            jax.ShapeDtypeStruct((B * L, C_PAD), jnp.float32),   # padded anomaly scores
        ],
    )(normal_raw, abnormal_raw, w_fn_bf16, b_fn, image_features, maps_flat_bf16)


def bilinear_upsample(a_wide, interp_m, interp_mt_bd):
    # a_wide: [H, N_MAPS*H] f32, interp_m: [S, H], interp_mt_bd: [N_MAPS*H, N_MAPS*S]
    return pl.pallas_call(
        _upsample_kernel,
        in_specs=[_VMEM] * 3,
        out_specs=_VMEM,
        out_shape=jax.ShapeDtypeStruct((IMG_SIZE, N_MAPS * IMG_SIZE), jnp.float32),
    )(a_wide, interp_m, interp_mt_bd)


# ------------------------------- glue / helpers ------------------------------------
def _interp_matrix(s_out, s_in):
    """Row-interpolation matrix for bilinear align_corners=True."""
    m = np.zeros((s_out, s_in), dtype=np.float32)
    scale = (s_in - 1) / (s_out - 1) if s_out > 1 else 0.0
    for i in range(s_out):
        x = i * scale
        x0 = int(np.floor(x))
        x1 = min(x0 + 1, s_in - 1)
        w = float(x - x0)
        m[i, x0] += 1.0 - w
        m[i, x1] += w
    return m


def _interp_mt_blockdiag(m_np):
    """Block-diagonal [N_MAPS*H, N_MAPS*S] of M^T, so all maps upsample in one matmul."""
    mt = m_np.T                                                   # [H, S]
    bd = np.zeros((N_MAPS * H, N_MAPS * IMG_SIZE), dtype=np.float32)
    for k in range(N_MAPS):
        bd[k * H:(k + 1) * H, k * IMG_SIZE:(k + 1) * IMG_SIZE] = mt
    return bd


def _patchify(img):
    # img: [B, 3, S, S] (NCHW) -> [B, L, 3*PATCH*PATCH]
    b = img.shape[0]
    x = img.reshape(b, 3, H, PATCH, H, PATCH)
    x = jnp.transpose(x, (0, 2, 4, 1, 3, 5))
    return x.reshape(b, L, 3 * PATCH * PATCH)


def anomaly_clip_forward(img, params):
    # TODO(synk): clip_model.encode_image / Adapter are not provided; synthesize the
    # CLS image feature with a deterministic linear stand-in.
    patch_feats = _patchify(img)                                      # [B, L, 48]
    image_features = jnp.mean(patch_feats, axis=1) @ params["w_cls"]  # [B, D_IMG]

    # TODO(synk): MLVFusion / VisualPerceptionModule / MSW are not provided; synthesize
    # out_maps [B, L, 1024] with a deterministic linear stand-in.
    out_maps = patch_feats @ params["w_maps"]                         # [B, L, D_MAP]

    # batch folded into the matmul M dimension; bf16 MXU operands
    maps_flat = out_maps.reshape(B * L, D_MAP).astype(jnp.bfloat16)
    w_fn_bf = params["w_fn"].astype(jnp.bfloat16)

    # TODO(synk): PromptLearner{Normal,Abnormal} + TextEncoder are not provided; their
    # (un-normalized) text features are synthesized deterministically as inputs.
    tp_pad, sc_pad = fused_head(
        params["normal_text_raw"], params["abnormal_text_raw"],
        w_fn_bf, params["b_fn"], image_features, maps_flat)

    # text_probs = image_features.unsqueeze(1) @ text_features^T   (raw, as in the module)
    text_probs = tp_pad[:, :2].reshape(B, 1, 2)

    # scores[b*L + i*H + j, c] -> A_wide[i, (b*2+c)*H + j]   (tiny layout plumbing)
    scores = sc_pad[:, :2]                                            # [B*L, 2]
    a_wide = jnp.transpose(scores.reshape(B, H, H, 2),
                           (1, 0, 3, 2)).reshape(H, N_MAPS * H)       # [H, N_MAPS*H]

    up = bilinear_upsample(a_wide, params["interp_m"], params["interp_mt_bd"])  # [S, N_MAPS*S]
    anomaly_map = jnp.transpose(up.reshape(IMG_SIZE, B, 2, IMG_SIZE),
                                (1, 2, 0, 3))                         # [B, 2, S, S]
    return text_probs, anomaly_map


# ----------------------------------- main -------------------------------------------
if __name__ == "__main__":
    key = jax.random.PRNGKey(0)
    k_img, k_wfn, k_bfn, k_wcls, k_wmaps, k_nt, k_at = jax.random.split(key, 7)

    img = jax.random.normal(k_img, (B, 3, IMG_SIZE, IMG_SIZE), jnp.float32)

    interp_m = _interp_matrix(IMG_SIZE, H)
    params = {
        # fn_linear = nn.Linear(1024, 768); stored transposed as [in, out]
        "w_fn": 0.02 * jax.random.normal(k_wfn, (D_MAP, D_IMG), jnp.float32),
        "b_fn": 0.02 * jax.random.normal(k_bfn, (1, D_IMG), jnp.float32),
        # deterministic stand-ins for undefined submodules
        "w_cls": 0.05 * jax.random.normal(k_wcls, (3 * PATCH * PATCH, D_IMG), jnp.float32),
        "w_maps": 0.05 * jax.random.normal(k_wmaps, (3 * PATCH * PATCH, D_MAP), jnp.float32),
        "normal_text_raw": jax.random.normal(k_nt, (N_NORMAL, D_IMG), jnp.float32),
        "abnormal_text_raw": jax.random.normal(k_at, (N_ABNORM, D_IMG), jnp.float32),
        "interp_m": jnp.asarray(interp_m),
        "interp_mt_bd": jnp.asarray(_interp_mt_blockdiag(interp_m)),
    }

    forward = jax.jit(anomaly_clip_forward)
    text_probs, anomaly_map = forward(img, params)
    jax.block_until_ready((text_probs, anomaly_map))

    assert text_probs.shape == (B, 1, 2)
    assert anomaly_map.shape == (B, 2, IMG_SIZE, IMG_SIZE)
    assert bool(jnp.all(jnp.isfinite(text_probs)))
    assert bool(jnp.all(jnp.isfinite(anomaly_map)))
    print("KERNEL_OK")
</pallas_src>

<mosaic_0001>
module attributes {stable_mosaic.version = 11 : i64} {
  func.func @_fused_head_kernel(%arg0: memref<8x768xf32, #tpu.memory_space<vmem>>, %arg1: memref<8x768xf32, #tpu.memory_space<vmem>>, %arg2: memref<1024x768xbf16, #tpu.memory_space<vmem>>, %arg3: memref<1x768xf32, #tpu.memory_space<vmem>>, %arg4: memref<2x768xf32, #tpu.memory_space<vmem>>, %arg5: memref<128x1024xbf16, #tpu.memory_space<vmem>>, %arg6: memref<2x128xf32, #tpu.memory_space<vmem>>, %arg7: memref<128x128xf32, #tpu.memory_space<vmem>>) attributes {dimension_semantics = [], scalar_prefetch = 0 : i64, scratch_operands = 0 : i64, tpu.core_type = #tpu.core_type<tc>} {
    %c0 = arith.constant 0 : index
    %c0_0 = arith.constant 0 : index
    %0 = vector.load %arg0[%c0, %c0_0] : memref<8x768xf32, #tpu.memory_space<vmem>>, vector<8x768xf32>
    %c0_1 = arith.constant 0 : index
    %c0_2 = arith.constant 0 : index
    %1 = vector.load %arg1[%c0_1, %c0_2] : memref<8x768xf32, #tpu.memory_space<vmem>>, vector<8x768xf32>
    %2 = arith.mulf %0, %0 : vector<8x768xf32>
    %cst = arith.constant dense<0.000000e+00> : vector<8xf32>
    %3 = vector.multi_reduction <add>, %2, %cst [1] : vector<8x768xf32> to vector<8xf32>
    %4 = vector.shape_cast %3 : vector<8xf32> to vector<8x1xf32>
    %5 = math.rsqrt %4 : vector<8x1xf32>
    %6 = vector.broadcast %5 : vector<8x1xf32> to vector<8x768xf32>
    %7 = arith.mulf %0, %6 : vector<8x768xf32>
    %8 = arith.mulf %1, %1 : vector<8x768xf32>
    %cst_3 = arith.constant dense<0.000000e+00> : vector<8xf32>
    %9 = vector.multi_reduction <add>, %8, %cst_3 [1] : vector<8x768xf32> to vector<8xf32>
    %10 = vector.shape_cast %9 : vector<8xf32> to vector<8x1xf32>
    %11 = math.rsqrt %10 : vector<8x1xf32>
    %12 = vector.broadcast %11 : vector<8x1xf32> to vector<8x768xf32>
    %13 = arith.mulf %1, %12 : vector<8x768xf32>
    %cst_4 = arith.constant dense<0.000000e+00> : vector<768xf32>
    %14 = vector.multi_reduction <add>, %7, %cst_4 [0] : vector<8x768xf32> to vector<768xf32>
    %15 = vector.shape_cast %14 : vector<768xf32> to vector<1x768xf32>
    %cst_5 = arith.constant 8.000000e+00 : f32
    %16 = vector.broadcast %cst_5 : f32 to vector<1x768xf32>
    %17 = arith.divf %15, %16 : vector<1x768xf32>
    %18 = arith.mulf %17, %17 : vector<1x768xf32>
    %19 = vector.shape_cast %18 : vector<1x768xf32> to vector<1x1x768xf32>
    %cst_6 = arith.constant dense<0.000000e+00> : vector<1xf32>
    %20 = vector.multi_reduction <add>, %19, %cst_6 [1, 2] : vector<1x1x768xf32> to vector<1xf32>
    %21 = vector.shape_cast %20 : vector<1xf32> to vector<1x1x1xf32>
    %22 = vector.extract %21[0, 0, 0] : f32 from vector<1x1x1xf32>
    %23 = math.rsqrt %22 : f32
    %24 = vector.broadcast %23 : f32 to vector<1x768xf32>
    %25 = arith.mulf %17, %24 : vector<1x768xf32>
    %cst_7 = arith.constant dense<0.000000e+00> : vector<768xf32>
    %26 = vector.multi_reduction <add>, %13, %cst_7 [0] : vector<8x768xf32> to vector<768xf32>
    %27 = vector.shape_cast %26 : vector<768xf32> to vector<1x768xf32>
    %cst_8 = arith.constant 8.000000e+00 : f32
    %28 = vector.broadcast %cst_8 : f32 to vector<1x768xf32>
    %29 = arith.divf %27, %28 : vector<1x768xf32>
    %30 = arith.mulf %29, %29 : vector<1x768xf32>
    %31 = vector.shape_cast %30 : vector<1x768xf32> to vector<1x1x768xf32>
    %cst_9 = arith.constant dense<0.000000e+00> : vector<1xf32>
    %32 = vector.multi_reduction <add>, %31, %cst_9 [1, 2] : vector<1x1x768xf32> to vector<1xf32>
    %33 = vector.shape_cast %32 : vector<1xf32> to vector<1x1x1xf32>
    %34 = vector.extract %33[0, 0, 0] : f32 from vector<1x1x1xf32>
    %35 = math.rsqrt %34 : f32
    %36 = vector.broadcast %35 : f32 to vector<1x768xf32>
    %37 = arith.mulf %29, %36 : vector<1x768xf32>
    %38 = tpu.iota {dimensions = array<i32: 0>} : vector<128x768xi32>
    %c0_i32 = arith.constant 0 : i32
    %39 = vector.broadcast %c0_i32 : i32 to vector<128x768xi32>
    %40 = arith.cmpi eq, %38, %39 : vector<128x768xi32>
    %c1_i32 = arith.constant 1 : i32
    %41 = vector.broadcast %c1_i32 : i32 to vector<128x768xi32>
    %42 = arith.cmpi eq, %38, %41 : vector<128x768xi32>
    %cst_10 = arith.constant 0.000000e+00 : f32
    %43 = vector.shape_cast %37 : vector<1x768xf32> to vector<1x768xf32>
    %44 = vector.broadcast %43 : vector<1x768xf32> to vector<128x768xf32>
    %45 = vector.broadcast %cst_10 : f32 to vector<128x768xf32>
    %46 = arith.select %42, %44, %45 : vector<128x768xi1>, vector<128x768xf32>
    %47 = vector.shape_cast %25 : vector<1x768xf32> to vector<1x768xf32>
    %48 = vector.broadcast %47 : vector<1x768xf32> to vector<128x768xf32>
    %49 = arith.select %40, %48, %46 : vector<128x768xi1>, vector<128x768xf32>
    %50 = arith.mulf %49, %49 : vector<128x768xf32>
    %51 = vector.shape_cast %50 : vector<128x768xf32> to vector<1x128x768xf32>
    %cst_11 = arith.constant dense<0.000000e+00> : vector<1xf32>
    %52 = vector.multi_reduction <add>, %51, %cst_11 [1, 2] : vector<1x128x768xf32> to vector<1xf32>
    %53 = vector.shape_cast %52 : vector<1xf32> to vector<1x1x1xf32>
    %54 = vector.extract %53[0, 0, 0] : f32 from vector<1x1x1xf32>
    %55 = math.rsqrt %54 : f32
    %56 = vector.broadcast %55 : f32 to vector<128x768xf32>
    %57 = arith.mulf %49, %56 : vector<128x768xf32>
    %58 = tpu.transpose %57, [1, 0] : vector<128x768xf32> -> vector<768x128xf32>
    %59 = arith.truncf %58 : vector<768x128xf32> to vector<768x128xbf16>
    %c0_12 = arith.constant 0 : index
    %c0_13 = arith.constant 0 : index
    %60 = vector.load %arg4[%c0_12, %c0_13] : memref<2x768xf32, #tpu.memory_space<vmem>>, vector<2x768xf32>
    %61 = arith.mulf %60, %60 : vector<2x768xf32>
    %cst_14 = arith.constant dense<0.000000e+00> : vector<2xf32>
    %62 = vector.multi_reduction <add>, %61, %cst_14 [1] : vector<2x768xf32> to vector<2xf32>
    %63 = vector.shape_cast %62 : vector<2xf32> to vector<2x1xf32>
    %64 = math.rsqrt %63 : vector<2x1xf32>
    %65 = vector.broadcast %64 : vector<2x1xf32> to vector<2x768xf32>
    %66 = arith.mulf %60, %65 : vector<2x768xf32>
    %67 = arith.truncf %66 : vector<2x768xf32> to vector<2x768xbf16>
    %cst_15 = arith.constant dense<0.000000e+00> : vector<2x128xf32>
    %68 = tpu.matmul %67, %59, %cst_15 {dimension_numbers = #tpu.dot_dimension_numbers<[1], [0], [0], [1], [0, 0, 1, 1], [], []>} : vector<2x768xbf16>, vector<768x128xbf16>, vector<2x128xf32> -> vector<2x128xf32>
    %c0_16 = arith.constant 0 : index
    %c0_17 = arith.constant 0 : index
    %69 = vector.load %arg6[%c0_16, %c0_17] : memref<2x128xf32, #tpu.memory_space<vmem>>, vector<2x128xf32>
    tpu.vector_store %arg6[%c0_16, %c0_17], %68 {strides = array<i32>} : memref<2x128xf32, #tpu.memory_space<vmem>>, vector<2x128xf32>,
    %c0_18 = arith.constant 0 : index
    %c0_19 = arith.constant 0 : index
    %70 = vector.load %arg2[%c0_18, %c0_19] : memref<1024x768xbf16, #tpu.memory_space<vmem>>, vector<1024x768xbf16>
    %cst_20 = arith.constant dense<0.000000e+00> : vector<1024x128xf32>
    %71 = tpu.matmul %70, %59, %cst_20 {dimension_numbers = #tpu.dot_dimension_numbers<[1], [0], [0], [1], [0, 0, 1, 1], [], []>} : vector<1024x768xbf16>, vector<768x128xbf16>, vector<1024x128xf32> -> vector<1024x128xf32>
    %c0_21 = arith.constant 0 : index
    %c0_22 = arith.constant 0 : index
    %72 = vector.load %arg3[%c0_21, %c0_22] : memref<1x768xf32, #tpu.memory_space<vmem>>, vector<1x768xf32>
    %cst_23 = arith.constant dense<0.000000e+00> : vector<1x128xf32>
    %73 = tpu.matmul %72, %58, %cst_23 {dimension_numbers = #tpu.dot_dimension_numbers<[1], [0], [0], [1], [0, 0, 1, 1], [], []>} : vector<1x768xf32>, vector<768x128xf32>, vector<1x128xf32> -> vector<1x128xf32>
    %c0_24 = arith.constant 0 : index
    %c0_25 = arith.constant 0 : index
    %74 = vector.load %arg5[%c0_24, %c0_25] : memref<128x1024xbf16, #tpu.memory_space<vmem>>, vector<128x1024xbf16>
    %75 = arith.truncf %71 : vector<1024x128xf32> to vector<1024x128xbf16>
    %cst_26 = arith.constant dense<0.000000e+00> : vector<128x128xf32>
    %76 = tpu.matmul %74, %75, %cst_26 {dimension_numbers = #tpu.dot_dimension_numbers<[1], [0], [0], [1], [0, 0, 1, 1], [], []>} : vector<128x1024xbf16>, vector<1024x128xbf16>, vector<128x128xf32> -> vector<128x128xf32>
    %77 = vector.broadcast %73 : vector<1x128xf32> to vector<128x128xf32>
    %78 = arith.addf %76, %77 : vector<128x128xf32>
    %c0_27 = arith.constant 0 : index
    %c0_28 = arith.constant 0 : index
    %79 = vector.load %arg7[%c0_27, %c0_28] : memref<128x128xf32, #tpu.memory_space<vmem>>, vector<128x128xf32>
    tpu.vector_store %arg7[%c0_27, %c0_28], %78 {strides = array<i32>} : memref<128x128xf32, #tpu.memory_space<vmem>>, vector<128x128xf32>,
    return
  }
}

module attributes {stable_mosaic.version = 11 : i64} {
  func.func @_upsample_kernel(%arg0: memref<8x32xf32, #tpu.memory_space<vmem>>, %arg1: memref<32x8xf32, #tpu.memory_space<vmem>>, %arg2: memref<32x128xf32, #tpu.memory_space<vmem>>, %arg3: memref<32x128xf32, #tpu.memory_space<vmem>>) attributes {dimension_semantics = [], scalar_prefetch = 0 : i64, scratch_operands = 0 : i64, tpu.core_type = #tpu.core_type<tc>} {
    %c0 = arith.constant 0 : index
    %c0_0 = arith.constant 0 : index
    %0 = vector.load %arg1[%c0, %c0_0] : memref<32x8xf32, #tpu.memory_space<vmem>>, vector<32x8xf32>
    %c0_1 = arith.constant 0 : index
    %c0_2 = arith.constant 0 : index
    %1 = vector.load %arg0[%c0_1, %c0_2] : memref<8x32xf32, #tpu.memory_space<vmem>>, vector<8x32xf32>
    %cst = arith.constant dense<0.000000e+00> : vector<32x32xf32>
    %2 = tpu.matmul %0, %1, %cst {dimension_numbers = #tpu.dot_dimension_numbers<[1], [0], [0], [1], [0, 0, 1, 1], [], []>} : vector<32x8xf32>, vector<8x32xf32>, vector<32x32xf32> -> vector<32x32xf32>
    %c0_3 = arith.constant 0 : index
    %c0_4 = arith.constant 0 : index
    %3 = vector.load %arg2[%c0_3, %c0_4] : memref<32x128xf32, #tpu.memory_space<vmem>>, vector<32x128xf32>
    %cst_5 = arith.constant dense<0.000000e+00> : vector<32x128xf32>
    %4 = tpu.matmul %2, %3, %cst_5 {dimension_numbers = #tpu.dot_dimension_numbers<[1], [0], [0], [1], [0, 0, 1, 1], [], []>} : vector<32x32xf32>, vector<32x128xf32>, vector<32x128xf32> -> vector<32x128xf32>
    %c0_6 = arith.constant 0 : index
    %c0_7 = arith.constant 0 : index
    %5 = vector.load %arg3[%c0_6, %c0_7] : memref<32x128xf32, #tpu.memory_space<vmem>>, vector<32x128xf32>
    tpu.vector_store %arg3[%c0_6, %c0_7], %4 {strides = array<i32>} : memref<32x128xf32, #tpu.memory_space<vmem>>, vector<32x128xf32>,
    return
  }
}

</mosaic_0001>

<bundles_post_ra>
// kernel: anomaly_clip_forward.3
= control target key start
LH: loop header
LB: loop body
LE: loop exit
PB: predicated region body
PF: predicated region fallthrough
CT: control target
= control target key end

     0   :  { %vm19_vm0 = vcmask 64512   ;;  %vm121_vm1 = vcmask 261120   ;;  %s341_s0 = inlined_call_operand.vmem [shape: f32[8,32], index: 0, kind: input, shape index: {}]   ;;  %s342_s1 = inlined_call_operand.vmem [shape: f32[32,8], index: 1, kind: input, shape index: {}]   ;;  %s343_s2 = inlined_call_operand.vmem [shape: f32[32,128], index: 2, kind: input, shape index: {}]   ;;  %s344_s3 = inlined_call_operand.vmem [shape: f32[32,128], index: 3, kind: output, shape index: {}]  }
   0x1   :  { %v18_v0 = vld [vmem:[%s341_s0] sm:$0xff]  ;;  %v15_v2 = vld [vmem:[%s342_s1 + $0x8] sm:$0xff]  ;;  %v16_v3 = vld [vmem:[%s342_s1 + $0x10] sm:$0xff] }
   0x2   :  { %v14_v1 = vld [vmem:[%s342_s1] sm:$0xff]  ;;  %248 = vmatprep.subr.mxu0 %v18_v0  ;;  %v120_v4 = vld [vmem:[%s343_s2 + $0x18] sm:$0xff]  ;;  %v119_v5 = vld [vmem:[%s343_s2 + $0x10] sm:$0xff] }
   0x3   :  { %250 = vmatprep.mubr.msk.f32.mxu0 %vm19_vm0, %v14_v1  ;;  %249 = vmatpush3.msra.mxu0 %v18_v0  ;;  %v17_v6 = vld [vmem:[%s342_s1 + $0x18] sm:$0xff]  ;;  %v118_v7 = vld [vmem:[%s343_s2 + $0x8] sm:$0xff]  ;;  %v117_v8 = vld [vmem:[%s343_s2] sm:$0xff] }
   0x4   :  { %270 = vmatprep.subr.mxu1 %v120_v4  ;;  %251 = vmatmul.mubr.msk.f32.vlgmr.msra.gmra.mxu0 %vm19_vm0, %v15_v2 }
   0x5   :  { %256 = vmatprep.subr.mxu0 %v120_v4  ;;  %253 = vmatprep.mubr.msk.f32.mxu0 %vm19_vm0, %v16_v3 }
   0x6   :  { %257 = vmatpush3.msra.mxu0 %v120_v4  ;;  %274 = vmatpush3.msra.mxu1 %v120_v4 }
   0x7   :  { %258 = vmatprep.subr.mxu0 %v119_v5  ;;  %271 = vmatprep.subr.mxu1 %v119_v5 }
   0x8   :  { %259 = vmatpush3.msra.mxu0 %v119_v5  ;;  %275 = vmatpush3.msra.mxu1 %v119_v5 }
   0x9   :  { %254 = vmatmul.mubr.msk.f32.gmra.mxu0 %vm19_vm0, %v17_v6  ;;  %260 = vmatprep.subr.mxu0 %v118_v7 }
   0xa   :  { %272 = vmatprep.subr.mxu1 %v118_v7  ;;  %261 = vmatpush3.msra.mxu0 %v118_v7 }
   0xb   :  { %276 = vmatpush3.msra.mxu1 %v118_v7  ;;  %262 = vmatprep.subr.mxu0 %v117_v8 }
   0xc   :  { %273 = vmatprep.subr.mxu1 %v117_v8  ;;  %263 = vmatpush3.msra.mxu0 %v117_v8 }
   0xd   :  { %277 = vmatpush3.msra.mxu1 %v117_v8 }
  0xc4   :  { %v252_v9 = vpop.f32.mrf.mxu0 }
  0xc6   :  { %v98_v10 = vpop.f32.mrf.mxu0 }
  0xc7   :  { %264 = vmatprep.mubr.msk.f32.mxu0 %vm121_vm1, %v98_v10 }
  0xc8   :  { %265 = vmatmul.mubr.msk.f32.vlgmr.msra.gmra.mxu0 %vm121_vm1, %v252_v9 }
  0xc9   :  { %v255_v11 = vpop.f32.mrf.mxu0 }
  0xcb   :  { %v108_v12 = vpop.f32.mrf.mxu0 }
  0xcc   :  { %267 = vmatprep.mubr.msk.f32.mxu1 %vm121_vm1, %v108_v12 }
  0xcd   :  { %268 = vmatmul.mubr.msk.f32.vlgmr.msra.gmra.mxu1 %vm121_vm1, %v255_v11 }
 0x188   :  { %v266_v13 = vpop.f32.mrf.mxu0 }
 0x189   :  { %220 = vst [vmem:[%s344_s3 + $0x8] sm:$0xff] %v266_v13 }
 0x18a   :  { %v200_v14 = vpop.f32.mrf.mxu0 }
 0x18b   :  { %219 = vst [vmem:[%s344_s3] sm:$0xff] %v200_v14 }
 0x18d   :  { %v269_v15 = vpop.f32.mrf.mxu1 }
 0x18e   :  { %222 = vst [vmem:[%s344_s3 + $0x18] sm:$0xff] %v269_v15 }
 0x18f   :  { %v210_v16 = vpop.f32.mrf.mxu1 }
 0x190   :  { %221 = vst [vmem:[%s344_s3 + $0x10] sm:$0xff] %v210_v16 }

// kernel: anomaly_clip_forward.2
= control target key start
LH: loop header
LB: loop body
LE: loop exit
PB: predicated region body
PF: predicated region fallthrough
CT: control target
= control target key end

     0   :  { %s11693_s0 = inlined_call_operand.vmem [shape: f32[8,768], index: 0, kind: input, shape index: {}]   ;;  %s11694_s1 = inlined_call_operand.vmem [shape: f32[8,768], index: 1, kind: input, shape index: {}]   ;;  %s11695_s2 = inlined_call_operand.vmem [shape: bf16[1024,768], index: 2, kind: input, shape index: {}]   ;;  %s11696_s3 = inlined_call_operand.vmem [shape: f32[1,768], index: 3, kind: input, shape index: {}]   ;;  %s11697_s4 = inlined_call_operand.vmem [shape: f32[2,768], index: 4, kind: input, shape index: {}]   ;;  %s11698_s5 = inlined_call_operand.vmem [shape: bf16[128,1024], index: 5, kind: input, shape index: {}]   ;;  %s11699_s6 = inlined_call_operand.hbm [shape: f32[2,128], index: 6, kind: output, shape index: {0}]   ;;  %s11700_s7 = inlined_call_operand.vmem [shape: f32[128,128], index: 7, kind: output, shape index: {1}]  }
   0x1   :  { %v27_v0 = vld [vmem:[%s11693_s0] sm:$0xff]  ;;  %v28_v1 = vld [vmem:[%s11693_s0 + $0x8] sm:$0xff]  ;;  %v29_v2 = vld [vmem:[%s11693_s0 + $0x10] sm:$0xff] }
   0x2   :  { %v30_v3 = vld [vmem:[%s11693_s0 + $0x18] sm:$0xff]  ;;  %v31_v4 = vld [vmem:[%s11693_s0 + $0x20] sm:$0xff]  ;;  %v39_v5 = vmul.f32 %v27_v0, %v27_v0  ;;  %v40_v6 = vmul.f32 %v28_v1, %v28_v1  ;;  %v41_v7 = vmul.f32 %v29_v2, %v29_v2  ;;  %v34_v10 = vld [vmem:[%s11694_s1 + $0x8] sm:$0xff] }
   0x3   :  { %v42_v8 = vmul.f32 %v30_v3, %v30_v3  ;;  %v33_v9 = vld [vmem:[%s11694_s1] sm:$0xff]  ;;  %v7897_v11 = vld [vmem:[%s11694_s1 + $0x10] sm:$0xff]  ;;  %v32_v12 = vld [vmem:[%s11693_s0 + $0x28] sm:$0xff]  ;;  %v60_v17 = vmul.f32 %v34_v10, %v34_v10  ;;  %v43_v20 = vmul.f32 %v31_v4, %v31_v4 }
   0x4   :  { %v45_v13 = vadd.f32 %v40_v6, %v39_v5  ;;  %v7905_v14 = vld [vmem:[%s11694_s1 + $0x18] sm:$0xff]  ;;  %v7910_v15 = vld [vmem:[%s11694_s1 + $0x20] sm:$0xff]  ;;  %v59_v16 = vmul.f32 %v33_v9, %v33_v9  ;;  %v61_v18 = vmul.f32 %v7897_v11, %v7897_v11  ;;  %v7917_v19 = vld [vmem:[%s11694_s1 + $0x28] sm:$0xff]  ;;  %v44_v24 = vmul.f32 %v32_v12, %v32_v12 }
   0x5   :  { %v62_v22 = vmul.f32 %v7905_v14, %v7905_v14  ;;  %v63_v26 = vmul.f32 %v7910_v15, %v7910_v15  ;;  %v64_v29 = vmul.f32 %v7917_v19, %v7917_v19 }
   0x6   :  { %v46_v21 = vadd.f32 %v45_v13, %v41_v7  ;;  %v65_v23 = vadd.f32 %v60_v17, %v59_v16 }
   0x8   :  { %v47_v25 = vadd.f32 %v46_v21, %v42_v8  ;;  %v66_v27 = vadd.f32 %v65_v23, %v61_v18 }
   0xa   :  { %v48_v28 = vadd.f32 %v47_v25, %v43_v20  ;;  %v67_v30 = vadd.f32 %v66_v27, %v62_v22 }
   0xc   :  { %v49_v31 = vadd.f32 %v48_v28, %v44_v24  ;;  %v68_v32 = vadd.f32 %v67_v30, %v63_v26 }
   0xe   :  { %50 = vadd.xlane.f32.xlu0 %v49_v31  ;;  %v69_v33 = vadd.f32 %v68_v32, %v64_v29 }
  0x12   :  { %70 = vadd.xlane.f32.xlu0 %v69_v33 }
  0x13   :  { %13 = vsyncpa [#allocation3], 0  ;;  %vm128_vm0 = vcmask 1040384   ;;  %vm1055_vm3 = vcmask 1041408  }
  0x97   :  { %v51_v34 = vpop.xlane.xlu0 %50 }
  0x98   :  { %7795 = vrsqrt.f32 %v51_v34 }
  0x9b   :  { %v71_v35 = vpop.xlane.xlu0 %70 }
  0x9c   :  { %7797 = vrsqrt.f32 %v71_v35 }
  0xa5   :  { %v7796_v36 = vpop.eup %7795 }
  0xa6   :  { %v53_v37 = vmul.f32 %v7796_v36, %v27_v0  ;;  %v54_v38 = vmul.f32 %v7796_v36, %v28_v1  ;;  %v55_v39 = vmul.f32 %v7796_v36, %v29_v2  ;;  %v56_v40 = vmul.f32 %v7796_v36, %v30_v3 }
  0xa7   :  { %v57_v41 = vmul.f32 %v7796_v36, %v31_v4  ;;  %v58_v42 = vmul.f32 %v7796_v36, %v32_v12 }
  0xa8   :  { %v79_v43 = vrot.slane %v53_v37, 4  ;;  %v85_v44 = vrot.slane %v54_v38, 4  ;;  %v91_v45 = vrot.slane %v55_v39, 4  ;;  %v97_v46 = vrot.slane %v56_v40, 4 }
  0xa9   :  { %v103_v47 = vrot.slane %v57_v41, 4  ;;  %v109_v48 = vrot.slane %v58_v42, 4  ;;  %v7798_v49 = vpop.eup %7797 }
  0xaa   :  { %v80_v50 = vadd.f32 %v79_v43, %v53_v37  ;;  %v86_v51 = vadd.f32 %v85_v44, %v54_v38  ;;  %v92_v52 = vadd.f32 %v91_v45, %v55_v39  ;;  %v98_v53 = vadd.f32 %v97_v46, %v56_v40 }
  0xab   :  { %v104_v54 = vadd.f32 %v103_v47, %v57_v41  ;;  %v110_v55 = vadd.f32 %v109_v48, %v58_v42  ;;  %v73_v62 = vmul.f32 %v7798_v49, %v33_v9  ;;  %v74_v63 = vmul.f32 %v7798_v49, %v34_v10 }
  0xac   :  { %v81_v56 = vrot.slane %v80_v50, 2  ;;  %v87_v57 = vrot.slane %v86_v51, 2  ;;  %v93_v58 = vrot.slane %v92_v52, 2  ;;  %v99_v59 = vrot.slane %v98_v53, 2 }
  0xad   :  { %v105_v60 = vrot.slane %v104_v54, 2  ;;  %v111_v61 = vrot.slane %v110_v55, 2  ;;  %v75_v6 = vmul.f32 %v7798_v49, %v7897_v11  ;;  %v76_v7 = vmul.f32 %v7798_v49, %v7905_v14 }
  0xae   :  { %v82_v0 = vadd.f32 %v81_v56, %v80_v50  ;;  %v88_v1 = vadd.f32 %v87_v57, %v86_v51  ;;  %v94_v2 = vadd.f32 %v93_v58, %v92_v52  ;;  %v100_v3 = vadd.f32 %v99_v59, %v98_v53 }
  0xaf   :  { %v106_v4 = vadd.f32 %v105_v60, %v104_v54  ;;  %v112_v5 = vadd.f32 %v111_v61, %v110_v55  ;;  %v159_v20 = vrot.slane %v73_v62, 4  ;;  %v165_v21 = vrot.slane %v74_v63, 4 }
  0xb0   :  { %v83_v8 = vrot.slane %v82_v0, 1  ;;  %v89_v12 = vrot.slane %v88_v1, 1  ;;  %v95_v13 = vrot.slane %v94_v2, 1  ;;  %v101_v16 = vrot.slane %v100_v3, 1 }
  0xb1   :  { %v107_v17 = vrot.slane %v106_v4, 1  ;;  %v113_v18 = vrot.slane %v112_v5, 1  ;;  %v160_v26 = vadd.f32 %v159_v20, %v73_v62  ;;  %v166_v27 = vadd.f32 %v165_v21, %v74_v63 }
  0xb2   :  { %v84_v9 = vadd.f32 %v83_v8, %v82_v0  ;;  %v90_v10 = vadd.f32 %v89_v12, %v88_v1  ;;  %v96_v22 = vadd.f32 %v95_v13, %v94_v2  ;;  %v102_v23 = vadd.f32 %v101_v16, %v100_v3 }
  0xb3   :  { %v108_v24 = vadd.f32 %v107_v17, %v106_v4  ;;  %v114_v25 = vadd.f32 %v113_v18, %v112_v5  ;;  %v161_v32 = vrot.slane %v160_v26, 2  ;;  %v167_v33 = vrot.slane %v166_v27, 2 }
  0xb4   :  { %v7927_v28 = vmul.f32 0.125, %v84_v9  ;;  %v7929_v11 = vmul.f32 0.125, %v90_v10  ;;  %v7931_v14 = vmul.f32 0.125, %v96_v22  ;;  %v7933_v29 = vmul.f32 0.125, %v102_v23 }
  0xb5   :  { %v7935_v30 = vmul.f32 0.125, %v108_v24  ;;  %v7937_v31 = vmul.f32 0.125, %v114_v25  ;;  %v77_v37 = vmul.f32 %v7798_v49, %v7910_v15  ;;  %v78_v39 = vmul.f32 %v7798_v49, %v7917_v19 }
  0xb6   :  { %v122_v34 = vmul.f32 %v7927_v28, %v7927_v28  ;;  %v123_v35 = vmul.f32 %v7929_v11, %v7929_v11  ;;  %v124_v36 = vmul.f32 %v7931_v14, %v7931_v14  ;;  %v125_v38 = vmul.f32 %v7933_v29, %v7933_v29 }
  0xb7   :  { %v162_v40 = vadd.f32 %v161_v32, %v160_v26  ;;  %v168_v41 = vadd.f32 %v167_v33, %v166_v27  ;;  %v126_v42 = vmul.f32 %v7935_v30, %v7935_v30  ;;  %v127_v45 = vmul.f32 %v7937_v31, %v7937_v31 }
  0xb8   :  { %v129_v43 = vsel %vm128_vm0, %v122_v34, 0.0  ;;  %v130_v44 = vsel %vm128_vm0, %v123_v35, 0.0  ;;  %v132_v15 = vsel %vm128_vm0, %v124_v36, 0.0  ;;  %v171_v50 = vrot.slane %v75_v6, 4 }
  0xb9   :  { %v131_v46 = vadd.f32 %v130_v44, %v129_v43  ;;  %v163_v47 = vrot.slane %v162_v40, 1  ;;  %v169_v48 = vrot.slane %v168_v41, 1  ;;  %v177_v51 = vrot.slane %v76_v7, 4 }
  0xba   :  { %v183_v19 = vrot.slane %v77_v37, 4  ;;  %v134_v52 = vsel %vm128_vm0, %v125_v38, 0.0  ;;  %v189_v54 = vrot.slane %v78_v39, 4  ;;  %v172_v56 = vadd.f32 %v171_v50, %v75_v6 }
  0xbb   :  { %v133_v49 = vadd.f32 %v132_v15, %v131_v46  ;;  %v164_v53 = vadd.f32 %v163_v47, %v162_v40  ;;  %v170_v55 = vadd.f32 %v169_v48, %v168_v41  ;;  %v178_v57 = vadd.f32 %v177_v51, %v76_v7 }
  0xbc   :  { %v184_v58 = vadd.f32 %v183_v19, %v77_v37  ;;  %v136_v60 = vsel %vm128_vm0, %v126_v42, 0.0  ;;  %v190_v61 = vadd.f32 %v189_v54, %v78_v39  ;;  %v173_v63 = vrot.slane %v172_v56, 2 }
  0xbd   :  { %v135_v59 = vadd.f32 %v134_v52, %v133_v49  ;;  %v7958_v62 = vmul.f32 0.125, %v164_v53  ;;  %v179_v0 = vrot.slane %v178_v57, 2  ;;  %v7960_v2 = vmul.f32 0.125, %v170_v55 }
  0xbe   :  { %v185_v1 = vrot.slane %v184_v58, 2  ;;  %v138_v4 = vsel %vm128_vm0, %v127_v45, 0.0  ;;  %v191_v5 = vrot.slane %v190_v61, 2  ;;  %v174_v7 = vadd.f32 %v173_v63, %v172_v56 }
  0xbf   :  { %v137_v3 = vadd.f32 %v136_v60, %v135_v59  ;;  %v201_v6 = vmul.f32 %v7958_v62, %v7958_v62  ;;  %v180_v8 = vadd.f32 %v179_v0, %v178_v57  ;;  %v202_v13 = vmul.f32 %v7960_v2, %v7960_v2 }
  0xc0   :  { %v186_v12 = vadd.f32 %v185_v1, %v184_v58  ;;  %v192_v17 = vadd.f32 %v191_v5, %v190_v61  ;;  %v175_v18 = vrot.slane %v174_v7, 1  ;;  %v237_v1 = vlaneseq }
  0xc1   :  { %v139_v16 = vadd.f32 %v138_v4, %v137_v3  ;;  %v181_v20 = vrot.slane %v180_v8, 1  ;;  %v207_v10 = vsel %vm128_vm0, %v201_v6, 0.0  ;;  %v208_v25 = vsel %vm128_vm0, %v202_v13, 0.0 }
  0xc2   :  { %v187_v21 = vrot.slane %v186_v12, 1  ;;  %v193_v9 = vrot.slane %v192_v17, 1  ;;  %v176_v22 = vadd.f32 %v175_v18, %v174_v7  ;;  %v209_v35 = vadd.f32 %v208_v25, %v207_v10 }
  0xc3   :  { %140 = vadd.xlane.f32.xlu1 %v139_v16  ;;  %v182_v23 = vadd.f32 %v181_v20, %v180_v8  ;;  %v7973_v3 = vshrl.u32 %v237_v1, 7 }
  0xc4   :  { %v188_v24 = vadd.f32 %v187_v21, %v186_v12  ;;  %v194_v26 = vadd.f32 %v193_v9, %v192_v17  ;;  %v197_v27 = vmul.f32 0.125, %v176_v22 }
  0xc5   :  { %v198_v32 = vmul.f32 0.125, %v182_v23  ;;  %11810 = vst [vmem:[#allocation5_spill] sm:$0xff] %v7973_v3  ;;  %vm270_vm1 = vcmp.eq.s32.totalorder %v7973_v3, 1  ;;  %vm254_vm2 = vcmp.eq.s32.totalorder %v7973_v3, 0 }
  0xc6   :  { %v199_v33 = vmul.f32 0.125, %v188_v24  ;;  %v200_v34 = vmul.f32 0.125, %v194_v26  ;;  %v203_v36 = vmul.f32 %v197_v27, %v197_v27 }
  0xc7   :  { %v204_v37 = vmul.f32 %v198_v32, %v198_v32 }
  0xc8   :  { %v205_v38 = vmul.f32 %v199_v33, %v199_v33  ;;  %v206_v39 = vmul.f32 %v200_v34, %v200_v34  ;;  %v210_v40 = vsel %vm128_vm0, %v203_v36, 0.0 }
  0xc9   :  { %v212_v41 = vsel %vm128_vm0, %v204_v37, 0.0  ;;  %v211_v42 = vadd.f32 %v210_v40, %v209_v35 }
  0xca   :  { %v214_v43 = vsel %vm128_vm0, %v205_v38, 0.0  ;;  %v216_v45 = vsel %vm128_vm0, %v206_v39, 0.0 }
  0xcb   :  { %v213_v44 = vadd.f32 %v212_v41, %v211_v42 }
  0xcd   :  { %v215_v46 = vadd.f32 %v214_v43, %v213_v44  ;;  %v1018_v44 = vld [vmem:[%s11697_s4] sm:$0xff] }
  0xcf   :  { %v217_v15 = vadd.f32 %v216_v45, %v215_v46  ;;  %v1020_v45 = vmul.f32 %v1018_v44, %v1018_v44 }
  0xd1   :  { %218 = vadd.xlane.f32.xlu1 %v217_v15 }
 0x14c   :  { %v141_v47 = vpop.xlane.xlu1 %140 }
 0x14d   :  { %v142_v48 = vrot.slane %v141_v47, 4 }
 0x14f   :  { %v143_v50 = vadd.f32 %v142_v48, %v141_v47  ;;  %v1024_v47 = vcombine.high %v1020_v45, %v1020_v45 }
 0x151   :  { %v144_v51 = vrot.slane %v143_v50, 2 }
 0x153   :  { %v145_v19 = vadd.f32 %v144_v51, %v143_v50 }
 0x155   :  { %v146_v49 = vrot.slane %v145_v19, 1 }
 0x157   :  { %v147_v52 = vadd.f32 %v146_v49, %v145_v19  ;;  %v8042_v49 = vld [vmem:[%s11697_s4 + $0x8] sm:$0xf] }
 0x159   :  { %7203 = vpush %v147_v52 }
 0x15a   :  { %v219_v53 = vpop.xlane.xlu1 %218 }
 0x15b   :  { %v220_v54 = vrot.slane %v219_v53, 4 }
 0x15d   :  { %v221_v55 = vadd.f32 %v220_v54, %v219_v53  ;;  %v1021_v53 = vmul.f32 %v8042_v49, %v8042_v49 }
 0x15f   :  { %v222_v57 = vrot.slane %v221_v55, 2 }
 0x161   :  { %v223_v58 = vadd.f32 %v222_v57, %v221_v55 }
 0x163   :  { %v224_v59 = vrot.slane %v223_v58, 1 }
 0x165   :  { %v225_v61 = vadd.f32 %v224_v59, %v223_v58 }
 0x18a   :  { %s7204_s0 = spop %7203 }
 0x18b   :  { %v149_v56 = vstv %s7204_s0 }
 0x18c   :  { %7799 = vrsqrt.f32 %v149_v56 }
 0x199   :  { %v7800_v60 = vpop.eup %7799 }
 0x19a   :  { %7205 = vpush %v7800_v60 }
 0x19b   :  { %7207 = vpush %v225_v61 }
 0x1cb   :  { %s7206_s1 = spop %7205 }
 0x1cc   :  { %s7208_s25 = spop %7207  ;;  %v152_v4 = vstv %s7206_s1 }
 0x1cd   :  { %v227_v63 = vstv %s7208_s25  ;;  %v153_v13 = vmul.f32 %v152_v4, %v7927_v28  ;;  %v154_v16 = vmul.f32 %v152_v4, %v7929_v11  ;;  %v155_v18 = vmul.f32 %v152_v4, %v7931_v14 }
 0x1ce   :  { %7801 = vrsqrt.f32 %v227_v63  ;;  %v156_v14 = vmul.f32 %v152_v4, %v7933_v29  ;;  %v157_v25 = vmul.f32 %v152_v4, %v7935_v30 }
 0x1db   :  { %v7802_v0 = vpop.eup %7801 }
 0x1dc   :  { %7209 = vpush %v7802_v0 }
 0x20d   :  { %s7210_s26 = spop %7209 }
 0x20e   :  { %v230_v5 = vstv %s7210_s26 }
 0x20f   :  { %v231_v6 = vmul.f32 %v230_v5, %v7958_v62  ;;  %v232_v7 = vmul.f32 %v230_v5, %v7960_v2  ;;  %v233_v8 = vmul.f32 %v230_v5, %v197_v27  ;;  %v234_v12 = vmul.f32 %v230_v5, %v198_v32 }
 0x210   :  { %v235_v17 = vmul.f32 %v230_v5, %v199_v33  ;;  %v236_v9 = vmul.f32 %v230_v5, %v200_v34  ;;  %v158_v33 = vmul.f32 %v152_v4, %v7937_v31  ;;  %v7829_v31 = vmov 1983009808  }
 0x211   :  { %v286_v20 = vsel %vm270_vm1, %v231_v6, 0.0  ;;  %v287_v21 = vsel %vm270_vm1, %v232_v7, 0.0  ;;  %v288_v62 = vsel %vm270_vm1, %v233_v8, 0.0  ;;  %v289_v2 = vsel %vm270_vm1, %v234_v12, 0.0 }
 0x212   :  { %v7992_v28 = vsel %vm254_vm2, %v153_v13, %v286_v20  ;;  %v7996_v11 = vsel %vm254_vm2, %v154_v16, %v287_v21  ;;  %v8001_v10 = vsel %vm254_vm2, %v155_v18, %v288_v62  ;;  %v290_v22 = vsel %vm270_vm1, %v235_v17, 0.0 }
 0x213   :  { %v478_v23 = vmul.f32 %v7992_v28, %v7992_v28  ;;  %v479_v24 = vmul.f32 %v7996_v11, %v7996_v11  ;;  %v385_v26 = vsel %vm254_vm2, %v156_v14, %v289_v2  ;;  %v291_v29 = vsel %vm270_vm1, %v236_v9, 0.0 }
 0x214   :  { %v480_v27 = vmul.f32 %v8001_v10, %v8001_v10  ;;  %v8019_v34 = vsel %vm254_vm2, %v157_v25, %v290_v22  ;;  %v481_v35 = vmul.f32 %v385_v26, %v385_v26  ;;  %v8023_v30 = vsel %vm254_vm2, %v158_v33, %v291_v29 }
 0x215   :  { %v574_v32 = vadd.f32 %v479_v24, %v478_v23  ;;  %v482_v37 = vmul.f32 %v8019_v34, %v8019_v34  ;;  %v483_v39 = vmul.f32 %v8023_v30, %v8023_v30  ;;  %v1026_v42 = vunpack.c.l.s4 %v7829_v31 }
 0x216   :  { %v7830_v2 = vmov 269488144  }
 0x217   :  { %v575_v36 = vadd.f32 %v574_v32, %v480_v27  ;;  %v1027_v43 = vunpack.c.0.s8 %v1026_v42  ;;  %v1072_v14 = vunpack.c.l.s4 %v7830_v2 }
 0x219   :  { %v576_v38 = vadd.f32 %v575_v36, %v481_v35  ;;  %v8033_v46 = vsub.s32 %v1027_v43, %v7973_v3  ;;  %v1073_v22 = vunpack.c.0.s8 %v1072_v14 }
 0x21b   :  { %v577_v40 = vadd.f32 %v576_v38, %v482_v37  ;;  %v1031_v15 = vrot.slane %v1020_v45, %v8033_v46  ;;  %v1038_v50 = vrot.slane %v1024_v47, %v8033_v46  ;;  %v1047_v57 = vrot.slane %v1021_v53, %v8033_v46 }
 0x21c   :  { %v1076_v24 = vsub.s32 %v1073_v22, %v7973_v3 }
 0x21d   :  { %v578_v41 = vadd.f32 %v577_v40, %v483_v39  ;;  %v1039_v48 = vcombine.high %v1031_v15, %v1031_v15  ;;  %v1056_v51 = vsel %vm1055_vm3, %v1031_v15, 0.0  ;;  %v1040_v54 = vcombine.high %v1038_v50, %v1038_v50 }
 0x21e   :  { %v1059_v55 = vsel %vm1055_vm3, %v1038_v50, 0.0  ;;  %v1048_v60 = vcombine.high %v1047_v57, %v1047_v57  ;;  %v1063_v61 = vsel %vm1055_vm3, %v1047_v57, 0.0 }
 0x21f   :  { %669 = vadd.xlane.f32.xlu0 %v578_v41  ;;  %v1057_v19 = vsel %vm1055_vm3, %v1039_v48, 0.0  ;;  %v1061_v58 = vsel %vm1055_vm3, %v1040_v54, 0.0 }
 0x220   :  { %v1058_v52 = vadd.f32 %v1057_v19, %v1056_v51  ;;  %v1065_v0 = vsel %vm1055_vm3, %v1048_v60, 0.0 }
 0x222   :  { %v1060_v56 = vadd.f32 %v1059_v55, %v1058_v52 }
 0x224   :  { %v1062_v59 = vadd.f32 %v1061_v58, %v1060_v56 }
 0x226   :  { %v1064_v63 = vadd.f32 %v1063_v61, %v1062_v59 }
 0x228   :  { %v1066_v1 = vadd.f32 %v1065_v0, %v1064_v63 }
 0x22a   :  { %1067 = vadd.xlane.f32.xlu0 %v1066_v1 }
 0x2a8   :  { %v670_v4 = vpop.xlane.xlu0 %669 }
 0x2a9   :  { %v671_v5 = vrot.slane %v670_v4, 4 }
 0x2ab   :  { %v672_v6 = vadd.f32 %v671_v5, %v670_v4 }
 0x2ad   :  { %v673_v7 = vrot.slane %v672_v6, 2 }
 0x2af   :  { %v674_v8 = vadd.f32 %v673_v7, %v672_v6 }
 0x2b1   :  { %v675_v12 = vrot.slane %v674_v8, 1 }
 0x2b3   :  { %v676_v13 = vadd.f32 %v675_v12, %v674_v8  ;;  %v1068_v18 = vpop.xlane.xlu0 %1067 }
 0x2b5   :  { %7211 = vpush %v676_v13 }
 0x2e6   :  { %s7212_s4 = spop %7211 }
 0x2e7   :  { %v678_v16 = vstv %s7212_s4 }
 0x2e8   :  { %7803 = vrsqrt.f32 %v678_v16 }
 0x2e9   :  { %7805 = vrsqrt.f32 %v1068_v18 }
 0x2f5   :  { %v7804_v17 = vpop.eup %7803 }
 0x2f6   :  { %7213 = vpush %v7804_v17  ;;  %v7806_v23 = vpop.eup %7805 }
 0x327   :  { %s7214_s8 = spop %7213 }
 0x328   :  { %v8051_v20 = vstv %s7214_s8 }
 0x329   :  { %v685_v21 = vmul.f32 %v8051_v20, %v385_v26  ;;  %v684_v62 = vmul.f32 %v8051_v20, %v8001_v10  ;;  %v8057_v9 = vmul.f32 0.0, %v8051_v20  ;;  %v8066_v10 = vrot.slane %v7806_v23, %v1076_v24 }
 0x32a   :  { %v683_v37 = vmul.f32 %v8051_v20, %v7996_v11  ;;  %v682_v38 = vmul.f32 %v8051_v20, %v7992_v28  ;;  %v687_v39 = vmul.f32 %v8051_v20, %v8023_v30  ;;  %v686_v18 = vmul.f32 %v8051_v20, %v8019_v34 }
 0x32b   :  { %874 = vxpose.xlu1.b32.start [1/16] %v685_v21, 128  ;;  %842 = vxpose.xlu0.b32.start [1/16] %v684_v62, 128  ;;  %v1079_v25 = vmul.f32 %v8066_v10, %v1018_v44 }
 0x32d   :  { %v8072_v26 = vrot.slane %v1079_v25, %v8033_v46  ;;  %v1083_v29 = vcombine.high %v1079_v25, %v1079_v25 }
 0x32f   :  { %875 = vxpose.xlu1.b32.cont [2/16] %v8057_v9, 128  ;;  %843 = vxpose.xlu0.b32.cont [2/16] %v8057_v9, 128  ;;  %v1098_v27 = vcombine.high %v8072_v26, %v8072_v26  ;;  %v8077_v32 = vrot.slane %v1083_v29, %v8033_v46 }
 0x331   :  { %v1115_v33 = vpack.c.bf16 %v1098_v27, %v1098_v27  ;;  %v1099_v35 = vcombine.high %v8077_v32, %v8077_v32 }
 0x333   :  { %876 = vxpose.xlu1.b32.cont [3/16] %v8057_v9, 128  ;;  %844 = vxpose.xlu0.b32.cont [3/16] %v8057_v9, 128  ;;  %v1117_v36 = vpack.c.bf16 %v1099_v35, %v1099_v35 }
 0x334   :  { %1152 = vmatprep.mubr.bf16.mxu0 %v1115_v33 }
 0x335   :  { %1192 = vmatprep.mubr.bf16.mxu1 %v1117_v36 }
 0x337   :  { %877 = vxpose.xlu1.b32.cont [4/16] %v8057_v9, 128  ;;  %845 = vxpose.xlu0.b32.cont [4/16] %v8057_v9, 128 }
 0x33b   :  { %878 = vxpose.xlu1.b32.cont [5/16] %v8057_v9, 128  ;;  %846 = vxpose.xlu0.b32.cont [5/16] %v8057_v9, 128 }
 0x33f   :  { %879 = vxpose.xlu1.b32.cont [6/16] %v8057_v9, 128  ;;  %847 = vxpose.xlu0.b32.cont [6/16] %v8057_v9, 128 }
 0x343   :  { %880 = vxpose.xlu1.b32.cont [7/16] %v8057_v9, 128  ;;  %848 = vxpose.xlu0.b32.cont [7/16] %v8057_v9, 128 }
 0x347   :  { %881 = vxpose.xlu1.b32.cont [8/16] %v8057_v9, 128  ;;  %849 = vxpose.xlu0.b32.cont [8/16] %v8057_v9, 128 }
 0x34b   :  { %882 = vxpose.xlu1.b32.cont [9/16] %v8057_v9, 128  ;;  %850 = vxpose.xlu0.b32.cont [9/16] %v8057_v9, 128 }
 0x34f   :  { %883 = vxpose.xlu1.b32.cont [10/16] %v8057_v9, 128  ;;  %851 = vxpose.xlu0.b32.cont [10/16] %v8057_v9, 128 }
 0x353   :  { %884 = vxpose.xlu1.b32.cont [11/16] %v8057_v9, 128  ;;  %852 = vxpose.xlu0.b32.cont [11/16] %v8057_v9, 128 }
 0x357   :  { %885 = vxpose.xlu1.b32.cont [12/16] %v8057_v9, 128  ;;  %853 = vxpose.xlu0.b32.cont [12/16] %v8057_v9, 128 }
 0x35b   :  { %886 = vxpose.xlu1.b32.cont [13/16] %v8057_v9, 128  ;;  %854 = vxpose.xlu0.b32.cont [13/16] %v8057_v9, 128 }
 0x35f   :  { %887 = vxpose.xlu1.b32.cont [14/16] %v8057_v9, 128  ;;  %855 = vxpose.xlu0.b32.cont [14/16] %v8057_v9, 128 }
 0x363   :  { %888 = vxpose.xlu1.b32.cont [15/16] %v8057_v9, 128  ;;  %856 = vxpose.xlu0.b32.cont [15/16] %v8057_v9, 128 }
 0x367   :  { %889 = vxpose.xlu1.b32.end [16/16] %v8057_v9, 128  ;;  %857 = vxpose.xlu0.b32.end [16/16] %v8057_v9, 128 }
 0x36b   :  { %810 = vxpose.xlu0.b32.start [1/16] %v683_v37, 128  ;;  %778 = vxpose.xlu1.b32.start [1/16] %v682_v38, 128 }
 0x36f   :  { %811 = vxpose.xlu0.b32.cont [2/16] %v8057_v9, 128  ;;  %779 = vxpose.xlu1.b32.cont [2/16] %v8057_v9, 128 }
 0x373   :  { %812 = vxpose.xlu0.b32.cont [3/16] %v8057_v9, 128  ;;  %780 = vxpose.xlu1.b32.cont [3/16] %v8057_v9, 128 }
 0x377   :  { %813 = vxpose.xlu0.b32.cont [4/16] %v8057_v9, 128  ;;  %781 = vxpose.xlu1.b32.cont [4/16] %v8057_v9, 128 }
 0x37b   :  { %814 = vxpose.xlu0.b32.cont [5/16] %v8057_v9, 128  ;;  %782 = vxpose.xlu1.b32.cont [5/16] %v8057_v9, 128 }
 0x37f   :  { %815 = vxpose.xlu0.b32.cont [6/16] %v8057_v9, 128  ;;  %783 = vxpose.xlu1.b32.cont [6/16] %v8057_v9, 128 }
 0x383   :  { %816 = vxpose.xlu0.b32.cont [7/16] %v8057_v9, 128  ;;  %784 = vxpose.xlu1.b32.cont [7/16] %v8057_v9, 128 }
 0x387   :  { %817 = vxpose.xlu0.b32.cont [8/16] %v8057_v9, 128  ;;  %785 = vxpose.xlu1.b32.cont [8/16] %v8057_v9, 128 }
 0x38b   :  { %818 = vxpose.xlu0.b32.cont [9/16] %v8057_v9, 128  ;;  %786 = vxpose.xlu1.b32.cont [9/16] %v8057_v9, 128 }
 0x38f   :  { %819 = vxpose.xlu0.b32.cont [10/16] %v8057_v9, 128  ;;  %787 = vxpose.xlu1.b32.cont [10/16] %v8057_v9, 128 }
 0x393   :  { %820 = vxpose.xlu0.b32.cont [11/16] %v8057_v9, 128  ;;  %788 = vxpose.xlu1.b32.cont [11/16] %v8057_v9, 128 }
 0x397   :  { %821 = vxpose.xlu0.b32.cont [12/16] %v8057_v9, 128  ;;  %789 = vxpose.xlu1.b32.cont [12/16] %v8057_v9, 128 }
 0x39b   :  { %822 = vxpose.xlu0.b32.cont [13/16] %v8057_v9, 128  ;;  %790 = vxpose.xlu1.b32.cont [13/16] %v8057_v9, 128 }
 0x39f   :  { %823 = vxpose.xlu0.b32.cont [14/16] %v8057_v9, 128  ;;  %791 = vxpose.xlu1.b32.cont [14/16] %v8057_v9, 128 }
 0x3a3   :  { %824 = vxpose.xlu0.b32.cont [15/16] %v8057_v9, 128  ;;  %792 = vxpose.xlu1.b32.cont [15/16] %v8057_v9, 128 }
 0x3a7   :  { %v8135_v28 = vpop.trf.xlu1  ;;  %825 = vxpose.xlu0.b32.end [16/16] %v8057_v9, 128  ;;  %793 = vxpose.xlu1.b32.end [16/16] %v8057_v9, 128  ;;  %v8139_v11 = vpop.trf.xlu0 }
 0x3a8   :  { %11811 = vst [vmem:[#allocation6_spill] sm:$0xff] %v8135_v28  ;;  %11812 = vst [vmem:[#allocation7_spill] sm:$0xff] %v8139_v11 }
 0x3ab   :  { %v8143_v40 = vpop.trf.xlu1  ;;  %938 = vxpose.xlu1.b32.start [1/16] %v687_v39, 128  ;;  %v8145_v41 = vpop.trf.xlu0 }
 0x3ac   :  { %11813 = vst [vmem:[#allocation8_spill] sm:$0xff] %v8143_v40  ;;  %11814 = vst [vmem:[#allocation9_spill] sm:$0xff] %v8145_v41 }
 0x3af   :  { %v8147_v31 = vpop.trf.xlu1  ;;  %939 = vxpose.xlu1.b32.cont [2/16] %v8057_v9, 128  ;;  %v8150_v42 = vpop.trf.xlu0 }
 0x3b0   :  { %11815 = vst [vmem:[#allocation10_spill] sm:$0xff] %v8147_v31  ;;  %11816 = vst [vmem:[#allocation11_spill] sm:$0xff] %v8150_v42 }
 0x3b3   :  { %v8152_v43 = vpop.trf.xlu1  ;;  %940 = vxpose.xlu1.b32.cont [3/16] %v8057_v9, 128  ;;  %v8155_v44 = vpop.trf.xlu0 }
 0x3b4   :  { %11817 = vst [vmem:[#allocation12_spill] sm:$0xff] %v8152_v43  ;;  %11818 = vst [vmem:[#allocation13_spill] sm:$0xff] %v8155_v44  ;;  %v8304_v38 = vpack.c.bf16 %v8152_v43, %v8147_v31 }
 0x3b6   :  { %11858 = vst [vmem:[#allocation53_spill] sm:$0xff] %v8304_v38 }
 0x3b7   :  { %v8157_v45 = vpop.trf.xlu1  ;;  %941 = vxpose.xlu1.b32.cont [4/16] %v8057_v9, 128  ;;  %v8160_v30 = vpop.trf.xlu0 }
 0x3b8   :  { %11819 = vst [vmem:[#allocation14_spill] sm:$0xff] %v8157_v45  ;;  %11820 = vst [vmem:[#allocation15_spill] sm:$0xff] %v8160_v30 }
 0x3bb   :  { %v8162_v15 = vpop.trf.xlu1  ;;  %942 = vxpose.xlu1.b32.cont [5/16] %v8057_v9, 128  ;;  %v8165_v47 = vpop.trf.xlu0 }
 0x3bc   :  { %11821 = vst [vmem:[#allocation16_spill] sm:$0xff] %v8162_v15  ;;  %11822 = vst [vmem:[#allocation17_spill] sm:$0xff] %v8165_v47  ;;  %v8289_v33 = vpack.c.bf16 %v8162_v15, %v8157_v45  ;;  %v8300_v37 = vpack.c.bf16 %v8165_v47, %v8160_v30  ;;  %v8315_v45 = vpack.c.bf16 %v8155_v44, %v8150_v42  ;;  %v11716_v15 = vmov 0  }
 0x3bd   :  { %v8319_v30 = vpack.c.bf16 %v8143_v40, %v8135_v28  ;;  %v8330_v47 = vpack.c.bf16 %v8145_v41, %v8139_v11  ;;  %v7221_v40 = vld [vmem:[%s11695_s2 + $0x184] ss:$24 sps:$4 sm:$0xff]   ;;  %v1116_v44 = vpack.c.bf16 %v8077_v32, %v8077_v32 }
 0x3be   :  { %11855 = vst [vmem:[#allocation50_spill] sm:$0xff] %v8289_v33 }
 0x3bf   :  { %v8167_v48 = vpop.trf.xlu1  ;;  %943 = vxpose.xlu1.b32.cont [6/16] %v8057_v9, 128  ;;  %v8170_v50 = vpop.trf.xlu0  ;;  %11861 = vst [vmem:[#allocation56_spill] sm:$0xff] %v8319_v30 }
 0x3c0   :  { %11823 = vst [vmem:[#allocation18_spill] sm:$0xff] %v8167_v48  ;;  %11824 = vst [vmem:[#allocation19_spill] sm:$0xff] %v8170_v50 }
 0x3c3   :  { %v8172_v51 = vpop.trf.xlu1  ;;  %944 = vxpose.xlu1.b32.cont [7/16] %v8057_v9, 128  ;;  %v8175_v19 = vpop.trf.xlu0 }
 0x3c4   :  { %11825 = vst [vmem:[#allocation20_spill] sm:$0xff] %v8172_v51  ;;  %11826 = vst [vmem:[#allocation21_spill] sm:$0xff] %v8175_v19  ;;  %v8274_v24 = vpack.c.bf16 %v8172_v51, %v8167_v48  ;;  %v8285_v27 = vpack.c.bf16 %v8175_v19, %v8170_v50 }
 0x3c6   :  { %11852 = vst [vmem:[#allocation47_spill] sm:$0xff] %v8274_v24 }
 0x3c7   :  { %v8177_v52 = vpop.trf.xlu1  ;;  %945 = vxpose.xlu1.b32.cont [8/16] %v8057_v9, 128  ;;  %v8180_v53 = vpop.trf.xlu0 }
 0x3c8   :  { %11827 = vst [vmem:[#allocation22_spill] sm:$0xff] %v8177_v52  ;;  %11828 = vst [vmem:[#allocation23_spill] sm:$0xff] %v8180_v53 }
 0x3cb   :  { %v8182_v54 = vpop.trf.xlu1  ;;  %946 = vxpose.xlu1.b32.cont [9/16] %v8057_v9, 128  ;;  %v8185_v55 = vpop.trf.xlu0 }
 0x3cc   :  { %11829 = vst [vmem:[#allocation24_spill] sm:$0xff] %v8182_v54  ;;  %11830 = vst [vmem:[#allocation25_spill] sm:$0xff] %v8185_v55  ;;  %v8259_v34 = vpack.c.bf16 %v8182_v54, %v8177_v52  ;;  %v8270_v23 = vpack.c.bf16 %v8185_v55, %v8180_v53 }
 0x3ce   :  { %11849 = vst [vmem:[#allocation44_spill] sm:$0xff] %v8259_v34 }
 0x3cf   :  { %v8187_v56 = vpop.trf.xlu1  ;;  %947 = vxpose.xlu1.b32.cont [10/16] %v8057_v9, 128  ;;  %v8190_v57 = vpop.trf.xlu0 }
 0x3d0   :  { %11831 = vst [vmem:[#allocation26_spill] sm:$0xff] %v8187_v56  ;;  %11832 = vst [vmem:[#allocation27_spill] sm:$0xff] %v8190_v57 }
 0x3d3   :  { %v8192_v58 = vpop.trf.xlu1  ;;  %948 = vxpose.xlu1.b32.cont [11/16] %v8057_v9, 128  ;;  %v8195_v59 = vpop.trf.xlu0 }
 0x3d4   :  { %11833 = vst [vmem:[#allocation28_spill] sm:$0xff] %v8192_v58  ;;  %11834 = vst [vmem:[#allocation29_spill] sm:$0xff] %v8195_v59  ;;  %v8245_v21 = vpack.c.bf16 %v8192_v58, %v8187_v56  ;;  %v8249_v62 = vpack.c.bf16 %v8195_v59, %v8190_v57 }
 0x3d6   :  { %11846 = vst [vmem:[#allocation41_spill] sm:$0xff] %v8245_v21 }
 0x3d7   :  { %v8197_v60 = vpop.trf.xlu1  ;;  %949 = vxpose.xlu1.b32.cont [12/16] %v8057_v9, 128  ;;  %v8200_v61 = vpop.trf.xlu0 }
 0x3d8   :  { %11835 = vst [vmem:[#allocation30_spill] sm:$0xff] %v8197_v60  ;;  %11836 = vst [vmem:[#allocation31_spill] sm:$0xff] %v8200_v61 }
 0x3db   :  { %v8202_v63 = vpop.trf.xlu1  ;;  %950 = vxpose.xlu1.b32.cont [13/16] %v8057_v9, 128  ;;  %v8205_v0 = vpop.trf.xlu0 }
 0x3dc   :  { %11837 = vst [vmem:[#allocation32_spill] sm:$0xff] %v8202_v63  ;;  %11838 = vst [vmem:[#allocation33_spill] sm:$0xff] %v8205_v0  ;;  %v8227_v12 = vpack.c.bf16 %v8202_v63, %v8197_v60  ;;  %v8232_v13 = vpack.c.bf16 %v8205_v0, %v8200_v61 }
 0x3de   :  { %11843 = vst [vmem:[#allocation38_spill] sm:$0xff] %v8227_v12 }
 0x3df   :  { %v8207_v1 = vpop.trf.xlu1  ;;  %951 = vxpose.xlu1.b32.cont [14/16] %v8057_v9, 128  ;;  %v8210_v4 = vpop.trf.xlu0 }
 0x3e0   :  { %11839 = vst [vmem:[#allocation34_spill] sm:$0xff] %v8207_v1  ;;  %11840 = vst [vmem:[#allocation35_spill] sm:$0xff] %v8210_v4 }
 0x3e3   :  { %v8212_v5 = vpop.trf.xlu1  ;;  %952 = vxpose.xlu1.b32.cont [15/16] %v8057_v9, 128  ;;  %v8215_v6 = vpop.trf.xlu0 }
 0x3e4   :  { %11841 = vst [vmem:[#allocation36_spill] sm:$0xff] %v8212_v5  ;;  %11842 = vst [vmem:[#allocation37_spill] sm:$0xff] %v8215_v6  ;;  %v8219_v7 = vpack.c.bf16 %v8212_v5, %v8207_v1  ;;  %v8223_v8 = vpack.c.bf16 %v8215_v6, %v8210_v4  ;;  %v11883_v4 = vmov 0  }
 0x3e6   :  { %6766 = vmatprep.subr.bf16.mxu1 %v8219_v7 }
 0x3e7   :  { %953 = vxpose.xlu1.b32.end [16/16] %v8057_v9, 128  ;;  %v8235_v16 = vpop.trf.xlu1  ;;  %6767 = vmatpush3.bf16.msra.mxu1 %v8223_v8  ;;  %v8238_v17 = vpop.trf.xlu0 }
 0x3e8   :  { %11844 = vst [vmem:[#allocation39_spill] sm:$0xff] %v8235_v16  ;;  %11845 = vst [vmem:[#allocation40_spill] sm:$0xff] %v8238_v17  ;;  %6768 = vmatprep.subr.bf16.mxu1 %v8227_v12 }
 0x3eb   :  { %906 = vxpose.xlu1.b32.start [1/16] %v686_v18, 128  ;;  %v8251_v2 = vpop.trf.xlu1  ;;  %6769 = vmatpush3.bf16.msra.mxu1 %v8232_v13  ;;  %v8254_v14 = vpop.trf.xlu0 }
 0x3ec   :  { %11847 = vst [vmem:[#allocation42_spill] sm:$0xff] %v8251_v2  ;;  %11848 = vst [vmem:[#allocation43_spill] sm:$0xff] %v8254_v14  ;;  %6770 = vmatprep.subr.bf16.mxu1 %v8245_v21 }
 0x3ef   :  { %907 = vxpose.xlu1.b32.cont [2/16] %v8057_v9, 128  ;;  %v8262_v20 = vpop.trf.xlu1  ;;  %6771 = vmatpush3.bf16.msra.mxu1 %v8249_v62  ;;  %v8265_v22 = vpop.trf.xlu0 }
 0x3f0   :  { %11850 = vst [vmem:[#allocation45_spill] sm:$0xff] %v8262_v20  ;;  %11851 = vst [vmem:[#allocation46_spill] sm:$0xff] %v8265_v22  ;;  %6772 = vmatprep.subr.bf16.mxu1 %v8259_v34 }
 0x3f3   :  { %908 = vxpose.xlu1.b32.cont [3/16] %v8057_v9, 128  ;;  %v8277_v25 = vpop.trf.xlu1  ;;  %6773 = vmatpush3.bf16.msra.mxu1 %v8270_v23  ;;  %v8280_v29 = vpop.trf.xlu0 }
 0x3f4   :  { %11853 = vst [vmem:[#allocation48_spill] sm:$0xff] %v8277_v25  ;;  %11854 = vst [vmem:[#allocation49_spill] sm:$0xff] %v8280_v29  ;;  %6774 = vmatprep.subr.bf16.mxu1 %v8274_v24 }
 0x3f7   :  { %909 = vxpose.xlu1.b32.cont [4/16] %v8057_v9, 128  ;;  %v8292_v35 = vpop.trf.xlu1  ;;  %6775 = vmatpush3.bf16.msra.mxu1 %v8285_v27  ;;  %v8295_v36 = vpop.trf.xlu0 }
 0x3f8   :  { %11856 = vst [vmem:[#allocation51_spill] sm:$0xff] %v8292_v35  ;;  %11857 = vst [vmem:[#allocation52_spill] sm:$0xff] %v8295_v36  ;;  %6776 = vmatprep.subr.bf16.mxu1 %v8289_v33 }
 0x3fb   :  { %910 = vxpose.xlu1.b32.cont [5/16] %v8057_v9, 128  ;;  %v8307_v39 = vpop.trf.xlu1  ;;  %6777 = vmatpush3.bf16.msra.mxu1 %v8300_v37  ;;  %v8310_v18 = vpop.trf.xlu0 }
 0x3fc   :  { %11859 = vst [vmem:[#allocation54_spill] sm:$0xff] %v8307_v39  ;;  %11860 = vst [vmem:[#allocation55_spill] sm:$0xff] %v8310_v18  ;;  %6778 = vmatprep.subr.bf16.mxu1 %v8304_v38 }
 0x3ff   :  { %911 = vxpose.xlu1.b32.cont [6/16] %v8057_v9, 128  ;;  %v8322_v31 = vpop.trf.xlu1  ;;  %6779 = vmatpush3.bf16.msra.mxu1 %v8315_v45  ;;  %v8325_v43 = vpop.trf.xlu0 }
 0x400   :  { %11862 = vst [vmem:[#allocation57_spill] sm:$0xff] %v8322_v31  ;;  %11863 = vst [vmem:[#allocation58_spill] sm:$0xff] %v8325_v43  ;;  %6780 = vmatprep.subr.bf16.mxu1 %v8319_v30 }
 0x403   :  { %912 = vxpose.xlu1.b32.cont [7/16] %v8057_v9, 128  ;;  %v8333_v42 = vpop.trf.xlu1  ;;  %6781 = vmatpush3.bf16.msra.mxu1 %v8330_v47  ;;  %v8336_v28 = vpop.trf.xlu0 }
 0x404   :  { %11864 = vst [vmem:[#allocation59_spill] sm:$0xff] %v8333_v42  ;;  %11865 = vst [vmem:[#allocation60_spill] sm:$0xff] %v8336_v28  ;;  %7171 = vmatprep.subr.bf16.mxu1 %v11716_v15 }
 0x406   :  { %1193 = vmatmul.mubr.bf16.vlgmr.msra.gmra.mxu1 %v1116_v44 }
 0x407   :  { %913 = vxpose.xlu1.b32.cont [8/16] %v8057_v9, 128  ;;  %v8345_v11 = vpop.trf.xlu1  ;;  %v8347_v41 = vpop.trf.xlu0  ;;  %3641 = vmatprep.mubr.bf16.mxu1 %v7221_v40 }
 0x408   :  { %11866 = vst [vmem:[#allocation61_spill] sm:$0xff] %v8345_v11  ;;  %11867 = vst [vmem:[#allocation62_spill] sm:$0xff] %v8347_v41 }
 0x40b   :  { %914 = vxpose.xlu1.b32.cont [9/16] %v8057_v9, 128  ;;  %v8350_v50 = vpop.trf.xlu1  ;;  %v8352_v48 = vpop.trf.xlu0 }
 0x40c   :  { %11868 = vst [vmem:[#allocation63_spill] sm:$0xff] %v8350_v50  ;;  %11869 = vst [vmem:[#allocation64_spill] sm:$0xff] %v8352_v48  ;;  %v8424_v6 = vpack.c.bf16 %v8352_v48, %v8347_v41  ;;  %v8433_v5 = vpack.c.bf16 %v8350_v50, %v8345_v11  ;;  %v8447_v48 = vpack.c.bf16 %v8333_v42, %v8322_v31 }
 0x40d   :  { %v8452_v11 = vpack.c.bf16 %v8310_v18, %v8295_v36  ;;  %v1080_v31 = vmul.f32 %v8066_v10, %v8042_v49  ;;  %v8468_v36 = vpack.c.bf16 %v8280_v29, %v8265_v22  ;;  %v8485_v10 = vpack.c.bf16 %v8254_v14, %v8238_v17  ;;  %v7219_v29 = vld [vmem:[%s11695_s2 + $0x180] ss:$24 sps:$4 sm:$0xff]  }
 0x40e   :  { %v1114_v17 = vpack.c.bf16 %v8072_v26, %v8072_v26 }
 0x40f   :  { %915 = vxpose.xlu1.b32.cont [10/16] %v8057_v9, 128  ;;  %v8355_v32 = vpop.trf.xlu1  ;;  %v8357_v19 = vpop.trf.xlu0  ;;  %v8481_v49 = vrot.slane %v1080_v31, %v8033_v46 }
 0x410   :  { %11870 = vst [vmem:[#allocation65_spill] sm:$0xff] %v8355_v32  ;;  %11871 = vst [vmem:[#allocation66_spill] sm:$0xff] %v8357_v19 }
 0x411   :  { %v1107_v46 = vcombine.high %v8481_v49, %v8481_v49 }
 0x413   :  { %916 = vxpose.xlu1.b32.cont [11/16] %v8057_v9, 128  ;;  %v8360_v44 = vpop.trf.xlu1  ;;  %v8362_v15 = vpop.trf.xlu0  ;;  %v1119_v14 = vpack.c.bf16 %v1107_v46, %v1107_v46 }
 0x414   :  { %11872 = vst [vmem:[#allocation67_spill] sm:$0xff] %v8360_v44  ;;  %11873 = vst [vmem:[#allocation68_spill] sm:$0xff] %v8362_v15  ;;  %v8404_v0 = vpack.c.bf16 %v8362_v15, %v8357_v19  ;;  %v7225_v15 = vld [vmem:[%s11695_s2 + $0x1e4] ss:$24 sps:$4 sm:$0xff]  }
 0x417   :  { %917 = vxpose.xlu1.b32.cont [12/16] %v8057_v9, 128  ;;  %v8365_v40 = vpop.trf.xlu1  ;;  %v8367_v51 = vpop.trf.xlu0 }
 0x418   :  { %11874 = vst [vmem:[#allocation69_spill] sm:$0xff] %v8365_v40  ;;  %11875 = vst [vmem:[#allocation70_spill] sm:$0xff] %v8367_v51 }
 0x41b   :  { %918 = vxpose.xlu1.b32.cont [13/16] %v8057_v9, 128  ;;  %v8370_v53 = vpop.trf.xlu1  ;;  %v8372_v52 = vpop.trf.xlu0 }
 0x41c   :  { %11876 = vst [vmem:[#allocation71_spill] sm:$0xff] %v8370_v53  ;;  %11877 = vst [vmem:[#allocation72_spill] sm:$0xff] %v8372_v52  ;;  %v8386_v59 = vpack.c.bf16 %v8372_v52, %v8367_v51  ;;  %v8408_v63 = vpack.c.bf16 %v8370_v53, %v8365_v40 }
 0x41f   :  { %919 = vxpose.xlu1.b32.cont [14/16] %v8057_v9, 128  ;;  %v8375_v55 = vpop.trf.xlu1  ;;  %v8377_v54 = vpop.trf.xlu0 }
 0x420   :  { %11878 = vst [vmem:[#allocation73_spill] sm:$0xff] %v8375_v55  ;;  %11879 = vst [vmem:[#allocation74_spill] sm:$0xff] %v8377_v54 }
 0x423   :  { %920 = vxpose.xlu1.b32.cont [15/16] %v8057_v9, 128  ;;  %v8380_v57 = vpop.trf.xlu1  ;;  %v8382_v56 = vpop.trf.xlu0 }
 0x424   :  { %11880 = vst [vmem:[#allocation75_spill] sm:$0xff] %v8380_v57  ;;  %11881 = vst [vmem:[#allocation76_spill] sm:$0xff] %v8382_v56  ;;  %v8390_v58 = vpack.c.bf16 %v8380_v57, %v8375_v55  ;;  %v8394_v61 = vpack.c.bf16 %v8382_v56, %v8377_v54 }
 0x426   :  { %6744 = vmatprep.subr.bf16.mxu0 %v8394_v61  ;;  %7187 = vmatpush1.bf16.msra.mxu1 %v8390_v58 }
 0x427   :  { %921 = vxpose.xlu1.b32.end [16/16] %v8057_v9, 128  ;;  %v8399_v60 = vpop.trf.xlu1  ;;  %6745 = vmatpush3.bf16.msra.mxu0 %v8390_v58  ;;  %v8419_v9 = vpack.c.bf16 %v8360_v44, %v8355_v32  ;;  %v8438_v32 = vpack.c.bf16 %v8336_v28, %v8325_v43  ;;  %v8461_v28 = vpack.c.bf16 %v8307_v39, %v8292_v35  ;;  %v7222_v39 = vld [vmem:[%s11695_s2 + $0x1b4] ss:$24 sps:$4 sm:$0xff]   ;;  %v7224_v44 = vld [vmem:[%s11695_s2 + $0x1b0] ss:$24 sps:$4 sm:$0xff]  }
 0x428   :  { %11882 = vst [vmem:[#allocation77_spill] sm:$0xff] %v8399_v60  ;;  %7172 = vmatprep.subr.bf16.mxu1 %v11883_v4  ;;  %6746 = vmatprep.subr.bf16.mxu0 %v8386_v59  ;;  %v8477_v35 = vpack.c.bf16 %v8277_v25, %v8262_v20  ;;  %v8494_v20 = vpack.c.bf16 %v8251_v2, %v8235_v16 }
 0x42a   :  { %7188 = vmatpush1.bf16.msra.mxu1 %v8408_v63 }
 0x42b   :  { %v8413_v1 = vpop.trf.xlu1  ;;  %6747 = vmatpush3.bf16.msra.mxu0 %v8408_v63  ;;  %7173 = vmatprep.subr.bf16.mxu1 %v11883_v4 }
 0x42c   :  { %11884 = vst [vmem:[#allocation78_spill] sm:$0xff] %v8413_v1  ;;  %6748 = vmatprep.subr.bf16.mxu0 %v8404_v0 }
 0x42e   :  { %7189 = vmatpush1.bf16.msra.mxu1 %v8419_v9 }
 0x42f   :  { %v8427_v3 = vpop.trf.xlu1  ;;  %6749 = vmatpush3.bf16.msra.mxu0 %v8419_v9  ;;  %7174 = vmatprep.subr.bf16.mxu1 %v11883_v4 }
 0x430   :  { %11885 = vst [vmem:[#allocation79_spill] sm:$0xff] %v8427_v3  ;;  %6750 = vmatprep.subr.bf16.mxu0 %v8424_v6 }
 0x432   :  { %7190 = vmatpush1.bf16.msra.mxu1 %v8433_v5 }
 0x433   :  { %v8441_v41 = vpop.trf.xlu1  ;;  %6751 = vmatpush3.bf16.msra.mxu0 %v8433_v5  ;;  %7175 = vmatprep.subr.bf16.mxu1 %v11883_v4 }
 0x434   :  { %11886 = vst [vmem:[#allocation80_spill] sm:$0xff] %v8441_v41  ;;  %6752 = vmatprep.subr.bf16.mxu0 %v8438_v32 }
 0x436   :  { %7191 = vmatpush1.bf16.msra.mxu1 %v8447_v48 }
 0x437   :  { %v8455_v43 = vpop.trf.xlu1  ;;  %6753 = vmatpush3.bf16.msra.mxu0 %v8447_v48  ;;  %7176 = vmatprep.subr.bf16.mxu1 %v11883_v4 }
 0x438   :  { %11887 = vst [vmem:[#allocation81_spill] sm:$0xff] %v8455_v43  ;;  %6754 = vmatprep.subr.bf16.mxu0 %v8452_v11 }
 0x43a   :  { %7192 = vmatpush1.bf16.msra.mxu1 %v8461_v28 }
 0x43b   :  { %v8471_v18 = vpop.trf.xlu1  ;;  %6755 = vmatpush3.bf16.msra.mxu0 %v8461_v28  ;;  %7177 = vmatprep.subr.bf16.mxu1 %v11883_v4 }
 0x43c   :  { %11888 = vst [vmem:[#allocation82_spill] sm:$0xff] %v8471_v18  ;;  %6756 = vmatprep.subr.bf16.mxu0 %v8468_v36 }
 0x43e   :  { %7193 = vmatpush1.bf16.msra.mxu1 %v8477_v35 }
 0x43f   :  { %v8488_v22 = vpop.trf.xlu1  ;;  %6757 = vmatpush3.bf16.msra.mxu0 %v8477_v35  ;;  %7178 = vmatprep.subr.bf16.mxu1 %v11883_v4 }
 0x440   :  { %11889 = vst [vmem:[#allocation83_spill] sm:$0xff] %v8488_v22  ;;  %6758 = vmatprep.subr.bf16.mxu0 %v8485_v10 }
 0x442   :  { %7194 = vmatpush1.bf16.msra.mxu1 %v8494_v20 }
 0x443   :  { %v8500_v31 = vpop.trf.xlu1  ;;  %6759 = vmatpush3.bf16.msra.mxu0 %v8494_v20  ;;  %7179 = vmatprep.subr.bf16.mxu1 %v11883_v4 }
 0x444   :  { %11890 = vst [vmem:[#allocation84_spill] sm:$0xff] %v8500_v31 }
 0x446   :  { %1153 = vmatmul.mubr.bf16.vlgmr.msra.gmra.mxu0 %v1114_v17  ;;  %7195 = vmatpush2.bf16.msra.mxu1 %v8394_v61 }
 0x447   :  { %v8507_v16 = vpop.trf.xlu1  ;;  %1232 = vmatprep.mubr.bf16.mxu0 %v1119_v14  ;;  %7180 = vmatprep.subr.bf16.mxu1 %v11883_v4 }
 0x448   :  { %11891 = vst [vmem:[#allocation85_spill] sm:$0xff] %v8507_v16 }
 0x44a   :  { %7196 = vmatpush2.bf16.msra.mxu1 %v8386_v59 }
 0x44b   :  { %v8511_v2 = vpop.trf.xlu1  ;;  %7181 = vmatprep.subr.bf16.mxu1 %v11883_v4 }
 0x44c   :  { %11892 = vst [vmem:[#allocation86_spill] sm:$0xff] %v8511_v2 }
 0x44e   :  { %7197 = vmatpush2.bf16.msra.mxu1 %v8404_v0 }
 0x44f   :  { %v8515_v25 = vpop.trf.xlu1  ;;  %7182 = vmatprep.subr.bf16.mxu1 %v11883_v4 }
 0x450   :  { %11893 = vst [vmem:[#allocation87_spill] sm:$0xff] %v8515_v25 }
 0x452   :  { %7198 = vmatpush2.bf16.msra.mxu1 %v8424_v6 }
 0x453   :  { %v8519_v26 = vpop.trf.xlu1  ;;  %7183 = vmatprep.subr.bf16.mxu1 %v11883_v4 }
 0x454   :  { %11894 = vst [vmem:[#allocation88_spill] sm:$0xff] %v8519_v26  ;;  %v8639_v12 = vpack.c.bf16 %v8519_v26, %v8515_v25 }
 0x456   :  { %7199 = vmatpush2.bf16.msra.mxu1 %v8438_v32 }
 0x457   :  { %v8523_v17 = vpop.trf.xlu1  ;;  %7184 = vmatprep.subr.bf16.mxu1 %v11883_v4 }
 0x458   :  { %11895 = vst [vmem:[#allocation89_spill] sm:$0xff] %v8523_v17 }
 0x45a   :  { %7200 = vmatpush2.bf16.msra.mxu1 %v8452_v11 }
 0x45b   :  { %v8527_v14 = vpop.trf.xlu1  ;;  %7185 = vmatprep.subr.bf16.mxu1 %v11883_v4 }
 0x45c   :  { %11896 = vst [vmem:[#allocation90_spill] sm:$0xff] %v8527_v14 }
 0x45e   :  { %7201 = vmatpush2.bf16.msra.mxu1 %v8468_v36 }
 0x45f   :  { %v8531_v46 = vpop.trf.xlu1  ;;  %7186 = vmatprep.subr.bf16.mxu1 %v11883_v4 }
 0x460   :  { %11897 = vst [vmem:[#allocation91_spill] sm:$0xff] %v8531_v46 }
 0x462   :  { %7202 = vmatpush2.bf16.msra.mxu1 %v8485_v10 }
 0x463   :  { %v8541_v42 = vpop.trf.xlu1  ;;  %4635 = vmatprep.subr.bf16.mxu1 %v11883_v4 }
 0x464   :  { %11898 = vst [vmem:[#allocation92_spill] sm:$0xff] %v8541_v42  ;;  %v8546_v50 = vpack.c.bf16 %v8541_v42, %v8531_v46 }
 0x465   :  { %3642 = vmatmul.mubr.bf16.vlgmr.msra.gmra.mxu1 %v7219_v29  ;;  %v7227_v29 = vld [vmem:[%s11695_s2 + $0x1e0] ss:$24 sps:$4 sm:$0xff]  }
 0x466   :  { %6788 = vmatprep.subr.bf16.mxu0 %v8546_v50  ;;  %3649 = vmatprep.mubr.bf16.mxu1 %v7222_v39  ;;  %v7228_v39 = vld [vmem:[%s11695_s2 + $0x214] ss:$24 sps:$4 sm:$0xff]  }
 0x467   :  { %v8549_v19 = vpop.trf.xlu1 }
 0x468   :  { %11899 = vst [vmem:[#allocation93_spill] sm:$0xff] %v8549_v19 }
 0x46b   :  { %v8557_v40 = vpop.trf.xlu1 }
 0x46c   :  { %11900 = vst [vmem:[#allocation94_spill] sm:$0xff] %v8557_v40 }
 0x46d   :  { %3650 = vmatmul.mubr.bf16.gmra.mxu1 %v7224_v44  ;;  %v7231_v44 = vld [vmem:[%s11695_s2 + $0x244] ss:$24 sps:$4 sm:$0xff]  }
 0x46e   :  { %3657 = vmatprep.mubr.bf16.mxu1 %v7225_v15  ;;  %v7230_v15 = vld [vmem:[%s11695_s2 + $0x210] ss:$24 sps:$4 sm:$0xff]  }
 0x46f   :  { %v8559_v46 = vpop.trf.xlu1 }
 0x470   :  { %11901 = vst [vmem:[#allocation95_spill] sm:$0xff] %v8559_v46 }
 0x473   :  { %v8567_v42 = vpop.trf.xlu1 }
 0x474   :  { %11902 = vst [vmem:[#allocation96_spill] sm:$0xff] %v8567_v42 }
 0x475   :  { %3658 = vmatmul.mubr.bf16.gmra.mxu1 %v7227_v29  ;;  %v7233_v29 = vld [vmem:[%s11695_s2 + $0x240] ss:$24 sps:$4 sm:$0xff]  }
 0x476   :  { %3665 = vmatprep.mubr.bf16.mxu1 %v7228_v39  ;;  %v7234_v39 = vld [vmem:[%s11695_s2 + $0x274] ss:$24 sps:$4 sm:$0xff]  }
 0x477   :  { %v8569_v51 = vpop.trf.xlu1 }
 0x478   :  { %11903 = vst [vmem:[#allocation97_spill] sm:$0xff] %v8569_v51 }
 0x47b   :  { %v8577_v53 = vpop.trf.xlu1 }
 0x47c   :  { %11904 = vst [vmem:[#allocation98_spill] sm:$0xff] %v8577_v53 }
 0x47d   :  { %3666 = vmatmul.mubr.bf16.gmra.mxu1 %v7230_v15  ;;  %v7236_v15 = vld [vmem:[%s11695_s2 + $0x270] ss:$24 sps:$4 sm:$0xff]  }
 0x47e   :  { %3673 = vmatprep.mubr.bf16.mxu1 %v7231_v44  ;;  %v7237_v44 = vld [vmem:[%s11695_s2 + $0x2a4] ss:$24 sps:$4 sm:$0xff]  }
 0x47f   :  { %v8579_v52 = vpop.trf.xlu1 }
 0x480   :  { %11905 = vst [vmem:[#allocation99_spill] sm:$0xff] %v8579_v52 }
 0x483   :  { %v8587_v55 = vpop.trf.xlu1 }
 0x484   :  { %11906 = vst [vmem:[#allocation100_spill] sm:$0xff] %v8587_v55 }
 0x485   :  { %3674 = vmatmul.mubr.bf16.gmra.mxu1 %v7233_v29  ;;  %v7239_v29 = vld [vmem:[%s11695_s2 + $0x2a0] ss:$24 sps:$4 sm:$0xff]  }
 0x486   :  { %3681 = vmatprep.mubr.bf16.mxu1 %v7234_v39  ;;  %v7240_v39 = vld [vmem:[%s11695_s2 + $0x2d4] ss:$24 sps:$4 sm:$0xff]  }
 0x487   :  { %v8589_v54 = vpop.trf.xlu1 }
 0x488   :  { %11907 = vst [vmem:[#allocation101_spill] sm:$0xff] %v8589_v54 }
 0x48b   :  { %v8597_v57 = vpop.trf.xlu1 }
 0x48c   :  { %11908 = vst [vmem:[#allocation102_spill] sm:$0xff] %v8597_v57  ;;  %v1006_v25 = vpack.c.bf16 %v8597_v57, %v8589_v54 }
 0x48d   :  { %3682 = vmatmul.mubr.bf16.gmra.mxu1 %v7236_v15  ;;  %v7242_v15 = vld [vmem:[%s11695_s2 + $0x2d0] ss:$24 sps:$4 sm:$0xff]  }
 0x48e   :  { %3689 = vmatprep.mubr.bf16.mxu1 %v7237_v44  ;;  %v7243_v44 = vld [vmem:[%s11695_s2 + $0x304] ss:$24 sps:$4 sm:$0xff]  }
 0x48f   :  { %v8599_v56 = vpop.trf.xlu1 }
 0x490   :  { %11909 = vst [vmem:[#allocation103_spill] sm:$0xff] %v8599_v56 }
 0x493   :  { %v8607_v30 = vpop.trf.xlu1 }
 0x494   :  { %11910 = vst [vmem:[#allocation104_spill] sm:$0xff] %v8607_v30 }
 0x495   :  { %3690 = vmatmul.mubr.bf16.gmra.mxu1 %v7239_v29  ;;  %v7245_v29 = vld [vmem:[%s11695_s2 + $0x300] ss:$24 sps:$4 sm:$0xff]  }
 0x496   :  { %3697 = vmatprep.mubr.bf16.mxu1 %v7240_v39  ;;  %v8626_v39 = vpack.c.bf16 %v8527_v14, %v8523_v17  ;;  %v7248_v17 = vld [vmem:[%s11695_s2 + $0x330] ss:$24 sps:$4 sm:$0xff]  }
 0x497   :  { %v8609_v38 = vpop.trf.xlu1 }
 0x498   :  { %11911 = vst [vmem:[#allocation105_spill] sm:$0xff] %v8609_v38 }
 0x49b   :  { %v8617_v33 = vpop.trf.xlu1 }
 0x49c   :  { %11912 = vst [vmem:[#allocation106_spill] sm:$0xff] %v8617_v33 }
 0x49d   :  { %3698 = vmatmul.mubr.bf16.gmra.mxu1 %v7242_v15  ;;  %v7246_v15 = vld [vmem:[%s11695_s2 + $0x334] ss:$24 sps:$4 sm:$0xff]  }
 0x49e   :  { %3705 = vmatprep.mubr.bf16.mxu1 %v7243_v44  ;;  %v1008_v44 = vpack.c.bf16 %v8617_v33, %v8609_v38 }
 0x49f   :  { %v8619_v24 = vpop.trf.xlu1 }
 0x4a0   :  { %11913 = vst [vmem:[#allocation107_spill] sm:$0xff] %v8619_v24 }
 0x4a3   :  { %v8628_v34 = vpop.trf.xlu1 }
 0x4a4   :  { %11914 = vst [vmem:[#allocation108_spill] sm:$0xff] %v8628_v34  ;;  %v1009_v21 = vpack.c.bf16 %v8628_v34, %v8619_v24 }
 0x4a5   :  { %3706 = vmatmul.mubr.bf16.gmra.mxu1 %v7245_v29  ;;  %v1007_v29 = vpack.c.bf16 %v8607_v30, %v8599_v56 }
 0x4a6   :  { %6789 = vmatpush3.bf16.msra.mxu0 %v1009_v21  ;;  %4636 = vmatpush1.bf16.msra.mxu1 %v1009_v21  ;;  %v8650_v21 = vpack.c.bf16 %v8511_v2, %v8507_v16  ;;  %v7251_v16 = vld [vmem:[%s11695_s2 + $0x360] ss:$24 sps:$4 sm:$0xff]  }
 0x4a7   :  { %6790 = vmatprep.subr.bf16.mxu0 %v8626_v39  ;;  %4637 = vmatprep.subr.bf16.mxu1 %v11883_v4 }
 0x4a8   :  { %3713 = vmatprep.mubr.bf16.mxu1 %v7246_v15  ;;  %v7249_v15 = vld [vmem:[%s11695_s2 + $0x364] ss:$24 sps:$4 sm:$0xff]  }
 0x4aa   :  { %6791 = vmatpush3.bf16.msra.mxu0 %v1008_v44  ;;  %4638 = vmatpush1.bf16.msra.mxu1 %v1008_v44  ;;  %v8661_v44 = vpack.c.bf16 %v8500_v31, %v8488_v22  ;;  %v1004_v22 = vpack.c.bf16 %v8577_v53, %v8569_v51 }
 0x4ab   :  { %6792 = vmatprep.subr.bf16.mxu0 %v8639_v12  ;;  %4639 = vmatprep.subr.bf16.mxu1 %v11883_v4 }
 0x4ad   :  { %3714 = vmatmul.mubr.bf16.gmra.mxu1 %v7248_v17  ;;  %v1005_v17 = vpack.c.bf16 %v8587_v55, %v8579_v52 }
 0x4ae   :  { %6793 = vmatpush3.bf16.msra.mxu0 %v1007_v29  ;;  %4640 = vmatpush1.bf16.msra.mxu1 %v1007_v29  ;;  %v8672_v29 = vpack.c.bf16 %v8471_v18, %v8455_v43  ;;  %v7254_v43 = vld [vmem:[%s11695_s2 + $0x390] ss:$24 sps:$4 sm:$0xff]  }
 0x4af   :  { %6794 = vmatprep.subr.bf16.mxu0 %v8650_v21  ;;  %4641 = vmatprep.subr.bf16.mxu1 %v11883_v4 }
 0x4b0   :  { %3721 = vmatprep.mubr.bf16.mxu1 %v7249_v15  ;;  %v7252_v15 = vld [vmem:[%s11695_s2 + $0x394] ss:$24 sps:$4 sm:$0xff]  }
 0x4b2   :  { %6795 = vmatpush3.bf16.msra.mxu0 %v1006_v25  ;;  %4642 = vmatpush1.bf16.msra.mxu1 %v1006_v25  ;;  %v8683_v25 = vpack.c.bf16 %v8441_v41, %v8427_v3  ;;  %v1002_v3 = vpack.c.bf16 %v8557_v40, %v8549_v19  ;;  %v7260_v19 = vld [vmem:[%s11695_s2 + $0x3f0] ss:$24 sps:$4 sm:$0xff]  }
 0x4b3   :  { %6796 = vmatprep.subr.bf16.mxu0 %v8661_v44  ;;  %4643 = vmatprep.subr.bf16.mxu1 %v11883_v4 }
 0x4b5   :  { %3722 = vmatmul.mubr.bf16.gmra.mxu1 %v7251_v16  ;;  %v1003_v16 = vpack.c.bf16 %v8567_v42, %v8559_v46 }
 0x4b6   :  { %6797 = vmatpush3.bf16.msra.mxu0 %v1005_v17  ;;  %4644 = vmatpush1.bf16.msra.mxu1 %v1005_v17  ;;  %v8694_v17 = vpack.c.bf16 %v8413_v1, %v8399_v60  ;;  %v1118_v60 = vpack.c.bf16 %v8481_v49, %v8481_v49 }
 0x4b7   :  { %6798 = vmatprep.subr.bf16.mxu0 %v8672_v29  ;;  %4645 = vmatprep.subr.bf16.mxu1 %v11883_v4 }
 0x4b8   :  { %3729 = vmatprep.mubr.bf16.mxu1 %v7252_v15  ;;  %v7255_v15 = vld [vmem:[%s11695_s2 + $0x3c4] ss:$24 sps:$4 sm:$0xff]  }
 0x4ba   :  { %6799 = vmatpush3.bf16.msra.mxu0 %v1004_v22  ;;  %4646 = vmatpush1.bf16.msra.mxu1 %v1004_v22  ;;  %v7257_v22 = vld [vmem:[%s11695_s2 + $0x3c0] ss:$24 sps:$4 sm:$0xff]  }
 0x4bb   :  { %6800 = vmatprep.subr.bf16.mxu0 %v8683_v25  ;;  %4647 = vmatprep.subr.bf16.mxu1 %v11883_v4 }
 0x4bd   :  { %3730 = vmatmul.mubr.bf16.gmra.mxu1 %v7254_v43  ;;  %v7258_v43 = vld [vmem:[%s11695_s2 + $0x3f4] ss:$24 sps:$4 sm:$0xff]  }
 0x4be   :  { %6801 = vmatpush3.bf16.msra.mxu0 %v1003_v16  ;;  %4648 = vmatpush1.bf16.msra.mxu1 %v1003_v16  ;;  %v7281_v16 = vld [vmem:[%s11695_s2 + $0x4] ss:$24 sps:$4 sm:$0xff]  }
 0x4bf   :  { %6802 = vmatprep.subr.bf16.mxu0 %v8694_v17  ;;  %4649 = vmatprep.subr.bf16.mxu1 %v11883_v4 }
 0x4c0   :  { %3737 = vmatprep.mubr.bf16.mxu1 %v7255_v15 }
 0x4c2   :  { %6803 = vmatpush3.bf16.msra.mxu0 %v1002_v3  ;;  %4650 = vmatpush1.bf16.msra.mxu1 %v1002_v3 }
 0x4c3   :  { %3545 = vmatprep.subr.bf16.mxu0 %v11883_v4  ;;  %4651 = vmatprep.subr.bf16.mxu1 %v11883_v4 }
 0x4c5   :  { %1233 = vmatmul.mubr.bf16.vlgmr.msra.gmra.mxu0 %v1118_v60  ;;  %3738 = vmatmul.mubr.bf16.gmra.mxu1 %v7257_v22  ;;  %v7293_v22 = vld [vmem:[%s11695_s2 + $0x5a4] ss:$24 sps:$4 sm:$0xff]  }
 0x4c6   :  { %v6782_v15 = vpop.f32.mrf.mxu1  ;;  %3546 = vmatpush1.bf16.msra.mxu0 %v8390_v58  ;;  %4652 = vmatpush2.bf16.msra.mxu1 %v8546_v50  ;;  %v7261_v58 = vld [vmem:[%s11695_s2 + $0x424] ss:$24 sps:$4 sm:$0xff]  }
 0x4c7   :  { %3547 = vmatprep.subr.bf16.mxu0 %v11883_v4  ;;  %4653 = vmatprep.subr.bf16.mxu1 %v11883_v4 }
 0x4c8   :  { %v6783_v3 = vpop.f32.mrf.mxu1  ;;  %3745 = vmatprep.mubr.bf16.mxu1 %v7258_v43  ;;  %3577 = vmatprep.mubr.bf16.mxu0 %v7281_v16  ;;  %v7296_v16 = vld [vmem:[%s11695_s2 + $0x5a0] ss:$24 sps:$4 sm:$0xff]  }
 0x4c9   :  { %v8722_v49 = vadd.f32 %v6783_v3, %v6782_v15  ;;  %v7297_v15 = vld [vmem:[%s11695_s2 + $0x94] ss:$24 sps:$4 sm:$0xff]   ;;  %v7302_v3 = vld [vmem:[%s11695_s2 + $0x5d0] ss:$24 sps:$4 sm:$0xff]  }
 0x4ca   :  { %v6785_v60 = vpop.f32.mrf.mxu1  ;;  %3548 = vmatpush1.bf16.msra.mxu0 %v8408_v63  ;;  %4654 = vmatpush2.bf16.msra.mxu1 %v8626_v39  ;;  %v7263_v63 = vld [vmem:[%s11695_s2 + $0x420] ss:$24 sps:$4 sm:$0xff]  }
 0x4cb   :  { %3549 = vmatprep.subr.bf16.mxu0 %v11883_v4  ;;  %4655 = vmatprep.subr.bf16.mxu1 %v11883_v4  ;;  %v7308_v60 = vld [vmem:[%s11695_s2 + $0x600] ss:$24 sps:$4 sm:$0xff]  }
 0x4cc   :  { %v6786_v50 = vpop.f32.mrf.mxu1 }
 0x4cd   :  { %3746 = vmatmul.mubr.bf16.gmra.mxu1 %v7260_v19  ;;  %v7264_v19 = vld [vmem:[%s11695_s2 + $0x454] ss:$24 sps:$4 sm:$0xff]  }
 0x4ce   :  { %3550 = vmatpush1.bf16.msra.mxu0 %v8419_v9  ;;  %4656 = vmatpush2.bf16.msra.mxu1 %v8639_v12  ;;  %v7270_v12 = vld [vmem:[%s11695_s2 + $0x4b4] ss:$24 sps:$4 sm:$0xff]  }
 0x4cf   :  { %3551 = vmatprep.subr.bf16.mxu0 %v11883_v4  ;;  %4657 = vmatprep.subr.bf16.mxu1 %v11883_v4  ;;  %v7285_v9 = vld [vmem:[%s11695_s2 + $0x34] ss:$24 sps:$4 sm:$0xff]  }
 0x4d0   :  { %3753 = vmatprep.mubr.bf16.mxu1 %v7261_v58  ;;  %v7309_v50 = vld [vmem:[%s11695_s2 + $0xf4] ss:$24 sps:$4 sm:$0xff]  }
 0x4d2   :  { %3552 = vmatpush1.bf16.msra.mxu0 %v8433_v5  ;;  %4658 = vmatpush2.bf16.msra.mxu1 %v8650_v21  ;;  %v7266_v5 = vld [vmem:[%s11695_s2 + $0x450] ss:$24 sps:$4 sm:$0xff]  }
 0x4d3   :  { %3553 = vmatprep.subr.bf16.mxu0 %v11883_v4  ;;  %4659 = vmatprep.subr.bf16.mxu1 %v11883_v4 }
 0x4d5   :  { %3754 = vmatmul.mubr.bf16.gmra.mxu1 %v7263_v63 }
 0x4d6   :  { %3554 = vmatpush1.bf16.msra.mxu0 %v8447_v48  ;;  %4660 = vmatpush2.bf16.msra.mxu1 %v8661_v44  ;;  %v7267_v48 = vld [vmem:[%s11695_s2 + $0x484] ss:$24 sps:$4 sm:$0xff]   ;;  %v7289_v44 = vld [vmem:[%s11695_s2 + $0x30] ss:$24 sps:$4 sm:$0xff]  }
 0x4d7   :  { %3555 = vmatprep.subr.bf16.mxu0 %v11883_v4  ;;  %4661 = vmatprep.subr.bf16.mxu1 %v11883_v4 }
 0x4d8   :  { %3761 = vmatprep.mubr.bf16.mxu1 %v7264_v19  ;;  %v7313_v19 = vld [vmem:[%s11695_s2 + $0xf0] ss:$24 sps:$4 sm:$0xff]  }
 0x4da   :  { %3556 = vmatpush1.bf16.msra.mxu0 %v8461_v28  ;;  %4662 = vmatpush2.bf16.msra.mxu1 %v8672_v29  ;;  %v7269_v28 = vld [vmem:[%s11695_s2 + $0x480] ss:$24 sps:$4 sm:$0xff]   ;;  %v7290_v29 = vld [vmem:[%s11695_s2 + $0x570] ss:$24 sps:$4 sm:$0xff]  }
 0x4db   :  { %3557 = vmatprep.subr.bf16.mxu0 %v11883_v4  ;;  %4663 = vmatprep.subr.bf16.mxu1 %v11883_v4 }
 0x4dd   :  { %3762 = vmatmul.mubr.bf16.gmra.mxu1 %v7266_v5  ;;  %v7314_v5 = vld [vmem:[%s11695_s2 + $0x630] ss:$24 sps:$4 sm:$0xff]  }
 0x4de   :  { %3558 = vmatpush1.bf16.msra.mxu0 %v8477_v35  ;;  %4664 = vmatpush2.bf16.msra.mxu1 %v8683_v25  ;;  %v7272_v35 = vld [vmem:[%s11695_s2 + $0x4b0] ss:$24 sps:$4 sm:$0xff]  }
 0x4df   :  { %3559 = vmatprep.subr.bf16.mxu0 %v11883_v4  ;;  %4665 = vmatprep.subr.bf16.mxu1 %v11883_v4 }
 0x4e0   :  { %3769 = vmatprep.mubr.bf16.mxu1 %v7267_v48  ;;  %v11915_v48 = vld [vmem:[#allocation38_spill] sm:$0xff] }
 0x4e2   :  { %3560 = vmatpush1.bf16.msra.mxu0 %v8494_v20  ;;  %4666 = vmatpush2.bf16.msra.mxu1 %v8694_v17  ;;  %v7273_v20 = vld [vmem:[%s11695_s2 + $0x4e4] ss:$24 sps:$4 sm:$0xff]  }
 0x4e3   :  { %3561 = vmatprep.subr.bf16.mxu0 %v11883_v4 }
 0x4e5   :  { %3770 = vmatmul.mubr.bf16.gmra.mxu1 %v7269_v28 }
 0x4e6   :  { %3562 = vmatpush2.bf16.msra.mxu0 %v8394_v61  ;;  %3777 = vmatprep.mubr.bf16.mxu1 %v7270_v12  ;;  %v7275_v61 = vld [vmem:[%s11695_s2 + $0x4e0] ss:$24 sps:$4 sm:$0xff]   ;;  %v7317_v12 = vld [vmem:[%s11695_s2 + $0x664] ss:$24 sps:$4 sm:$0xff]  }
 0x4e7   :  { %3563 = vmatprep.subr.bf16.mxu0 %v11883_v4 }
 0x4ea   :  { %3564 = vmatpush2.bf16.msra.mxu0 %v8386_v59  ;;  %v7276_v59 = vld [vmem:[%s11695_s2 + $0x514] ss:$24 sps:$4 sm:$0xff]  }
 0x4eb   :  { %3565 = vmatprep.subr.bf16.mxu0 %v11883_v4 }
 0x4ed   :  { %3778 = vmatmul.mubr.bf16.gmra.mxu1 %v7272_v35 }
 0x4ee   :  { %3566 = vmatpush2.bf16.msra.mxu0 %v8404_v0  ;;  %3785 = vmatprep.mubr.bf16.mxu1 %v7273_v20  ;;  %v7278_v0 = vld [vmem:[%s11695_s2 + $0x510] ss:$24 sps:$4 sm:$0xff]  }
 0x4ef   :  { %3567 = vmatprep.subr.bf16.mxu0 %v11883_v4  ;;  %v11916_v20 = vld [vmem:[#allocation41_spill] sm:$0xff] }
 0x4f2   :  { %3568 = vmatpush2.bf16.msra.mxu0 %v8424_v6  ;;  %v7282_v6 = vld [vmem:[%s11695_s2 + $0x544] ss:$24 sps:$4 sm:$0xff]  }
 0x4f3   :  { %3569 = vmatprep.subr.bf16.mxu0 %v11883_v4 }
 0x4f5   :  { %3786 = vmatmul.mubr.bf16.gmra.mxu1 %v7275_v61 }
 0x4f6   :  { %3570 = vmatpush2.bf16.msra.mxu0 %v8438_v32  ;;  %3793 = vmatprep.mubr.bf16.mxu1 %v7276_v59  ;;  %v7279_v32 = vld [vmem:[%s11695_s2] ss:$24 sps:$4 sm:$0xff]  }
 0x4f7   :  { %3571 = vmatprep.subr.bf16.mxu0 %v11883_v4 }
 0x4fa   :  { %3572 = vmatpush2.bf16.msra.mxu0 %v8452_v11  ;;  %v7284_v11 = vld [vmem:[%s11695_s2 + $0x540] ss:$24 sps:$4 sm:$0xff]  }
 0x4fb   :  { %3573 = vmatprep.subr.bf16.mxu0 %v11883_v4 }
 0x4fd   :  { %3794 = vmatmul.mubr.bf16.gmra.mxu1 %v7278_v0  ;;  %v7319_v0 = vld [vmem:[%s11695_s2 + $0x120] ss:$24 sps:$4 sm:$0xff]  }
 0x4fe   :  { %3574 = vmatpush2.bf16.msra.mxu0 %v8468_v36  ;;  %3801 = vmatprep.mubr.bf16.mxu1 %v7282_v6  ;;  %v7287_v36 = vld [vmem:[%s11695_s2 + $0x574] ss:$24 sps:$4 sm:$0xff]   ;;  %v7320_v6 = vld [vmem:[%s11695_s2 + $0x660] ss:$24 sps:$4 sm:$0xff]  }
 0x4ff   :  { %3575 = vmatprep.subr.bf16.mxu0 %v11883_v4 }
 0x502   :  { %3576 = vmatpush2.bf16.msra.mxu0 %v8485_v10 }
 0x503   :  { %4090 = vmatprep.subr.bf16.mxu0 %v11883_v4 }
 0x505   :  { %3578 = vmatmul.mubr.bf16.vlgmr.msra.gmra.mxu0 %v7279_v32  ;;  %3802 = vmatmul.mubr.bf16.gmra.mxu1 %v7284_v11  ;;  %v11917_v32 = vld [vmem:[#allocation44_spill] sm:$0xff]  ;;  %v7321_v11 = vld [vmem:[%s11695_s2 + $0x154] ss:$24 sps:$4 sm:$0xff]  }
 0x506   :  { %v6760_v39 = vpop.f32.mrf.mxu0  ;;  %4091 = vmatpush1.bf16.msra.mxu0 %v8223_v8  ;;  %3585 = vmatprep.mubr.bf16.mxu0 %v7285_v9  ;;  %v7291_v8 = vld [vmem:[%s11695_s2 + $0x64] ss:$24 sps:$4 sm:$0xff]  }
 0x507   :  { %4092 = vmatprep.subr.bf16.mxu0 %v11883_v4  ;;  %3809 = vmatprep.mubr.bf16.mxu1 %v7287_v36  ;;  %v7325_v36 = vld [vmem:[%s11695_s2 + $0x694] ss:$24 sps:$4 sm:$0xff]  }
 0x508   :  { %v6761_v10 = vpop.f32.mrf.mxu0 }
 0x509   :  { %v6762_v21 = vadd.f32 %v6761_v10, %v6760_v39  ;;  %v11918_v10 = vld [vmem:[#allocation47_spill] sm:$0xff] }
 0x50a   :  { %v6763_v25 = vpop.f32.mrf.mxu0  ;;  %4093 = vmatpush1.bf16.msra.mxu0 %v8232_v13  ;;  %v7295_v13 = vld [vmem:[%s11695_s2 + $0x60] ss:$24 sps:$4 sm:$0xff]  }
 0x50b   :  { %v8834_v17 = vadd.f32 %v8722_v49, %v6762_v21  ;;  %4094 = vmatprep.subr.bf16.mxu0 %v11883_v4  ;;  %v7303_v49 = vld [vmem:[%s11695_s2 + $0xc4] ss:$24 sps:$4 sm:$0xff]   ;;  %v7326_v25 = vld [vmem:[%s11695_s2 + $0x150] ss:$24 sps:$4 sm:$0xff]  }
 0x50c   :  { %v6764_v43 = vpop.f32.mrf.mxu0 }
 0x50d   :  { %3586 = vmatmul.mubr.bf16.gmra.mxu0 %v7289_v44  ;;  %3810 = vmatmul.mubr.bf16.gmra.mxu1 %v7290_v29  ;;  %v7323_v29 = vld [vmem:[%s11695_s2 + $0x690] ss:$24 sps:$4 sm:$0xff]  }
 0x50e   :  { %4095 = vmatpush1.bf16.msra.mxu0 %v8249_v62  ;;  %3593 = vmatprep.mubr.bf16.mxu0 %v7291_v8  ;;  %v7299_v62 = vld [vmem:[%s11695_s2 + $0x5d4] ss:$24 sps:$4 sm:$0xff]  }
 0x50f   :  { %4096 = vmatprep.subr.bf16.mxu0 %v11883_v4  ;;  %3817 = vmatprep.mubr.bf16.mxu1 %v7293_v22  ;;  %v11919_v8 = vld [vmem:[#allocation50_spill] sm:$0xff]  ;;  %v7329_v22 = vld [vmem:[%s11695_s2 + $0x6c4] ss:$24 sps:$4 sm:$0xff]  }
 0x512   :  { %4097 = vmatpush1.bf16.msra.mxu0 %v8270_v23  ;;  %v7301_v23 = vld [vmem:[%s11695_s2 + $0x90] ss:$24 sps:$4 sm:$0xff]  }
 0x513   :  { %4098 = vmatprep.subr.bf16.mxu0 %v11883_v4 }
 0x515   :  { %3594 = vmatmul.mubr.bf16.gmra.mxu0 %v7295_v13  ;;  %3818 = vmatmul.mubr.bf16.gmra.mxu1 %v7296_v16  ;;  %v7332_v13 = vld [vmem:[%s11695_s2 + $0xc] ss:$24 sps:$4 sm:$0xff]  }
 0x516   :  { %4099 = vmatpush1.bf16.msra.mxu0 %v8285_v27  ;;  %3601 = vmatprep.mubr.bf16.mxu0 %v7297_v15  ;;  %v7305_v27 = vld [vmem:[%s11695_s2 + $0x604] ss:$24 sps:$4 sm:$0xff]  }
 0x517   :  { %4100 = vmatprep.subr.bf16.mxu0 %v11883_v4  ;;  %3825 = vmatprep.mubr.bf16.mxu1 %v7299_v62  ;;  %v11920_v15 = vld [vmem:[#allocation53_spill] sm:$0xff] }
 0x51a   :  { %4101 = vmatpush1.bf16.msra.mxu0 %v8300_v37  ;;  %v7307_v37 = vld [vmem:[%s11695_s2 + $0xc0] ss:$24 sps:$4 sm:$0xff]  }
 0x51b   :  { %4102 = vmatprep.subr.bf16.mxu0 %v11883_v4 }
 0x51d   :  { %3602 = vmatmul.mubr.bf16.gmra.mxu0 %v7301_v23  ;;  %3826 = vmatmul.mubr.bf16.gmra.mxu1 %v7302_v3  ;;  %v7327_v3 = vld [vmem:[%s11695_s2 + $0x6c0] ss:$24 sps:$4 sm:$0xff]  }
 0x51e   :  { %4103 = vmatpush1.bf16.msra.mxu0 %v8315_v45  ;;  %3609 = vmatprep.mubr.bf16.mxu0 %v7303_v49  ;;  %v7311_v45 = vld [vmem:[%s11695_s2 + $0x634] ss:$24 sps:$4 sm:$0xff]   ;;  %v7330_v49 = vld [vmem:[%s11695_s2 + $0x8] ss:$24 sps:$4 sm:$0xff]  }
 0x51f   :  { %4104 = vmatprep.subr.bf16.mxu0 %v11883_v4  ;;  %3833 = vmatprep.mubr.bf16.mxu1 %v7305_v27  ;;  %v11921_v27 = vld [vmem:[#allocation56_spill] sm:$0xff] }
 0x522   :  { %4105 = vmatpush1.bf16.msra.mxu0 %v8330_v47 }
 0x523   :  { %4106 = vmatprep.subr.bf16.mxu0 %v11883_v4 }
 0x525   :  { %3610 = vmatmul.mubr.bf16.gmra.mxu0 %v7307_v37  ;;  %v8888_v58 = vpop.f32.mrf.mxu1  ;;  %3834 = vmatmul.mubr.bf16.gmra.mxu1 %v7308_v60  ;;  %v7335_v37 = vld [vmem:[%s11695_s2 + $0x6f4] ss:$24 sps:$4 sm:$0xff]  }
 0x526   :  { %4107 = vmatpush2.bf16.msra.mxu0 %v8219_v7  ;;  %3617 = vmatprep.mubr.bf16.mxu0 %v7309_v50  ;;  %v7315_v7 = vld [vmem:[%s11695_s2 + $0x124] ss:$24 sps:$4 sm:$0xff]  }
 0x527   :  { %v3645_v63 = vpop.f32.mrf.mxu1  ;;  %4108 = vmatprep.subr.bf16.mxu0 %v11883_v4  ;;  %3841 = vmatprep.mubr.bf16.mxu1 %v7311_v45  ;;  %v11922_v50 = vld [vmem:[#allocation76_spill] sm:$0xff] }
 0x528   :  { %v11923_v63 = vld [vmem:[#allocation75_spill] sm:$0xff] }
 0x529   :  { %v8892_v47 = vpop.f32.mrf.mxu1 }
 0x52a   :  { %4109 = vmatpush2.bf16.msra.mxu0 %v11915_v48  ;;  %v11925_v48 = vld [vmem:[#allocation73_spill] sm:$0xff] }
 0x52b   :  { %v3648_v28 = vpop.f32.mrf.mxu1  ;;  %4110 = vmatprep.subr.bf16.mxu0 %v11883_v4 }
 0x52c   :  { %v11926_v28 = vld [vmem:[#allocation72_spill] sm:$0xff] }
 0x52d   :  { %3618 = vmatmul.mubr.bf16.gmra.mxu0 %v7313_v19  ;;  %v8908_v35 = vpop.f32.mrf.mxu1  ;;  %3842 = vmatmul.mubr.bf16.gmra.mxu1 %v7314_v5  ;;  %v11924_v5 = vld [vmem:[#allocation74_spill] sm:$0xff] }
 0x52e   :  { %4111 = vmatpush2.bf16.msra.mxu0 %v11916_v20  ;;  %3625 = vmatprep.mubr.bf16.mxu0 %v7315_v7  ;;  %v7338_v20 = vld [vmem:[%s11695_s2 + $0x38] ss:$24 sps:$4 sm:$0xff]  }
 0x52f   :  { %v3653_v61 = vpop.f32.mrf.mxu1  ;;  %4112 = vmatprep.subr.bf16.mxu0 %v11883_v4  ;;  %3849 = vmatprep.mubr.bf16.mxu1 %v7317_v12  ;;  %v7333_v12 = vld [vmem:[%s11695_s2 + $0x6f0] ss:$24 sps:$4 sm:$0xff]  }
 0x530   :  { %v11927_v61 = vld [vmem:[#allocation71_spill] sm:$0xff] }
 0x531   :  { %v8912_v59 = vpop.f32.mrf.mxu1 }
 0x532   :  { %4113 = vmatpush2.bf16.msra.mxu0 %v11917_v32  ;;  %v11928_v32 = vld [vmem:[#allocation70_spill] sm:$0xff] }
 0x533   :  { %v3656_v9 = vpop.f32.mrf.mxu1  ;;  %4114 = vmatprep.subr.bf16.mxu0 %v11883_v4 }
 0x534   :  { %v11929_v9 = vld [vmem:[#allocation69_spill] sm:$0xff] }
 0x535   :  { %3626 = vmatmul.mubr.bf16.gmra.mxu0 %v7319_v0  ;;  %v8928_v39 = vpop.f32.mrf.mxu1  ;;  %3850 = vmatmul.mubr.bf16.gmra.mxu1 %v7320_v6  ;;  %v7341_v0 = vld [vmem:[%s11695_s2 + $0x724] ss:$24 sps:$4 sm:$0xff]  }
 0x536   :  { %4115 = vmatpush2.bf16.msra.mxu0 %v11918_v10  ;;  %3633 = vmatprep.mubr.bf16.mxu0 %v7321_v11  ;;  %v7342_v11 = vld [vmem:[%s11695_s2 + $0x6c] ss:$24 sps:$4 sm:$0xff]   ;;  %v11930_v10 = vld [vmem:[#allocation68_spill] sm:$0xff] }
 0x537   :  { %v3661_v21 = vpop.f32.mrf.mxu1  ;;  %4116 = vmatprep.subr.bf16.mxu0 %v11883_v4  ;;  %3857 = vmatprep.mubr.bf16.mxu1 %v7325_v36 }
 0x538   :  { %v11931_v21 = vld [vmem:[#allocation67_spill] sm:$0xff] }
 0x539   :  { %v8932_v44 = vpop.f32.mrf.mxu1 }
 0x53a   :  { %4117 = vmatpush2.bf16.msra.mxu0 %v11919_v8  ;;  %v11933_v8 = vld [vmem:[#allocation65_spill] sm:$0xff] }
 0x53b   :  { %v3664_v43 = vpop.f32.mrf.mxu1  ;;  %4118 = vmatprep.subr.bf16.mxu0 %v11883_v4 }
 0x53c   :  { %v7339_v43 = vld [vmem:[%s11695_s2 + $0x720] ss:$24 sps:$4 sm:$0xff]  }
 0x53d   :  { %3634 = vmatmul.mubr.bf16.gmra.mxu0 %v7326_v25  ;;  %v8948_v16 = vpop.f32.mrf.mxu1  ;;  %3858 = vmatmul.mubr.bf16.gmra.mxu1 %v7323_v29  ;;  %v11932_v25 = vld [vmem:[#allocation66_spill] sm:$0xff] }
 0x53e   :  { %4119 = vmatpush2.bf16.msra.mxu0 %v11920_v15  ;;  %3865 = vmatprep.mubr.bf16.mxu1 %v7329_v22  ;;  %v7344_v15 = vld [vmem:[%s11695_s2 + $0x68] ss:$24 sps:$4 sm:$0xff]  }
 0x53f   :  { %v3669_v62 = vpop.f32.mrf.mxu1  ;;  %4120 = vmatprep.subr.bf16.mxu0 %v11883_v4  ;;  %4122 = vmatprep.mubr.bf16.mxu0 %v7332_v13  ;;  %v7336_v4 = vld [vmem:[%s11695_s2 + $0x3c] ss:$24 sps:$4 sm:$0xff]  }
 0x540   :  { %v11934_v13 = vld [vmem:[#allocation64_spill] sm:$0xff]  ;;  %v11935_v62 = vld [vmem:[#allocation63_spill] sm:$0xff] }
 0x541   :  { %v8952_v23 = vpop.f32.mrf.mxu1 }
 0x542   :  { %4121 = vmatpush2.bf16.msra.mxu0 %v11921_v27  ;;  %v11936_v27 = vld [vmem:[#allocation62_spill] sm:$0xff] }
 0x543   :  { %v3672_v60 = vpop.f32.mrf.mxu1  ;;  %6810 = vmatprep.subr.mxu0 %v11922_v50 }
 0x544   :  { %v11937_v60 = vld [vmem:[#allocation61_spill] sm:$0xff] }
 0x545   :  { %v8968_v45 = vpop.f32.mrf.mxu1  ;;  %3866 = vmatmul.mubr.bf16.gmra.mxu1 %v7327_v3  ;;  %4123 = vmatmul.mubr.bf16.vlgmr.msra.gmra.mxu0 %v7330_v49  ;;  %v7347_v49 = vld [vmem:[%s11695_s2 + $0x754] ss:$24 sps:$4 sm:$0xff]  }
 0x546   :  { %6811 = vmatpush3.msra.mxu0 %v11923_v63  ;;  %3873 = vmatprep.mubr.bf16.mxu1 %v7335_v37  ;;  %v7348_v37 = vld [vmem:[%s11695_s2 + $0x9c] ss:$24 sps:$4 sm:$0xff]  }
 0x547   :  { %v3677_v19 = vpop.f32.mrf.mxu1  ;;  %6812 = vmatprep.subr.mxu0 %v11924_v5  ;;  %4130 = vmatprep.mubr.bf16.mxu0 %v7336_v4  ;;  %v11938_v4 = vld [vmem:[#allocation60_spill] sm:$0xff]  ;;  %v11939_v63 = vld [vmem:[#allocation59_spill] sm:$0xff]  ;;  %v11940_v5 = vld [vmem:[#allocation58_spill] sm:$0xff] }
 0x548   :  { %6813 = vmatpush3.msra.mxu0 %v11925_v48  ;;  %v11941_v48 = vld [vmem:[#allocation57_spill] sm:$0xff] }
 0x549   :  { %v8973_v7 = vpop.f32.mrf.mxu1  ;;  %6814 = vmatprep.subr.mxu0 %v11926_v28 }
 0x54a   :  { %6815 = vmatpush3.msra.mxu0 %v11927_v61  ;;  %v7350_v61 = vld [vmem:[%s11695_s2 + $0x98] ss:$24 sps:$4 sm:$0xff]  }
 0x54b   :  { %v3680_v6 = vpop.f32.mrf.mxu1  ;;  %6816 = vmatprep.subr.mxu0 %v11928_v32  ;;  %v7353_v32 = vld [vmem:[%s11695_s2 + $0x784] ss:$24 sps:$4 sm:$0xff]  }
 0x54c   :  { %6817 = vmatpush3.msra.mxu0 %v11929_v9  ;;  %v7354_v9 = vld [vmem:[%s11695_s2 + $0xcc] ss:$24 sps:$4 sm:$0xff]  }
 0x54d   :  { %v8991_v36 = vpop.f32.mrf.mxu1  ;;  %3874 = vmatmul.mubr.bf16.gmra.mxu1 %v7333_v12  ;;  %4131 = vmatmul.mubr.bf16.gmra.mxu0 %v7338_v20  ;;  %v7345_v12 = vld [vmem:[%s11695_s2 + $0x750] ss:$24 sps:$4 sm:$0xff]  }
 0x54e   :  { %6818 = vmatprep.subr.mxu0 %v11930_v10  ;;  %3881 = vmatprep.mubr.bf16.mxu1 %v7341_v0  ;;  %v11942_v20 = vld [vmem:[#allocation55_spill] sm:$0xff]  ;;  %v11943_v0 = vld [vmem:[#allocation54_spill] sm:$0xff] }
 0x54f   :  { %6819 = vmatpush3.msra.mxu0 %v11931_v21  ;;  %v3685_v29 = vpop.f32.mrf.mxu1  ;;  %4138 = vmatprep.mubr.bf16.mxu0 %v7342_v11  ;;  %v11944_v11 = vld [vmem:[#allocation52_spill] sm:$0xff]  ;;  %v11945_v10 = vld [vmem:[#allocation51_spill] sm:$0xff] }
 0x550   :  { %6820 = vmatprep.subr.mxu0 %v11932_v25  ;;  %v11946_v29 = vld [vmem:[#allocation49_spill] sm:$0xff]  ;;  %v11947_v25 = vld [vmem:[#allocation48_spill] sm:$0xff] }
 0x551   :  { %6821 = vmatpush3.msra.mxu0 %v11933_v8  ;;  %v8997_v22 = vpop.f32.mrf.mxu1 }
 0x552   :  { %6822 = vmatprep.subr.mxu0 %v11934_v13  ;;  %v11949_v13 = vld [vmem:[#allocation45_spill] sm:$0xff] }
 0x553   :  { %6823 = vmatpush3.msra.mxu0 %v11935_v62  ;;  %v3688_v3 = vpop.f32.mrf.mxu1  ;;  %v7351_v62 = vld [vmem:[%s11695_s2 + $0x780] ss:$24 sps:$4 sm:$0xff]  }
 0x554   :  { %6824 = vmatprep.subr.mxu0 %v11936_v27  ;;  %v11950_v3 = vld [vmem:[#allocation43_spill] sm:$0xff]  ;;  %v11951_v27 = vld [vmem:[#allocation42_spill] sm:$0xff] }
 0x555   :  { %6825 = vmatpush3.msra.mxu0 %v11937_v60  ;;  %v9015_v50 = vpop.f32.mrf.mxu1  ;;  %3882 = vmatmul.mubr.bf16.gmra.mxu1 %v7339_v43  ;;  %v11948_v43 = vld [vmem:[#allocation46_spill] sm:$0xff] }
 0x556   :  { %4139 = vmatmul.mubr.bf16.gmra.mxu0 %v7344_v15  ;;  %6826 = vmatprep.subr.mxu0 %v11938_v4  ;;  %v7359_v60 = vld [vmem:[%s11695_s2 + $0x7b4] ss:$24 sps:$4 sm:$0xff]  }
 0x557   :  { %6827 = vmatpush3.msra.mxu0 %v11939_v63  ;;  %v3693_v19 = vpop.f32.mrf.mxu1  ;;  %3889 = vmatprep.mubr.bf16.mxu1 %v7347_v49  ;;  %v7356_v49 = vld [vmem:[%s11695_s2 + $0xc8] ss:$24 sps:$4 sm:$0xff]   ;;  %v7360_v4 = vld [vmem:[%s11695_s2 + $0xfc] ss:$24 sps:$4 sm:$0xff]  }
 0x558   :  { %6828 = vmatprep.subr.mxu0 %v11940_v5  ;;  %4146 = vmatprep.mubr.bf16.mxu0 %v7348_v37  ;;  %v11952_v63 = vld [vmem:[#allocation40_spill] sm:$0xff]  ;;  %v11953_v19 = vld [vmem:[#allocation39_spill] sm:$0xff] }
 0x559   :  { %6829 = vmatpush3.msra.mxu0 %v11941_v48  ;;  %v9021_v28 = vpop.f32.mrf.mxu1  ;;  %v11954_v48 = vld [vmem:[#allocation36_spill] sm:$0xff] }
 0x55a   :  { %6830 = vmatprep.subr.mxu0 %v11942_v20 }
 0x55b   :  { %6831 = vmatpush3.msra.mxu0 %v11943_v0  ;;  %v3696_v6 = vpop.f32.mrf.mxu1  ;;  %v7362_v0 = vld [vmem:[%s11695_s2 + $0xf8] ss:$24 sps:$4 sm:$0xff]  }
 0x55c   :  { %6832 = vmatprep.subr.mxu0 %v11944_v11  ;;  %v7365_v6 = vld [vmem:[%s11695_s2 + $0x7e4] ss:$24 sps:$4 sm:$0xff]  }
 0x55d   :  { %6833 = vmatpush3.msra.mxu0 %v11945_v10  ;;  %v9039_v21 = vpop.f32.mrf.mxu1  ;;  %3890 = vmatmul.mubr.bf16.gmra.mxu1 %v7345_v12  ;;  %v7366_v11 = vld [vmem:[%s11695_s2 + $0x12c] ss:$24 sps:$4 sm:$0xff]  }
 0x55e   :  { %4147 = vmatmul.mubr.bf16.gmra.mxu0 %v7350_v61  ;;  %6834 = vmatprep.subr.mxu0 %v11946_v29  ;;  %v7357_v61 = vld [vmem:[%s11695_s2 + $0x7b0] ss:$24 sps:$4 sm:$0xff]  }
 0x55f   :  { %6835 = vmatpush3.msra.mxu0 %v11947_v25  ;;  %v3701_v8 = vpop.f32.mrf.mxu1  ;;  %3897 = vmatprep.mubr.bf16.mxu1 %v7353_v32  ;;  %v7363_v25 = vld [vmem:[%s11695_s2 + $0x7e0] ss:$24 sps:$4 sm:$0xff]  }
 0x560   :  { %6836 = vmatprep.subr.mxu0 %v11948_v43  ;;  %4154 = vmatprep.mubr.bf16.mxu0 %v7354_v9  ;;  %v7368_v8 = vld [vmem:[%s11695_s2 + $0x128] ss:$24 sps:$4 sm:$0xff]   ;;  %v7371_v43 = vld [vmem:[%s11695_s2 + $0x814] ss:$24 sps:$4 sm:$0xff]  }
 0x561   :  { %6837 = vmatpush3.msra.mxu0 %v11949_v13  ;;  %v9045_v15 = vpop.f32.mrf.mxu1 }
 0x562   :  { %6838 = vmatprep.subr.mxu0 %v11950_v3 }
 0x563   :  { %6839 = vmatpush3.msra.mxu0 %v11951_v27  ;;  %v3704_v37 = vpop.f32.mrf.mxu1 }
 0x564   :  { %6840 = vmatprep.subr.mxu0 %v11952_v63  ;;  %v7369_v37 = vld [vmem:[%s11695_s2 + $0x810] ss:$24 sps:$4 sm:$0xff]  }
 0x565   :  { %6841 = vmatpush3.msra.mxu0 %v11953_v19  ;;  %v9063_v5 = vpop.f32.mrf.mxu1  ;;  %3898 = vmatmul.mubr.bf16.gmra.mxu1 %v7351_v62  ;;  %v7372_v62 = vld [vmem:[%s11695_s2 + $0x15c] ss:$24 sps:$4 sm:$0xff]   ;;  %v7378_v19 = vld [vmem:[%s11695_s2 + $0x18c] ss:$24 sps:$4 sm:$0xff]  }
 0x566   :  { %4155 = vmatmul.mubr.bf16.gmra.mxu0 %v7356_v49  ;;  %6845 = vmatprep.subr.mxu0 %v11954_v48 }
 0x567   :  { %v3709_v12 = vpop.f32.mrf.mxu1  ;;  %3905 = vmatprep.mubr.bf16.mxu1 %v7359_v60  ;;  %4162 = vmatprep.mubr.bf16.mxu0 %v7360_v4  ;;  %v7374_v60 = vld [vmem:[%s11695_s2 + $0x158] ss:$24 sps:$4 sm:$0xff]   ;;  %v7377_v4 = vld [vmem:[%s11695_s2 + $0x844] ss:$24 sps:$4 sm:$0xff]  }
 0x569   :  { %v9066_v20 = vpop.f32.mrf.mxu1 }
 0x56a   :  { %11955 = vst [vmem:[#allocation38_spill] sm:$0xff] %v9066_v20 }
 0x56b   :  { %v3712_v32 = vpop.f32.mrf.mxu1 }
 0x56c   :  { %v7383_v32 = vld [vmem:[%s11695_s2 + $0x874] ss:$24 sps:$4 sm:$0xff]  }
 0x56d   :  { %v9080_v9 = vpop.f32.mrf.mxu1  ;;  %3906 = vmatmul.mubr.bf16.gmra.mxu1 %v7357_v61 }
 0x56e   :  { %11956 = vst [vmem:[#allocation41_spill] sm:$0xff] %v9080_v9  ;;  %4163 = vmatmul.mubr.bf16.gmra.mxu0 %v7362_v0  ;;  %3913 = vmatprep.mubr.bf16.mxu1 %v7365_v6  ;;  %v7375_v0 = vld [vmem:[%s11695_s2 + $0x840] ss:$24 sps:$4 sm:$0xff]  }
 0x56f   :  { %v3717_v10 = vpop.f32.mrf.mxu1  ;;  %4170 = vmatprep.mubr.bf16.mxu0 %v7366_v11  ;;  %v7380_v6 = vld [vmem:[%s11695_s2 + $0x188] ss:$24 sps:$4 sm:$0xff]  }
 0x570   :  { %v7384_v10 = vld [vmem:[%s11695_s2 + $0x1bc] ss:$24 sps:$4 sm:$0xff]  }
 0x571   :  { %v9082_v29 = vpop.f32.mrf.mxu1 }
 0x572   :  { %11957 = vst [vmem:[#allocation44_spill] sm:$0xff] %v9082_v29 }
 0x573   :  { %v3720_v13 = vpop.f32.mrf.mxu1 }
 0x575   :  { %v9096_v3 = vpop.f32.mrf.mxu1  ;;  %3914 = vmatmul.mubr.bf16.gmra.mxu1 %v7363_v25 }
 0x576   :  { %11958 = vst [vmem:[#allocation47_spill] sm:$0xff] %v9096_v3  ;;  %4171 = vmatmul.mubr.bf16.gmra.mxu0 %v7368_v8  ;;  %3921 = vmatprep.mubr.bf16.mxu1 %v7371_v43 }
 0x577   :  { %v3725_v49 = vpop.f32.mrf.mxu1  ;;  %4178 = vmatprep.mubr.bf16.mxu0 %v7372_v62 }
 0x579   :  { %v9098_v27 = vpop.f32.mrf.mxu1 }
 0x57a   :  { %11959 = vst [vmem:[#allocation50_spill] sm:$0xff] %v9098_v27 }
 0x57b   :  { %v3728_v63 = vpop.f32.mrf.mxu1 }
 0x57c   :  { %v7389_v63 = vld [vmem:[%s11695_s2 + $0x8a4] ss:$24 sps:$4 sm:$0xff]  }
 0x57d   :  { %v9112_v48 = vpop.f32.mrf.mxu1  ;;  %3922 = vmatmul.mubr.bf16.gmra.mxu1 %v7369_v37 }
 0x57e   :  { %11960 = vst [vmem:[#allocation53_spill] sm:$0xff] %v9112_v48  ;;  %4179 = vmatmul.mubr.bf16.gmra.mxu0 %v7374_v60  ;;  %3929 = vmatprep.mubr.bf16.mxu1 %v7377_v4  ;;  %v7381_v60 = vld [vmem:[%s11695_s2 + $0x870] ss:$24 sps:$4 sm:$0xff]  }
 0x57f   :  { %v3733_v12 = vpop.f32.mrf.mxu1  ;;  %4186 = vmatprep.mubr.bf16.mxu0 %v7378_v19  ;;  %v7386_v4 = vld [vmem:[%s11695_s2 + $0x1b8] ss:$24 sps:$4 sm:$0xff]  }
 0x581   :  { %v9114_v61 = vpop.f32.mrf.mxu1 }
 0x582   :  { %11961 = vst [vmem:[#allocation56_spill] sm:$0xff] %v9114_v61 }
 0x583   :  { %v3736_v11 = vpop.f32.mrf.mxu1 }
 0x585   :  { %v6804_v25 = vpop.f32.mrf.mxu0  ;;  %v9128_v8 = vpop.f32.mrf.mxu1  ;;  %3930 = vmatmul.mubr.bf16.gmra.mxu1 %v7375_v0 }
 0x586   :  { %11962 = vst [vmem:[#allocation76_spill] sm:$0xff] %v9128_v8  ;;  %4187 = vmatmul.mubr.bf16.gmra.mxu0 %v7380_v6  ;;  %3937 = vmatprep.mubr.bf16.mxu1 %v7383_v32  ;;  %v7390_v6 = vld [vmem:[%s11695_s2 + $0x1ec] ss:$24 sps:$4 sm:$0xff]  }
 0x587   :  { %v6805_v43 = vpop.f32.mrf.mxu0  ;;  %v3741_v13 = vpop.f32.mrf.mxu1  ;;  %4194 = vmatprep.mubr.bf16.mxu0 %v7384_v10 }
 0x588   :  { %v6806_v62 = vadd.f32 %v6805_v43, %v6804_v25  ;;  %v7392_v25 = vld [vmem:[%s11695_s2 + $0x1e8] ss:$24 sps:$4 sm:$0xff]   ;;  %v7395_v43 = vld [vmem:[%s11695_s2 + $0x8d4] ss:$24 sps:$4 sm:$0xff]  }
 0x589   :  { %v6807_v49 = vpop.f32.mrf.mxu0  ;;  %v9130_v37 = vpop.f32.mrf.mxu1 }
 0x58a   :  { %11963 = vst [vmem:[#allocation75_spill] sm:$0xff] %v9130_v37  ;;  %v1235_v19 = vadd.f32 %v6806_v62, %v8834_v17  ;;  %v7387_v17 = vld [vmem:[%s11695_s2 + $0x8a0] ss:$24 sps:$4 sm:$0xff]   ;;  %v7396_v62 = vld [vmem:[%s11695_s2 + $0x21c] ss:$24 sps:$4 sm:$0xff]  }
 0x58b   :  { %v6808_v12 = vpop.f32.mrf.mxu0  ;;  %v3744_v0 = vpop.f32.mrf.mxu1 }
 0x58c   :  { %1240 = vst [vmem:[#allocation2] sm:$0x3] %v1235_v19  ;;  %v7398_v19 = vld [vmem:[%s11695_s2 + $0x218] ss:$24 sps:$4 sm:$0xff]   ;;  %v7401_v12 = vld [vmem:[%s11695_s2 + $0x904] ss:$24 sps:$4 sm:$0xff]  }
 0x58d   :  { %v9145_v32 = vpop.f32.mrf.mxu1  ;;  %3938 = vmatmul.mubr.bf16.gmra.mxu1 %v7381_v60 }
 0x58e   :  { %11964 = vst [vmem:[#allocation74_spill] sm:$0xff] %v9145_v32  ;;  %4195 = vmatmul.mubr.bf16.gmra.mxu0 %v7386_v4  ;;  %3945 = vmatprep.mubr.bf16.mxu1 %v7389_v63  ;;  %v7393_v63 = vld [vmem:[%s11695_s2 + $0x8d0] ss:$24 sps:$4 sm:$0xff]  }
 0x58f   :  { %v3749_v11 = vpop.f32.mrf.mxu1  ;;  %4202 = vmatprep.mubr.bf16.mxu0 %v7390_v6  ;;  %v7402_v6 = vld [vmem:[%s11695_s2 + $0x24c] ss:$24 sps:$4 sm:$0xff]  }
 0x591   :  { %v9147_v10 = vpop.f32.mrf.mxu1 }
 0x592   :  { %11965 = vst [vmem:[#allocation73_spill] sm:$0xff] %v9147_v10 }
 0x593   :  { %v3752_v13 = vpop.f32.mrf.mxu1 }
 0x594   :  { %v7404_v13 = vld [vmem:[%s11695_s2 + $0x248] ss:$24 sps:$4 sm:$0xff]  }
 0x595   :  { %v9161_v49 = vpop.f32.mrf.mxu1  ;;  %3946 = vmatmul.mubr.bf16.gmra.mxu1 %v7387_v17 }
 0x596   :  { %11966 = vst [vmem:[#allocation72_spill] sm:$0xff] %v9161_v49  ;;  %4203 = vmatmul.mubr.bf16.gmra.mxu0 %v7392_v25  ;;  %3953 = vmatprep.mubr.bf16.mxu1 %v7395_v43  ;;  %v7399_v43 = vld [vmem:[%s11695_s2 + $0x900] ss:$24 sps:$4 sm:$0xff]  }
 0x597   :  { %v3757_v60 = vpop.f32.mrf.mxu1  ;;  %4210 = vmatprep.mubr.bf16.mxu0 %v7396_v62  ;;  %v7407_v62 = vld [vmem:[%s11695_s2 + $0x934] ss:$24 sps:$4 sm:$0xff]  }
 0x599   :  { %v9163_v4 = vpop.f32.mrf.mxu1 }
 0x59a   :  { %11967 = vst [vmem:[#allocation71_spill] sm:$0xff] %v9163_v4 }
 0x59b   :  { %v3760_v0 = vpop.f32.mrf.mxu1 }
 0x59d   :  { %v9177_v11 = vpop.f32.mrf.mxu1  ;;  %3954 = vmatmul.mubr.bf16.gmra.mxu1 %v7393_v63  ;;  %v7408_v63 = vld [vmem:[%s11695_s2 + $0x27c] ss:$24 sps:$4 sm:$0xff]  }
 0x59e   :  { %11968 = vst [vmem:[#allocation70_spill] sm:$0xff] %v9177_v11  ;;  %4211 = vmatmul.mubr.bf16.gmra.mxu0 %v7398_v19  ;;  %3961 = vmatprep.mubr.bf16.mxu1 %v7401_v12  ;;  %v7434_v11 = vld [vmem:[%s11695_s2 + $0x338] ss:$24 sps:$4 sm:$0xff]  }
 0x59f   :  { %v3765_v17 = vpop.f32.mrf.mxu1  ;;  %4218 = vmatprep.mubr.bf16.mxu0 %v7402_v6  ;;  %v7405_v6 = vld [vmem:[%s11695_s2 + $0x930] ss:$24 sps:$4 sm:$0xff]  }
 0x5a0   :  { %v7410_v17 = vld [vmem:[%s11695_s2 + $0x278] ss:$24 sps:$4 sm:$0xff]  }
 0x5a1   :  { %v9179_v25 = vpop.f32.mrf.mxu1 }
 0x5a2   :  { %11969 = vst [vmem:[#allocation69_spill] sm:$0xff] %v9179_v25 }
 0x5a3   :  { %v3768_v60 = vpop.f32.mrf.mxu1 }
 0x5a4   :  { %v7413_v60 = vld [vmem:[%s11695_s2 + $0x964] ss:$24 sps:$4 sm:$0xff]  }
 0x5a5   :  { %v9193_v19 = vpop.f32.mrf.mxu1  ;;  %3962 = vmatmul.mubr.bf16.gmra.mxu1 %v7399_v43  ;;  %v7414_v43 = vld [vmem:[%s11695_s2 + $0x2ac] ss:$24 sps:$4 sm:$0xff]  }
 0x5a6   :  { %11970 = vst [vmem:[#allocation68_spill] sm:$0xff] %v9193_v19  ;;  %4219 = vmatmul.mubr.bf16.gmra.mxu0 %v7404_v13  ;;  %3969 = vmatprep.mubr.bf16.mxu1 %v7407_v62 }
 0x5a7   :  { %v3773_v12 = vpop.f32.mrf.mxu1  ;;  %4226 = vmatprep.mubr.bf16.mxu0 %v7408_v63 }
 0x5a8   :  { %v7411_v12 = vld [vmem:[%s11695_s2 + $0x960] ss:$24 sps:$4 sm:$0xff]  }
 0x5a9   :  { %v9195_v0 = vpop.f32.mrf.mxu1 }
 0x5aa   :  { %11971 = vst [vmem:[#allocation67_spill] sm:$0xff] %v9195_v0  ;;  %v7419_v0 = vld [vmem:[%s11695_s2 + $0x994] ss:$24 sps:$4 sm:$0xff]  }
 0x5ab   :  { %v3776_v19 = vpop.f32.mrf.mxu1 }
 0x5ac   :  { %v7416_v19 = vld [vmem:[%s11695_s2 + $0x2a8] ss:$24 sps:$4 sm:$0xff]  }
 0x5ad   :  { %v9209_v13 = vpop.f32.mrf.mxu1  ;;  %3970 = vmatmul.mubr.bf16.gmra.mxu1 %v7405_v6  ;;  %v7420_v6 = vld [vmem:[%s11695_s2 + $0x2dc] ss:$24 sps:$4 sm:$0xff]  }
 0x5ae   :  { %11972 = vst [vmem:[#allocation66_spill] sm:$0xff] %v9209_v13  ;;  %4227 = vmatmul.mubr.bf16.gmra.mxu0 %v7410_v17  ;;  %3977 = vmatprep.mubr.bf16.mxu1 %v7413_v60 }
 0x5af   :  { %v3781_v62 = vpop.f32.mrf.mxu1  ;;  %4234 = vmatprep.mubr.bf16.mxu0 %v7414_v43 }
 0x5b0   :  { %v7417_v62 = vld [vmem:[%s11695_s2 + $0x990] ss:$24 sps:$4 sm:$0xff]  }
 0x5b1   :  { %v9211_v63 = vpop.f32.mrf.mxu1 }
 0x5b2   :  { %11973 = vst [vmem:[#allocation65_spill] sm:$0xff] %v9211_v63  ;;  %v7425_v63 = vld [vmem:[%s11695_s2 + $0x9c4] ss:$24 sps:$4 sm:$0xff]  }
 0x5b3   :  { %v3784_v13 = vpop.f32.mrf.mxu1 }
 0x5b4   :  { %v7422_v13 = vld [vmem:[%s11695_s2 + $0x2d8] ss:$24 sps:$4 sm:$0xff]  }
 0x5b5   :  { %v9225_v17 = vpop.f32.mrf.mxu1  ;;  %3978 = vmatmul.mubr.bf16.gmra.mxu1 %v7411_v12 }
 0x5b6   :  { %11974 = vst [vmem:[#allocation64_spill] sm:$0xff] %v9225_v17  ;;  %4235 = vmatmul.mubr.bf16.gmra.mxu0 %v7416_v19  ;;  %3985 = vmatprep.mubr.bf16.mxu1 %v7419_v0  ;;  %v7426_v0 = vld [vmem:[%s11695_s2 + $0x30c] ss:$24 sps:$4 sm:$0xff]  }
 0x5b7   :  { %v3789_v60 = vpop.f32.mrf.mxu1  ;;  %4242 = vmatprep.mubr.bf16.mxu0 %v7420_v6 }
 0x5b8   :  { %v7423_v60 = vld [vmem:[%s11695_s2 + $0x9c0] ss:$24 sps:$4 sm:$0xff]  }
 0x5b9   :  { %v9227_v43 = vpop.f32.mrf.mxu1 }
 0x5ba   :  { %11975 = vst [vmem:[#allocation63_spill] sm:$0xff] %v9227_v43  ;;  %v7431_v43 = vld [vmem:[%s11695_s2 + $0x9f4] ss:$24 sps:$4 sm:$0xff]  }
 0x5bb   :  { %v3792_v17 = vpop.f32.mrf.mxu1 }
 0x5bc   :  { %v7428_v17 = vld [vmem:[%s11695_s2 + $0x308] ss:$24 sps:$4 sm:$0xff]  }
 0x5bd   :  { %v9241_v12 = vpop.f32.mrf.mxu1  ;;  %3986 = vmatmul.mubr.bf16.gmra.mxu1 %v7417_v62 }
 0x5be   :  { %11976 = vst [vmem:[#allocation62_spill] sm:$0xff] %v9241_v12  ;;  %4243 = vmatmul.mubr.bf16.gmra.mxu0 %v7422_v13  ;;  %3993 = vmatprep.mubr.bf16.mxu1 %v7425_v63  ;;  %v7432_v63 = vld [vmem:[%s11695_s2 + $0x33c] ss:$24 sps:$4 sm:$0xff]  }
 0x5bf   :  { %v3797_v19 = vpop.f32.mrf.mxu1  ;;  %4250 = vmatprep.mubr.bf16.mxu0 %v7426_v0 }
 0x5c1   :  { %v9243_v6 = vpop.f32.mrf.mxu1 }
 0x5c2   :  { %11977 = vst [vmem:[#allocation61_spill] sm:$0xff] %v9243_v6 }
 0x5c3   :  { %v3800_v12 = vpop.f32.mrf.mxu1 }
 0x5c4   :  { %v7429_v12 = vld [vmem:[%s11695_s2 + $0x9f0] ss:$24 sps:$4 sm:$0xff]  }
 0x5c5   :  { %v9257_v62 = vpop.f32.mrf.mxu0  ;;  %v9259_v13 = vpop.f32.mrf.mxu1  ;;  %3994 = vmatmul.mubr.bf16.gmra.mxu1 %v7423_v60  ;;  %v7437_v60 = vld [vmem:[%s11695_s2 + $0xa24] ss:$24 sps:$4 sm:$0xff]  }
 0x5c6   :  { %11978 = vst [vmem:[#allocation60_spill] sm:$0xff] %v9259_v13  ;;  %4251 = vmatmul.mubr.bf16.gmra.mxu0 %v7428_v17  ;;  %4001 = vmatprep.mubr.bf16.mxu1 %v7431_v43 }
 0x5c7   :  { %v3581_v0 = vpop.f32.mrf.mxu0  ;;  %v3805_v19 = vpop.f32.mrf.mxu1  ;;  %4258 = vmatprep.mubr.bf16.mxu0 %v7432_v63  ;;  %v7440_v63 = vld [vmem:[%s11695_s2 + $0x36c] ss:$24 sps:$4 sm:$0xff]  }
 0x5c9   :  { %v9261_v6 = vpop.f32.mrf.mxu0  ;;  %v9263_v25 = vpop.f32.mrf.mxu1 }
 0x5ca   :  { %11979 = vst [vmem:[#allocation59_spill] sm:$0xff] %v9263_v25 }
 0x5cb   :  { %v3584_v43 = vpop.f32.mrf.mxu0  ;;  %v3808_v17 = vpop.f32.mrf.mxu1 }
 0x5cc   :  { %v7435_v43 = vld [vmem:[%s11695_s2 + $0xa20] ss:$24 sps:$4 sm:$0xff]  }
 0x5cd   :  { %v9277_v0 = vpop.f32.mrf.mxu0  ;;  %v9279_v19 = vpop.f32.mrf.mxu1  ;;  %4002 = vmatmul.mubr.bf16.gmra.mxu1 %v7429_v12  ;;  %v7438_v17 = vld [vmem:[%s11695_s2 + $0x368] ss:$24 sps:$4 sm:$0xff]  }
 0x5ce   :  { %11980 = vst [vmem:[#allocation58_spill] sm:$0xff] %v9279_v19  ;;  %4259 = vmatmul.mubr.bf16.gmra.mxu0 %v7434_v11  ;;  %4009 = vmatprep.mubr.bf16.mxu1 %v7437_v60  ;;  %v7443_v11 = vld [vmem:[%s11695_s2 + $0xa54] ss:$24 sps:$4 sm:$0xff]  }
 0x5cf   :  { %v3589_v25 = vpop.f32.mrf.mxu0  ;;  %v3813_v13 = vpop.f32.mrf.mxu1  ;;  %4266 = vmatprep.mubr.bf16.mxu0 %v7440_v63 }
 0x5d0   :  { %v7446_v13 = vld [vmem:[%s11695_s2 + $0x39c] ss:$24 sps:$4 sm:$0xff]  }
 0x5d1   :  { %v9281_v4 = vpop.f32.mrf.mxu0  ;;  %v9283_v49 = vpop.f32.mrf.mxu1 }
 0x5d2   :  { %11981 = vst [vmem:[#allocation57_spill] sm:$0xff] %v9283_v49 }
 0x5d3   :  { %v3592_v12 = vpop.f32.mrf.mxu0  ;;  %v3816_v25 = vpop.f32.mrf.mxu1 }
 0x5d4   :  { %v7441_v12 = vld [vmem:[%s11695_s2 + $0xa50] ss:$24 sps:$4 sm:$0xff]  }
 0x5d5   :  { %v9297_v60 = vpop.f32.mrf.mxu0  ;;  %v9299_v63 = vpop.f32.mrf.mxu1  ;;  %4010 = vmatmul.mubr.bf16.gmra.mxu1 %v7435_v43  ;;  %v7444_v25 = vld [vmem:[%s11695_s2 + $0x398] ss:$24 sps:$4 sm:$0xff]   ;;  %v7449_v43 = vld [vmem:[%s11695_s2 + $0xa84] ss:$24 sps:$4 sm:$0xff]  }
 0x5d6   :  { %11982 = vst [vmem:[#allocation55_spill] sm:$0xff] %v9299_v63  ;;  %4267 = vmatmul.mubr.bf16.gmra.mxu0 %v7438_v17  ;;  %4017 = vmatprep.mubr.bf16.mxu1 %v7443_v11 }
 0x5d7   :  { %v3597_v49 = vpop.f32.mrf.mxu0  ;;  %v3821_v19 = vpop.f32.mrf.mxu1  ;;  %4274 = vmatprep.mubr.bf16.mxu0 %v7446_v13 }
 0x5d8   :  { %v7452_v19 = vld [vmem:[%s11695_s2 + $0x3cc] ss:$24 sps:$4 sm:$0xff]  }
 0x5d9   :  { %v9301_v10 = vpop.f32.mrf.mxu0  ;;  %v9303_v32 = vpop.f32.mrf.mxu1 }
 0x5da   :  { %11983 = vst [vmem:[#allocation54_spill] sm:$0xff] %v9303_v32 }
 0x5db   :  { %v3600_v17 = vpop.f32.mrf.mxu0  ;;  %v3824_v49 = vpop.f32.mrf.mxu1 }
 0x5dc   :  { %v7447_v17 = vld [vmem:[%s11695_s2 + $0xa80] ss:$24 sps:$4 sm:$0xff]  }
 0x5dd   :  { %v9317_v11 = vpop.f32.mrf.mxu0  ;;  %v9319_v13 = vpop.f32.mrf.mxu1  ;;  %4018 = vmatmul.mubr.bf16.gmra.mxu1 %v7441_v12  ;;  %v7450_v49 = vld [vmem:[%s11695_s2 + $0x3c8] ss:$24 sps:$4 sm:$0xff]   ;;  %v7455_v12 = vld [vmem:[%s11695_s2 + $0xab4] ss:$24 sps:$4 sm:$0xff]  }
 0x5de   :  { %11984 = vst [vmem:[#allocation52_spill] sm:$0xff] %v9319_v13  ;;  %4275 = vmatmul.mubr.bf16.gmra.mxu0 %v7444_v25  ;;  %4025 = vmatprep.mubr.bf16.mxu1 %v7449_v43 }
 0x5df   :  { %v3605_v32 = vpop.f32.mrf.mxu0  ;;  %v3829_v63 = vpop.f32.mrf.mxu1  ;;  %4282 = vmatprep.mubr.bf16.mxu0 %v7452_v19 }
 0x5e0   :  { %v7458_v63 = vld [vmem:[%s11695_s2 + $0x3fc] ss:$24 sps:$4 sm:$0xff]  }
 0x5e1   :  { %v9321_v37 = vpop.f32.mrf.mxu0  ;;  %v9323_v8 = vpop.f32.mrf.mxu1 }
 0x5e2   :  { %11985 = vst [vmem:[#allocation51_spill] sm:$0xff] %v9323_v8 }
 0x5e3   :  { %v3608_v25 = vpop.f32.mrf.mxu0  ;;  %v3832_v32 = vpop.f32.mrf.mxu1 }
 0x5e4   :  { %v7453_v25 = vld [vmem:[%s11695_s2 + $0xab0] ss:$24 sps:$4 sm:$0xff]  }
 0x5e5   :  { %v9337_v43 = vpop.f32.mrf.mxu0  ;;  %v9339_v19 = vpop.f32.mrf.mxu1  ;;  %4026 = vmatmul.mubr.bf16.gmra.mxu1 %v7447_v17  ;;  %v7456_v32 = vld [vmem:[%s11695_s2 + $0x3f8] ss:$24 sps:$4 sm:$0xff]   ;;  %v7461_v17 = vld [vmem:[%s11695_s2 + $0xae4] ss:$24 sps:$4 sm:$0xff]  }
 0x5e6   :  { %11986 = vst [vmem:[#allocation49_spill] sm:$0xff] %v9339_v19  ;;  %4283 = vmatmul.mubr.bf16.gmra.mxu0 %v7450_v49  ;;  %4033 = vmatprep.mubr.bf16.mxu1 %v7455_v12 }
 0x5e7   :  { %v3613_v8 = vpop.f32.mrf.mxu0  ;;  %v3837_v13 = vpop.f32.mrf.mxu1  ;;  %4290 = vmatprep.mubr.bf16.mxu0 %v7458_v63 }
 0x5e8   :  { %v7464_v13 = vld [vmem:[%s11695_s2 + $0x42c] ss:$24 sps:$4 sm:$0xff]  }
 0x5e9   :  { %v9341_v40 = vpop.f32.mrf.mxu0  ;;  %v9343_v1 = vpop.f32.mrf.mxu1 }
 0x5ea   :  { %11987 = vst [vmem:[#allocation48_spill] sm:$0xff] %v9343_v1 }
 0x5eb   :  { %v3616_v49 = vpop.f32.mrf.mxu0  ;;  %v3840_v8 = vpop.f32.mrf.mxu1 }
 0x5ec   :  { %v7459_v49 = vld [vmem:[%s11695_s2 + $0xae0] ss:$24 sps:$4 sm:$0xff]  }
 0x5ed   :  { %v9357_v12 = vpop.f32.mrf.mxu0  ;;  %v9359_v63 = vpop.f32.mrf.mxu1  ;;  %4034 = vmatmul.mubr.bf16.gmra.mxu1 %v7453_v25  ;;  %v7462_v8 = vld [vmem:[%s11695_s2 + $0x428] ss:$24 sps:$4 sm:$0xff]   ;;  %v7467_v25 = vld [vmem:[%s11695_s2 + $0xb14] ss:$24 sps:$4 sm:$0xff]  }
 0x5ee   :  { %11988 = vst [vmem:[#allocation46_spill] sm:$0xff] %v9359_v63  ;;  %4291 = vmatmul.mubr.bf16.gmra.mxu0 %v7456_v32  ;;  %4041 = vmatprep.mubr.bf16.mxu1 %v7461_v17 }
 0x5ef   :  { %v3621_v1 = vpop.f32.mrf.mxu0  ;;  %v3845_v19 = vpop.f32.mrf.mxu1  ;;  %4298 = vmatprep.mubr.bf16.mxu0 %v7464_v13 }
 0x5f0   :  { %v7470_v19 = vld [vmem:[%s11695_s2 + $0x45c] ss:$24 sps:$4 sm:$0xff]  }
 0x5f1   :  { %v9361_v46 = vpop.f32.mrf.mxu0  ;;  %v9363_v61 = vpop.f32.mrf.mxu1 }
 0x5f2   :  { %11989 = vst [vmem:[#allocation45_spill] sm:$0xff] %v9363_v61 }
 0x5f3   :  { %v3624_v32 = vpop.f32.mrf.mxu0  ;;  %v3848_v1 = vpop.f32.mrf.mxu1 }
 0x5f4   :  { %v7465_v32 = vld [vmem:[%s11695_s2 + $0xb10] ss:$24 sps:$4 sm:$0xff]  }
 0x5f5   :  { %v9377_v17 = vpop.f32.mrf.mxu0  ;;  %v9379_v13 = vpop.f32.mrf.mxu1  ;;  %4042 = vmatmul.mubr.bf16.gmra.mxu1 %v7459_v49  ;;  %v7468_v1 = vld [vmem:[%s11695_s2 + $0x458] ss:$24 sps:$4 sm:$0xff]   ;;  %v7473_v49 = vld [vmem:[%s11695_s2 + $0xb44] ss:$24 sps:$4 sm:$0xff]  }
 0x5f6   :  { %11990 = vst [vmem:[#allocation43_spill] sm:$0xff] %v9379_v13  ;;  %4299 = vmatmul.mubr.bf16.gmra.mxu0 %v7462_v8  ;;  %4049 = vmatprep.mubr.bf16.mxu1 %v7467_v25 }
 0x5f7   :  { %v3629_v61 = vpop.f32.mrf.mxu0  ;;  %v3853_v63 = vpop.f32.mrf.mxu1  ;;  %4306 = vmatprep.mubr.bf16.mxu0 %v7470_v19 }
 0x5f8   :  { %v7476_v63 = vld [vmem:[%s11695_s2 + $0x48c] ss:$24 sps:$4 sm:$0xff]  }
 0x5f9   :  { %v9381_v42 = vpop.f32.mrf.mxu0  ;;  %v9383_v41 = vpop.f32.mrf.mxu1 }
 0x5fa   :  { %11991 = vst [vmem:[#allocation42_spill] sm:$0xff] %v9383_v41 }
 0x5fb   :  { %v3632_v8 = vpop.f32.mrf.mxu0  ;;  %v3856_v61 = vpop.f32.mrf.mxu1 }
 0x5fc   :  { %v7471_v8 = vld [vmem:[%s11695_s2 + $0xb40] ss:$24 sps:$4 sm:$0xff]  }
 0x5fd   :  { %v9397_v25 = vpop.f32.mrf.mxu0  ;;  %v9399_v19 = vpop.f32.mrf.mxu1  ;;  %4050 = vmatmul.mubr.bf16.gmra.mxu1 %v7465_v32  ;;  %v7474_v61 = vld [vmem:[%s11695_s2 + $0x488] ss:$24 sps:$4 sm:$0xff]   ;;  %v7479_v32 = vld [vmem:[%s11695_s2 + $0xb74] ss:$24 sps:$4 sm:$0xff]  }
 0x5fe   :  { %11992 = vst [vmem:[#allocation40_spill] sm:$0xff] %v9399_v19  ;;  %4307 = vmatmul.mubr.bf16.gmra.mxu0 %v7468_v1  ;;  %4057 = vmatprep.mubr.bf16.mxu1 %v7473_v49 }
 0x5ff   :  { %v3637_v41 = vpop.f32.mrf.mxu0  ;;  %v3861_v13 = vpop.f32.mrf.mxu1  ;;  %4314 = vmatprep.mubr.bf16.mxu0 %v7476_v63 }
 0x600   :  { %v7482_v13 = vld [vmem:[%s11695_s2 + $0x4bc] ss:$24 sps:$4 sm:$0xff]  }
 0x601   :  { %v9401_v51 = vpop.f32.mrf.mxu0  ;;  %v9403_v48 = vpop.f32.mrf.mxu1 }
 0x602   :  { %11993 = vst [vmem:[#allocation39_spill] sm:$0xff] %v9403_v48 }
 0x603   :  { %v3640_v1 = vpop.f32.mrf.mxu0  ;;  %v3864_v41 = vpop.f32.mrf.mxu1 }
 0x604   :  { %v7477_v41 = vld [vmem:[%s11695_s2 + $0xb70] ss:$24 sps:$4 sm:$0xff]  }
 0x605   :  { %v9417_v49 = vpop.f32.mrf.mxu1  ;;  %4058 = vmatmul.mubr.bf16.gmra.mxu1 %v7471_v8  ;;  %v4124_v63 = vpop.f32.mrf.mxu0 }
 0x606   :  { %11994 = vst [vmem:[#allocation36_spill] sm:$0xff] %v9417_v49  ;;  %v9420_v48 = vadd.f32 %v4124_v63, %v9257_v62  ;;  %4315 = vmatmul.mubr.bf16.gmra.mxu0 %v7474_v61  ;;  %4065 = vmatprep.mubr.bf16.mxu1 %v7479_v32  ;;  %v7480_v62 = vld [vmem:[%s11695_s2 + $0x4b8] ss:$24 sps:$4 sm:$0xff]   ;;  %v7488_v61 = vld [vmem:[%s11695_s2 + $0x4ec] ss:$24 sps:$4 sm:$0xff]  }
 0x607   :  { %v3869_v19 = vpop.f32.mrf.mxu1  ;;  %v4126_v53 = vpop.f32.mrf.mxu0  ;;  %4322 = vmatprep.mubr.bf16.mxu0 %v7482_v13 }
 0x608   :  { %v7485_v19 = vld [vmem:[%s11695_s2 + $0xba4] ss:$24 sps:$4 sm:$0xff]  }
 0x609   :  { %v9422_v18 = vpop.f32.mrf.mxu1  ;;  %v4127_v1 = vpop.f32.mrf.mxu0 }
 0x60a   :  { %11995 = vst [vmem:[#allocation109_spill] sm:$0xff] %v9422_v18  ;;  %v9428_v52 = vadd.f32 %v4127_v1, %v9261_v6 }
 0x60b   :  { %v3872_v53 = vpop.f32.mrf.mxu1  ;;  %v4129_v8 = vpop.f32.mrf.mxu0 }
 0x60c   :  { %v7483_v8 = vld [vmem:[%s11695_s2 + $0xba0] ss:$24 sps:$4 sm:$0xff]  }
 0x60d   :  { %v9439_v32 = vpop.f32.mrf.mxu1  ;;  %4066 = vmatmul.mubr.bf16.gmra.mxu1 %v7477_v41  ;;  %v4132_v13 = vpop.f32.mrf.mxu0  ;;  %v7491_v41 = vld [vmem:[%s11695_s2 + $0xbd4] ss:$24 sps:$4 sm:$0xff]  }
 0x60e   :  { %11996 = vst [vmem:[#allocation110_spill] sm:$0xff] %v9439_v32  ;;  %v9442_v6 = vadd.f32 %v4132_v13, %v9277_v0  ;;  %4323 = vmatmul.mubr.bf16.gmra.mxu0 %v7480_v62  ;;  %4073 = vmatprep.mubr.bf16.mxu1 %v7485_v19  ;;  %v7486_v0 = vld [vmem:[%s11695_s2 + $0x4e8] ss:$24 sps:$4 sm:$0xff]  }
 0x60f   :  { %v3877_v63 = vpop.f32.mrf.mxu1  ;;  %v4134_v1 = vpop.f32.mrf.mxu0  ;;  %4330 = vmatprep.mubr.bf16.mxu0 %v7488_v61  ;;  %v7494_v61 = vld [vmem:[%s11695_s2 + $0x51c] ss:$24 sps:$4 sm:$0xff]  }
 0x611   :  { %v9444_v18 = vpop.f32.mrf.mxu1  ;;  %v4135_v53 = vpop.f32.mrf.mxu0 }
 0x612   :  { %11997 = vst [vmem:[#allocation111_spill] sm:$0xff] %v9444_v18  ;;  %v9450_v49 = vadd.f32 %v4135_v53, %v9281_v4 }
 0x613   :  { %v3880_v62 = vpop.f32.mrf.mxu1  ;;  %v4137_v19 = vpop.f32.mrf.mxu0 }
 0x614   :  { %v7489_v62 = vld [vmem:[%s11695_s2 + $0xbd0] ss:$24 sps:$4 sm:$0xff]  }
 0x615   :  { %v9461_v13 = vpop.f32.mrf.mxu1  ;;  %4074 = vmatmul.mubr.bf16.gmra.mxu1 %v7483_v8  ;;  %v7492_v8 = vld [vmem:[%s11695_s2 + $0x518] ss:$24 sps:$4 sm:$0xff]  }
 0x616   :  { %11998 = vst [vmem:[#allocation112_spill] sm:$0xff] %v9461_v13  ;;  %v4140_v63 = vpop.f32.mrf.mxu0  ;;  %4331 = vmatmul.mubr.bf16.gmra.mxu0 %v7486_v0  ;;  %4081 = vmatprep.mubr.bf16.mxu1 %v7491_v41  ;;  %v7500_v0 = vld [vmem:[%s11695_s2 + $0x14] ss:$24 sps:$4 sm:$0xff]  }
 0x617   :  { %v9464_v4 = vadd.f32 %v4140_v63, %v9297_v60  ;;  %v3885_v1 = vpop.f32.mrf.mxu1  ;;  %4338 = vmatprep.mubr.bf16.mxu0 %v7494_v61  ;;  %v7497_v61 = vld [vmem:[%s11695_s2 + $0x54c] ss:$24 sps:$4 sm:$0xff]  }
 0x618   :  { %v4142_v53 = vpop.f32.mrf.mxu0 }
 0x619   :  { %v9466_v18 = vpop.f32.mrf.mxu1 }
 0x61a   :  { %11999 = vst [vmem:[#allocation113_spill] sm:$0xff] %v9466_v18  ;;  %v4143_v19 = vpop.f32.mrf.mxu0 }
 0x61b   :  { %v9478_v60 = vadd.f32 %v4143_v19, %v9301_v10  ;;  %v3888_v41 = vpop.f32.mrf.mxu1  ;;  %v7498_v19 = vld [vmem:[%s11695_s2 + $0x10] ss:$24 sps:$4 sm:$0xff]  }
 0x61c   :  { %v4145_v63 = vpop.f32.mrf.mxu0 }
 0x61d   :  { %v9483_v1 = vpop.f32.mrf.mxu1  ;;  %4082 = vmatmul.mubr.bf16.gmra.mxu1 %v7489_v62  ;;  %v7495_v62 = vld [vmem:[%s11695_s2 + $0x548] ss:$24 sps:$4 sm:$0xff]  }
 0x61e   :  { %12000 = vst [vmem:[#allocation114_spill] sm:$0xff] %v9483_v1  ;;  %v4148_v53 = vpop.f32.mrf.mxu0  ;;  %4339 = vmatmul.mubr.bf16.gmra.mxu0 %v7492_v8  ;;  %4667 = vmatprep.mubr.bf16.mxu1 %v7500_v0  ;;  %v7506_v8 = vld [vmem:[%s11695_s2 + $0x44] ss:$24 sps:$4 sm:$0xff]  }
 0x61f   :  { %v9486_v18 = vadd.f32 %v4148_v53, %v9317_v11  ;;  %v3893_v13 = vpop.f32.mrf.mxu1  ;;  %4346 = vmatprep.mubr.bf16.mxu0 %v7497_v61 }
 0x620   :  { %v4150_v32 = vpop.f32.mrf.mxu0 }
 0x621   :  { %v9488_v10 = vpop.f32.mrf.mxu1  ;;  %v7503_v32 = vld [vmem:[%s11695_s2 + $0x57c] ss:$24 sps:$4 sm:$0xff]  }
 0x622   :  { %12001 = vst [vmem:[#allocation115_spill] sm:$0xff] %v9488_v10  ;;  %v4151_v41 = vpop.f32.mrf.mxu0 }
 0x623   :  { %v9500_v11 = vadd.f32 %v4151_v41, %v9321_v37  ;;  %v3896_v13 = vpop.f32.mrf.mxu1  ;;  %v7504_v41 = vld [vmem:[%s11695_s2 + $0x40] ss:$24 sps:$4 sm:$0xff]  }
 0x624   :  { %v4153_v0 = vpop.f32.mrf.mxu0 }
 0x625   :  { %v9505_v61 = vpop.f32.mrf.mxu1  ;;  %4668 = vmatmul.mubr.bf16.vlgmr.msra.gmra.mxu1 %v7498_v19  ;;  %v7501_v19 = vld [vmem:[%s11695_s2 + $0x578] ss:$24 sps:$4 sm:$0xff]  }
 0x626   :  { %12002 = vst [vmem:[#allocation116_spill] sm:$0xff] %v9505_v61  ;;  %v4156_v63 = vpop.f32.mrf.mxu0  ;;  %4347 = vmatmul.mubr.bf16.gmra.mxu0 %v7495_v62  ;;  %4675 = vmatprep.mubr.bf16.mxu1 %v7506_v8  ;;  %v7512_v62 = vld [vmem:[%s11695_s2 + $0x74] ss:$24 sps:$4 sm:$0xff]  }
 0x627   :  { %v9508_v53 = vadd.f32 %v4156_v63, %v9337_v43  ;;  %v3901_v10 = vpop.f32.mrf.mxu1  ;;  %4354 = vmatprep.mubr.bf16.mxu0 %v7503_v32 }
 0x628   :  { %v4158_v1 = vpop.f32.mrf.mxu0 }
 0x629   :  { %v9510_v37 = vpop.f32.mrf.mxu1  ;;  %v7509_v1 = vld [vmem:[%s11695_s2 + $0x5ac] ss:$24 sps:$4 sm:$0xff]  }
 0x62a   :  { %12003 = vst [vmem:[#allocation117_spill] sm:$0xff] %v9510_v37  ;;  %v4159_v13 = vpop.f32.mrf.mxu0 }
 0x62b   :  { %v9522_v43 = vadd.f32 %v4159_v13, %v9341_v40  ;;  %v3904_v10 = vpop.f32.mrf.mxu1  ;;  %v7510_v13 = vld [vmem:[%s11695_s2 + $0x70] ss:$24 sps:$4 sm:$0xff]  }
 0x62c   :  { %v4161_v8 = vpop.f32.mrf.mxu0 }
 0x62d   :  { %v9527_v32 = vpop.f32.mrf.mxu1  ;;  %4676 = vmatmul.mubr.bf16.gmra.mxu1 %v7504_v41  ;;  %v7507_v41 = vld [vmem:[%s11695_s2 + $0x5a8] ss:$24 sps:$4 sm:$0xff]  }
 0x62e   :  { %12004 = vst [vmem:[#allocation118_spill] sm:$0xff] %v9527_v32  ;;  %v4164_v0 = vpop.f32.mrf.mxu0  ;;  %4355 = vmatmul.mubr.bf16.gmra.mxu0 %v7501_v19  ;;  %4683 = vmatprep.mubr.bf16.mxu1 %v7512_v62  ;;  %v7518_v19 = vld [vmem:[%s11695_s2 + $0xa4] ss:$24 sps:$4 sm:$0xff]  }
 0x62f   :  { %v9530_v63 = vadd.f32 %v4164_v0, %v9357_v12  ;;  %v3909_v37 = vpop.f32.mrf.mxu1  ;;  %4362 = vmatprep.mubr.bf16.mxu0 %v7509_v1 }
 0x630   :  { %v4166_v61 = vpop.f32.mrf.mxu0 }
 0x631   :  { %v9532_v40 = vpop.f32.mrf.mxu1  ;;  %v7515_v61 = vld [vmem:[%s11695_s2 + $0x5dc] ss:$24 sps:$4 sm:$0xff]  }
 0x632   :  { %12005 = vst [vmem:[#allocation119_spill] sm:$0xff] %v9532_v40  ;;  %v4167_v10 = vpop.f32.mrf.mxu0 }
 0x633   :  { %v9544_v12 = vadd.f32 %v4167_v10, %v9361_v46  ;;  %v3912_v37 = vpop.f32.mrf.mxu1  ;;  %v7516_v10 = vld [vmem:[%s11695_s2 + $0xa0] ss:$24 sps:$4 sm:$0xff]  }
 0x634   :  { %v4169_v62 = vpop.f32.mrf.mxu0 }
 0x635   :  { %v9549_v1 = vpop.f32.mrf.mxu1  ;;  %4684 = vmatmul.mubr.bf16.gmra.mxu1 %v7510_v13  ;;  %v7513_v13 = vld [vmem:[%s11695_s2 + $0x5d8] ss:$24 sps:$4 sm:$0xff]  }
 0x636   :  { %12006 = vst [vmem:[#allocation120_spill] sm:$0xff] %v9549_v1  ;;  %v4172_v8 = vpop.f32.mrf.mxu0  ;;  %4363 = vmatmul.mubr.bf16.gmra.mxu0 %v7507_v41  ;;  %4691 = vmatprep.mubr.bf16.mxu1 %v7518_v19  ;;  %v7524_v41 = vld [vmem:[%s11695_s2 + $0xd4] ss:$24 sps:$4 sm:$0xff]  }
 0x637   :  { %v9552_v0 = vadd.f32 %v4172_v8, %v9377_v17  ;;  %v3917_v40 = vpop.f32.mrf.mxu1  ;;  %4370 = vmatprep.mubr.bf16.mxu0 %v7515_v61 }
 0x638   :  { %v4174_v32 = vpop.f32.mrf.mxu0 }
 0x639   :  { %v9554_v46 = vpop.f32.mrf.mxu1  ;;  %v7521_v32 = vld [vmem:[%s11695_s2 + $0x60c] ss:$24 sps:$4 sm:$0xff]  }
 0x63a   :  { %12007 = vst [vmem:[#allocation121_spill] sm:$0xff] %v9554_v46  ;;  %v4175_v37 = vpop.f32.mrf.mxu0 }
 0x63b   :  { %v9566_v17 = vadd.f32 %v4175_v37, %v9381_v42  ;;  %v3920_v40 = vpop.f32.mrf.mxu1  ;;  %v7522_v37 = vld [vmem:[%s11695_s2 + $0xd0] ss:$24 sps:$4 sm:$0xff]  }
 0x63c   :  { %v4177_v19 = vpop.f32.mrf.mxu0 }
 0x63d   :  { %v9571_v61 = vpop.f32.mrf.mxu1  ;;  %4692 = vmatmul.mubr.bf16.gmra.mxu1 %v7516_v10  ;;  %v7519_v10 = vld [vmem:[%s11695_s2 + $0x608] ss:$24 sps:$4 sm:$0xff]  }
 0x63e   :  { %12008 = vst [vmem:[#allocation122_spill] sm:$0xff] %v9571_v61  ;;  %v4180_v62 = vpop.f32.mrf.mxu0  ;;  %4371 = vmatmul.mubr.bf16.gmra.mxu0 %v7513_v13  ;;  %4699 = vmatprep.mubr.bf16.mxu1 %v7524_v41  ;;  %v7530_v13 = vld [vmem:[%s11695_s2 + $0x104] ss:$24 sps:$4 sm:$0xff]  }
 0x63f   :  { %v9574_v8 = vadd.f32 %v4180_v62, %v9397_v25  ;;  %v3925_v46 = vpop.f32.mrf.mxu1  ;;  %4378 = vmatprep.mubr.bf16.mxu0 %v7521_v32 }
 0x640   :  { %v4182_v1 = vpop.f32.mrf.mxu0 }
 0x641   :  { %v9576_v42 = vpop.f32.mrf.mxu1  ;;  %v7527_v1 = vld [vmem:[%s11695_s2 + $0x63c] ss:$24 sps:$4 sm:$0xff]  }
 0x642   :  { %12009 = vst [vmem:[#allocation123_spill] sm:$0xff] %v9576_v42  ;;  %v4183_v40 = vpop.f32.mrf.mxu0 }
 0x643   :  { %v9588_v25 = vadd.f32 %v4183_v40, %v9401_v51  ;;  %v3928_v46 = vpop.f32.mrf.mxu1  ;;  %v7528_v51 = vld [vmem:[%s11695_s2 + $0x100] ss:$24 sps:$4 sm:$0xff]  }
 0x644   :  { %v4185_v41 = vpop.f32.mrf.mxu0  ;;  %v7525_v46 = vld [vmem:[%s11695_s2 + $0x638] ss:$24 sps:$4 sm:$0xff]  }
 0x645   :  { %v9593_v32 = vpop.f32.mrf.mxu1  ;;  %4700 = vmatmul.mubr.bf16.gmra.mxu1 %v7522_v37  ;;  %v7536_v37 = vld [vmem:[%s11695_s2 + $0x134] ss:$24 sps:$4 sm:$0xff]  }
 0x646   :  { %12010 = vst [vmem:[#allocation124_spill] sm:$0xff] %v9593_v32  ;;  %v9595_v19 = vpop.f32.mrf.mxu0  ;;  %4379 = vmatmul.mubr.bf16.gmra.mxu0 %v7519_v10  ;;  %4707 = vmatprep.mubr.bf16.mxu1 %v7530_v13 }
 0x647   :  { %v3933_v62 = vpop.f32.mrf.mxu1  ;;  %4386 = vmatprep.mubr.bf16.mxu0 %v7527_v1 }
 0x648   :  { %v4190_v42 = vpop.f32.mrf.mxu0 }
 0x649   :  { %v9597_v61 = vpop.f32.mrf.mxu1  ;;  %v7533_v42 = vld [vmem:[%s11695_s2 + $0x66c] ss:$24 sps:$4 sm:$0xff]  }
 0x64a   :  { %12011 = vst [vmem:[#allocation125_spill] sm:$0xff] %v9597_v61  ;;  %v9602_v40 = vpop.f32.mrf.mxu0 }
 0x64b   :  { %v3936_v10 = vpop.f32.mrf.mxu1 }
 0x64c   :  { %v4193_v13 = vpop.f32.mrf.mxu0  ;;  %v7534_v10 = vld [vmem:[%s11695_s2 + $0x130] ss:$24 sps:$4 sm:$0xff]  }
 0x64d   :  { %v9613_v1 = vpop.f32.mrf.mxu1  ;;  %4708 = vmatmul.mubr.bf16.gmra.mxu1 %v7528_v51  ;;  %v7531_v13 = vld [vmem:[%s11695_s2 + $0x668] ss:$24 sps:$4 sm:$0xff]   ;;  %v7542_v51 = vld [vmem:[%s11695_s2 + $0x164] ss:$24 sps:$4 sm:$0xff]  }
 0x64e   :  { %12012 = vst [vmem:[#allocation126_spill] sm:$0xff] %v9613_v1  ;;  %v9615_v41 = vpop.f32.mrf.mxu0  ;;  %4387 = vmatmul.mubr.bf16.gmra.mxu0 %v7525_v46  ;;  %4715 = vmatprep.mubr.bf16.mxu1 %v7536_v37 }
 0x64f   :  { %v3941_v62 = vpop.f32.mrf.mxu1  ;;  %4394 = vmatprep.mubr.bf16.mxu0 %v7533_v42 }
 0x650   :  { %v4198_v61 = vpop.f32.mrf.mxu0 }
 0x651   :  { %v9617_v32 = vpop.f32.mrf.mxu1  ;;  %v7539_v61 = vld [vmem:[%s11695_s2 + $0x69c] ss:$24 sps:$4 sm:$0xff]  }
 0x652   :  { %12013 = vst [vmem:[#allocation127_spill] sm:$0xff] %v9617_v32  ;;  %v9622_v27 = vpop.f32.mrf.mxu0 }
 0x653   :  { %v3944_v46 = vpop.f32.mrf.mxu1 }
 0x654   :  { %v4201_v37 = vpop.f32.mrf.mxu0  ;;  %v7540_v46 = vld [vmem:[%s11695_s2 + $0x160] ss:$24 sps:$4 sm:$0xff]  }
 0x655   :  { %v9633_v42 = vpop.f32.mrf.mxu1  ;;  %4716 = vmatmul.mubr.bf16.gmra.mxu1 %v7534_v10  ;;  %v7537_v37 = vld [vmem:[%s11695_s2 + $0x698] ss:$24 sps:$4 sm:$0xff]   ;;  %v7548_v10 = vld [vmem:[%s11695_s2 + $0x194] ss:$24 sps:$4 sm:$0xff]  }
 0x656   :  { %12014 = vst [vmem:[#allocation128_spill] sm:$0xff] %v9633_v42  ;;  %v9635_v62 = vpop.f32.mrf.mxu0  ;;  %4395 = vmatmul.mubr.bf16.gmra.mxu0 %v7531_v13  ;;  %4723 = vmatprep.mubr.bf16.mxu1 %v7542_v51 }
 0x657   :  { %v3949_v32 = vpop.f32.mrf.mxu1  ;;  %4402 = vmatprep.mubr.bf16.mxu0 %v7539_v61 }
 0x658   :  { %v4206_v1 = vpop.f32.mrf.mxu0  ;;  %v7545_v32 = vld [vmem:[%s11695_s2 + $0x6cc] ss:$24 sps:$4 sm:$0xff]  }
 0x659   :  { %v9637_v55 = vpop.f32.mrf.mxu1 }
 0x65a   :  { %12015 = vst [vmem:[#allocation129_spill] sm:$0xff] %v9637_v55  ;;  %v9642_v31 = vpop.f32.mrf.mxu0 }
 0x65b   :  { %v3952_v13 = vpop.f32.mrf.mxu1 }
 0x65c   :  { %v4209_v1 = vpop.f32.mrf.mxu0  ;;  %v7546_v13 = vld [vmem:[%s11695_s2 + $0x190] ss:$24 sps:$4 sm:$0xff]  }
 0x65d   :  { %v9653_v51 = vpop.f32.mrf.mxu1  ;;  %4724 = vmatmul.mubr.bf16.gmra.mxu1 %v7540_v46  ;;  %v7543_v1 = vld [vmem:[%s11695_s2 + $0x6c8] ss:$24 sps:$4 sm:$0xff]   ;;  %v7554_v46 = vld [vmem:[%s11695_s2 + $0x1c4] ss:$24 sps:$4 sm:$0xff]  }
 0x65e   :  { %12016 = vst [vmem:[#allocation130_spill] sm:$0xff] %v9653_v51  ;;  %v9655_v61 = vpop.f32.mrf.mxu0  ;;  %4403 = vmatmul.mubr.bf16.gmra.mxu0 %v7537_v37  ;;  %4731 = vmatprep.mubr.bf16.mxu1 %v7548_v10 }
 0x65f   :  { %v3957_v55 = vpop.f32.mrf.mxu1  ;;  %4410 = vmatprep.mubr.bf16.mxu0 %v7545_v32 }
 0x660   :  { %v4214_v42 = vpop.f32.mrf.mxu0  ;;  %v7551_v55 = vld [vmem:[%s11695_s2 + $0x6fc] ss:$24 sps:$4 sm:$0xff]  }
 0x661   :  { %v9657_v54 = vpop.f32.mrf.mxu1 }
 0x662   :  { %12017 = vst [vmem:[#allocation131_spill] sm:$0xff] %v9657_v54  ;;  %v9662_v3 = vpop.f32.mrf.mxu0 }
 0x663   :  { %v3960_v37 = vpop.f32.mrf.mxu1 }
 0x664   :  { %v4217_v42 = vpop.f32.mrf.mxu0  ;;  %v7552_v37 = vld [vmem:[%s11695_s2 + $0x1c0] ss:$24 sps:$4 sm:$0xff]  }
 0x665   :  { %v9673_v10 = vpop.f32.mrf.mxu1  ;;  %4732 = vmatmul.mubr.bf16.gmra.mxu1 %v7546_v13  ;;  %v7549_v42 = vld [vmem:[%s11695_s2 + $0x6f8] ss:$24 sps:$4 sm:$0xff]   ;;  %v7560_v13 = vld [vmem:[%s11695_s2 + $0x1f4] ss:$24 sps:$4 sm:$0xff]  }
 0x666   :  { %12018 = vst [vmem:[#allocation132_spill] sm:$0xff] %v9673_v10  ;;  %v9675_v32 = vpop.f32.mrf.mxu0  ;;  %4411 = vmatmul.mubr.bf16.gmra.mxu0 %v7543_v1  ;;  %4739 = vmatprep.mubr.bf16.mxu1 %v7554_v46 }
 0x667   :  { %v3965_v54 = vpop.f32.mrf.mxu1  ;;  %4418 = vmatprep.mubr.bf16.mxu0 %v7551_v55 }
 0x668   :  { %v4222_v51 = vpop.f32.mrf.mxu0  ;;  %v7557_v54 = vld [vmem:[%s11695_s2 + $0x72c] ss:$24 sps:$4 sm:$0xff]  }
 0x669   :  { %v9677_v57 = vpop.f32.mrf.mxu1 }
 0x66a   :  { %12019 = vst [vmem:[#allocation133_spill] sm:$0xff] %v9677_v57  ;;  %v9682_v2 = vpop.f32.mrf.mxu0 }
 0x66b   :  { %v3968_v1 = vpop.f32.mrf.mxu1 }
 0x66c   :  { %v4225_v51 = vpop.f32.mrf.mxu0  ;;  %v7558_v1 = vld [vmem:[%s11695_s2 + $0x1f0] ss:$24 sps:$4 sm:$0xff]  }
 0x66d   :  { %v9693_v46 = vpop.f32.mrf.mxu1  ;;  %4740 = vmatmul.mubr.bf16.gmra.mxu1 %v7552_v37  ;;  %v7555_v51 = vld [vmem:[%s11695_s2 + $0x728] ss:$24 sps:$4 sm:$0xff]   ;;  %v7566_v37 = vld [vmem:[%s11695_s2 + $0x224] ss:$24 sps:$4 sm:$0xff]  }
 0x66e   :  { %12020 = vst [vmem:[#allocation134_spill] sm:$0xff] %v9693_v46  ;;  %v9695_v55 = vpop.f32.mrf.mxu0  ;;  %4419 = vmatmul.mubr.bf16.gmra.mxu0 %v7549_v42  ;;  %4747 = vmatprep.mubr.bf16.mxu1 %v7560_v13 }
 0x66f   :  { %v3973_v57 = vpop.f32.mrf.mxu1  ;;  %4426 = vmatprep.mubr.bf16.mxu0 %v7557_v54 }
 0x670   :  { %v4230_v10 = vpop.f32.mrf.mxu0  ;;  %v7563_v57 = vld [vmem:[%s11695_s2 + $0x75c] ss:$24 sps:$4 sm:$0xff]  }
 0x671   :  { %v9697_v56 = vpop.f32.mrf.mxu1 }
 0x672   :  { %12021 = vst [vmem:[#allocation135_spill] sm:$0xff] %v9697_v56  ;;  %v9702_v29 = vpop.f32.mrf.mxu0 }
 0x673   :  { %v3976_v42 = vpop.f32.mrf.mxu1 }
 0x674   :  { %v4233_v10 = vpop.f32.mrf.mxu0  ;;  %v7564_v42 = vld [vmem:[%s11695_s2 + $0x220] ss:$24 sps:$4 sm:$0xff]  }
 0x675   :  { %v9713_v13 = vpop.f32.mrf.mxu1  ;;  %4748 = vmatmul.mubr.bf16.gmra.mxu1 %v7558_v1  ;;  %v7561_v10 = vld [vmem:[%s11695_s2 + $0x758] ss:$24 sps:$4 sm:$0xff]   ;;  %v7572_v1 = vld [vmem:[%s11695_s2 + $0x254] ss:$24 sps:$4 sm:$0xff]  }
 0x676   :  { %12022 = vst [vmem:[#allocation136_spill] sm:$0xff] %v9713_v13  ;;  %v9715_v54 = vpop.f32.mrf.mxu0  ;;  %4427 = vmatmul.mubr.bf16.gmra.mxu0 %v7555_v51  ;;  %4755 = vmatprep.mubr.bf16.mxu1 %v7566_v37 }
 0x677   :  { %v3981_v56 = vpop.f32.mrf.mxu1  ;;  %4434 = vmatprep.mubr.bf16.mxu0 %v7563_v57 }
 0x678   :  { %v4238_v46 = vpop.f32.mrf.mxu0  ;;  %v7569_v56 = vld [vmem:[%s11695_s2 + $0x78c] ss:$24 sps:$4 sm:$0xff]  }
 0x679   :  { %v9717_v30 = vpop.f32.mrf.mxu1 }
 0x67a   :  { %12023 = vst [vmem:[#allocation137_spill] sm:$0xff] %v9717_v30  ;;  %v9722_v26 = vpop.f32.mrf.mxu0 }
 0x67b   :  { %v3984_v51 = vpop.f32.mrf.mxu1 }
 0x67c   :  { %v4241_v46 = vpop.f32.mrf.mxu0  ;;  %v7570_v51 = vld [vmem:[%s11695_s2 + $0x250] ss:$24 sps:$4 sm:$0xff]  }
 0x67d   :  { %v9733_v37 = vpop.f32.mrf.mxu1  ;;  %4756 = vmatmul.mubr.bf16.gmra.mxu1 %v7564_v42  ;;  %v7567_v46 = vld [vmem:[%s11695_s2 + $0x788] ss:$24 sps:$4 sm:$0xff]   ;;  %v7578_v42 = vld [vmem:[%s11695_s2 + $0x284] ss:$24 sps:$4 sm:$0xff]  }
 0x67e   :  { %12024 = vst [vmem:[#allocation138_spill] sm:$0xff] %v9733_v37  ;;  %v9735_v57 = vpop.f32.mrf.mxu0  ;;  %4435 = vmatmul.mubr.bf16.gmra.mxu0 %v7561_v10  ;;  %4763 = vmatprep.mubr.bf16.mxu1 %v7572_v1 }
 0x67f   :  { %v3989_v30 = vpop.f32.mrf.mxu1  ;;  %4442 = vmatprep.mubr.bf16.mxu0 %v7569_v56 }
 0x680   :  { %v4246_v13 = vpop.f32.mrf.mxu0  ;;  %v7575_v30 = vld [vmem:[%s11695_s2 + $0x7bc] ss:$24 sps:$4 sm:$0xff]  }
 0x681   :  { %v9737_v38 = vpop.f32.mrf.mxu1 }
 0x682   :  { %12025 = vst [vmem:[#allocation139_spill] sm:$0xff] %v9737_v38  ;;  %v9742_v9 = vpop.f32.mrf.mxu0 }
 0x683   :  { %v3992_v10 = vpop.f32.mrf.mxu1 }
 0x684   :  { %v4249_v13 = vpop.f32.mrf.mxu0  ;;  %v7576_v10 = vld [vmem:[%s11695_s2 + $0x280] ss:$24 sps:$4 sm:$0xff]  }
 0x685   :  { %v9753_v1 = vpop.f32.mrf.mxu1  ;;  %4764 = vmatmul.mubr.bf16.gmra.mxu1 %v7570_v51  ;;  %v7573_v13 = vld [vmem:[%s11695_s2 + $0x7b8] ss:$24 sps:$4 sm:$0xff]   ;;  %v7584_v51 = vld [vmem:[%s11695_s2 + $0x2b4] ss:$24 sps:$4 sm:$0xff]  }
 0x686   :  { %12026 = vst [vmem:[#allocation140_spill] sm:$0xff] %v9753_v1  ;;  %v9755_v56 = vpop.f32.mrf.mxu0  ;;  %4443 = vmatmul.mubr.bf16.gmra.mxu0 %v7567_v46  ;;  %4771 = vmatprep.mubr.bf16.mxu1 %v7578_v42 }
 0x687   :  { %v3997_v38 = vpop.f32.mrf.mxu1  ;;  %4450 = vmatprep.mubr.bf16.mxu0 %v7575_v30 }
 0x688   :  { %v4254_v37 = vpop.f32.mrf.mxu0  ;;  %v7581_v38 = vld [vmem:[%s11695_s2 + $0x7ec] ss:$24 sps:$4 sm:$0xff]  }
 0x689   :  { %v9757_v33 = vpop.f32.mrf.mxu1 }
 0x68a   :  { %12027 = vst [vmem:[#allocation141_spill] sm:$0xff] %v9757_v33  ;;  %v9762_v14 = vpop.f32.mrf.mxu0 }
 0x68b   :  { %12028 = vst [vmem:[#allocation142_spill] sm:$0xff] %v9762_v14  ;;  %v4000_v46 = vpop.f32.mrf.mxu1 }
 0x68c   :  { %v4257_v37 = vpop.f32.mrf.mxu0  ;;  %v7582_v46 = vld [vmem:[%s11695_s2 + $0x2b0] ss:$24 sps:$4 sm:$0xff]  }
 0x68d   :  { %v9773_v42 = vpop.f32.mrf.mxu1  ;;  %4772 = vmatmul.mubr.bf16.gmra.mxu1 %v7576_v10  ;;  %v7579_v37 = vld [vmem:[%s11695_s2 + $0x7e8] ss:$24 sps:$4 sm:$0xff]   ;;  %v7590_v10 = vld [vmem:[%s11695_s2 + $0x2e4] ss:$24 sps:$4 sm:$0xff]  }
 0x68e   :  { %12029 = vst [vmem:[#allocation143_spill] sm:$0xff] %v9773_v42  ;;  %v9775_v30 = vpop.f32.mrf.mxu0  ;;  %4451 = vmatmul.mubr.bf16.gmra.mxu0 %v7573_v13  ;;  %4779 = vmatprep.mubr.bf16.mxu1 %v7584_v51 }
 0x68f   :  { %12030 = vst [vmem:[#allocation144_spill] sm:$0xff] %v9775_v30  ;;  %v4005_v33 = vpop.f32.mrf.mxu1  ;;  %4458 = vmatprep.mubr.bf16.mxu0 %v7581_v38 }
 0x690   :  { %v4262_v1 = vpop.f32.mrf.mxu0  ;;  %v7587_v33 = vld [vmem:[%s11695_s2 + $0x81c] ss:$24 sps:$4 sm:$0xff]  }
 0x691   :  { %v9777_v24 = vpop.f32.mrf.mxu1 }
 0x692   :  { %12031 = vst [vmem:[#allocation145_spill] sm:$0xff] %v9777_v24  ;;  %v9782_v14 = vpop.f32.mrf.mxu0 }
 0x693   :  { %12032 = vst [vmem:[#allocation146_spill] sm:$0xff] %v9782_v14  ;;  %v4008_v13 = vpop.f32.mrf.mxu1 }
 0x694   :  { %v4265_v1 = vpop.f32.mrf.mxu0  ;;  %v7588_v13 = vld [vmem:[%s11695_s2 + $0x2e0] ss:$24 sps:$4 sm:$0xff]  }
 0x695   :  { %v9793_v51 = vpop.f32.mrf.mxu1  ;;  %4780 = vmatmul.mubr.bf16.gmra.mxu1 %v7582_v46  ;;  %v7585_v1 = vld [vmem:[%s11695_s2 + $0x818] ss:$24 sps:$4 sm:$0xff]   ;;  %v7596_v46 = vld [vmem:[%s11695_s2 + $0x314] ss:$24 sps:$4 sm:$0xff]  }
 0x696   :  { %12033 = vst [vmem:[#allocation147_spill] sm:$0xff] %v9793_v51  ;;  %v9795_v38 = vpop.f32.mrf.mxu0  ;;  %4459 = vmatmul.mubr.bf16.gmra.mxu0 %v7579_v37  ;;  %4787 = vmatprep.mubr.bf16.mxu1 %v7590_v10 }
 0x697   :  { %12034 = vst [vmem:[#allocation148_spill] sm:$0xff] %v9795_v38  ;;  %v4013_v24 = vpop.f32.mrf.mxu1  ;;  %4466 = vmatprep.mubr.bf16.mxu0 %v7587_v33 }
 0x698   :  { %v4270_v42 = vpop.f32.mrf.mxu0  ;;  %v7593_v24 = vld [vmem:[%s11695_s2 + $0x84c] ss:$24 sps:$4 sm:$0xff]  }
 0x699   :  { %v9797_v14 = vpop.f32.mrf.mxu1 }
 0x69a   :  { %12035 = vst [vmem:[#allocation149_spill] sm:$0xff] %v9797_v14  ;;  %v9802_v30 = vpop.f32.mrf.mxu0 }
 0x69b   :  { %12036 = vst [vmem:[#allocation150_spill] sm:$0xff] %v9802_v30  ;;  %v4016_v37 = vpop.f32.mrf.mxu1 }
 0x69c   :  { %v4273_v42 = vpop.f32.mrf.mxu0  ;;  %v7594_v37 = vld [vmem:[%s11695_s2 + $0x310] ss:$24 sps:$4 sm:$0xff]  }
 0x69d   :  { %v9813_v10 = vpop.f32.mrf.mxu1  ;;  %4788 = vmatmul.mubr.bf16.gmra.mxu1 %v7588_v13  ;;  %v7591_v42 = vld [vmem:[%s11695_s2 + $0x848] ss:$24 sps:$4 sm:$0xff]   ;;  %v7602_v13 = vld [vmem:[%s11695_s2 + $0x344] ss:$24 sps:$4 sm:$0xff]  }
 0x69e   :  { %12037 = vst [vmem:[#allocation151_spill] sm:$0xff] %v9813_v10  ;;  %v9815_v33 = vpop.f32.mrf.mxu0  ;;  %4467 = vmatmul.mubr.bf16.gmra.mxu0 %v7585_v1  ;;  %4795 = vmatprep.mubr.bf16.mxu1 %v7596_v46 }
 0x69f   :  { %12038 = vst [vmem:[#allocation152_spill] sm:$0xff] %v9815_v33  ;;  %v4021_v14 = vpop.f32.mrf.mxu1  ;;  %4474 = vmatprep.mubr.bf16.mxu0 %v7593_v24 }
 0x6a0   :  { %v4278_v51 = vpop.f32.mrf.mxu0  ;;  %v7599_v14 = vld [vmem:[%s11695_s2 + $0x87c] ss:$24 sps:$4 sm:$0xff]  }
 0x6a1   :  { %v9817_v30 = vpop.f32.mrf.mxu1 }
 0x6a2   :  { %12039 = vst [vmem:[#allocation153_spill] sm:$0xff] %v9817_v30  ;;  %v9822_v38 = vpop.f32.mrf.mxu0 }
 0x6a3   :  { %12040 = vst [vmem:[#allocation154_spill] sm:$0xff] %v9822_v38  ;;  %v4024_v1 = vpop.f32.mrf.mxu1 }
 0x6a4   :  { %v4281_v51 = vpop.f32.mrf.mxu0  ;;  %v7600_v1 = vld [vmem:[%s11695_s2 + $0x340] ss:$24 sps:$4 sm:$0xff]  }
 0x6a5   :  { %v9833_v46 = vpop.f32.mrf.mxu1  ;;  %4796 = vmatmul.mubr.bf16.gmra.mxu1 %v7594_v37  ;;  %v7597_v51 = vld [vmem:[%s11695_s2 + $0x878] ss:$24 sps:$4 sm:$0xff]   ;;  %v7608_v37 = vld [vmem:[%s11695_s2 + $0x374] ss:$24 sps:$4 sm:$0xff]  }
 0x6a6   :  { %12041 = vst [vmem:[#allocation155_spill] sm:$0xff] %v9833_v46  ;;  %v9835_v24 = vpop.f32.mrf.mxu0  ;;  %4475 = vmatmul.mubr.bf16.gmra.mxu0 %v7591_v42  ;;  %4803 = vmatprep.mubr.bf16.mxu1 %v7602_v13 }
 0x6a7   :  { %12042 = vst [vmem:[#allocation156_spill] sm:$0xff] %v9835_v24  ;;  %v4029_v30 = vpop.f32.mrf.mxu1  ;;  %4482 = vmatprep.mubr.bf16.mxu0 %v7599_v14 }
 0x6a8   :  { %v4286_v10 = vpop.f32.mrf.mxu0  ;;  %v7605_v30 = vld [vmem:[%s11695_s2 + $0x8ac] ss:$24 sps:$4 sm:$0xff]  }
 0x6a9   :  { %v9837_v38 = vpop.f32.mrf.mxu1 }
 0x6aa   :  { %12043 = vst [vmem:[#allocation157_spill] sm:$0xff] %v9837_v38  ;;  %v9842_v33 = vpop.f32.mrf.mxu0 }
 0x6ab   :  { %12044 = vst [vmem:[#allocation158_spill] sm:$0xff] %v9842_v33  ;;  %v4032_v42 = vpop.f32.mrf.mxu1 }
 0x6ac   :  { %v4289_v10 = vpop.f32.mrf.mxu0  ;;  %v7606_v42 = vld [vmem:[%s11695_s2 + $0x370] ss:$24 sps:$4 sm:$0xff]  }
 0x6ad   :  { %v9853_v13 = vpop.f32.mrf.mxu1  ;;  %4804 = vmatmul.mubr.bf16.gmra.mxu1 %v7600_v1  ;;  %v7603_v10 = vld [vmem:[%s11695_s2 + $0x8a8] ss:$24 sps:$4 sm:$0xff]   ;;  %v7614_v1 = vld [vmem:[%s11695_s2 + $0x3a4] ss:$24 sps:$4 sm:$0xff]  }
 0x6ae   :  { %12045 = vst [vmem:[#allocation159_spill] sm:$0xff] %v9853_v13  ;;  %v9855_v14 = vpop.f32.mrf.mxu0  ;;  %4483 = vmatmul.mubr.bf16.gmra.mxu0 %v7597_v51  ;;  %4811 = vmatprep.mubr.bf16.mxu1 %v7608_v37 }
 0x6af   :  { %12046 = vst [vmem:[#allocation160_spill] sm:$0xff] %v9855_v14  ;;  %v4037_v38 = vpop.f32.mrf.mxu1  ;;  %4490 = vmatprep.mubr.bf16.mxu0 %v7605_v30 }
 0x6b0   :  { %v4294_v46 = vpop.f32.mrf.mxu0  ;;  %v7611_v38 = vld [vmem:[%s11695_s2 + $0x8dc] ss:$24 sps:$4 sm:$0xff]  }
 0x6b1   :  { %v9857_v33 = vpop.f32.mrf.mxu1 }
 0x6b2   :  { %12047 = vst [vmem:[#allocation161_spill] sm:$0xff] %v9857_v33  ;;  %v9862_v24 = vpop.f32.mrf.mxu0 }
 0x6b3   :  { %12048 = vst [vmem:[#allocation162_spill] sm:$0xff] %v9862_v24  ;;  %v4040_v51 = vpop.f32.mrf.mxu1 }
 0x6b4   :  { %v4297_v46 = vpop.f32.mrf.mxu0  ;;  %v7612_v51 = vld [vmem:[%s11695_s2 + $0x3a0] ss:$24 sps:$4 sm:$0xff]  }
 0x6b5   :  { %v9873_v37 = vpop.f32.mrf.mxu1  ;;  %4812 = vmatmul.mubr.bf16.gmra.mxu1 %v7606_v42  ;;  %v7609_v46 = vld [vmem:[%s11695_s2 + $0x8d8] ss:$24 sps:$4 sm:$0xff]   ;;  %v7620_v42 = vld [vmem:[%s11695_s2 + $0x3d4] ss:$24 sps:$4 sm:$0xff]  }
 0x6b6   :  { %12049 = vst [vmem:[#allocation163_spill] sm:$0xff] %v9873_v37  ;;  %v9875_v30 = vpop.f32.mrf.mxu0  ;;  %4491 = vmatmul.mubr.bf16.gmra.mxu0 %v7603_v10  ;;  %4819 = vmatprep.mubr.bf16.mxu1 %v7614_v1 }
 0x6b7   :  { %12050 = vst [vmem:[#allocation164_spill] sm:$0xff] %v9875_v30  ;;  %v4045_v33 = vpop.f32.mrf.mxu1  ;;  %4498 = vmatprep.mubr.bf16.mxu0 %v7611_v38 }
 0x6b8   :  { %v4302_v13 = vpop.f32.mrf.mxu0  ;;  %v7617_v33 = vld [vmem:[%s11695_s2 + $0x90c] ss:$24 sps:$4 sm:$0xff]  }
 0x6b9   :  { %v9877_v24 = vpop.f32.mrf.mxu1 }
 0x6ba   :  { %12051 = vst [vmem:[#allocation165_spill] sm:$0xff] %v9877_v24  ;;  %v9882_v14 = vpop.f32.mrf.mxu0 }
 0x6bb   :  { %12052 = vst [vmem:[#allocation166_spill] sm:$0xff] %v9882_v14  ;;  %v4048_v10 = vpop.f32.mrf.mxu1 }
 0x6bc   :  { %v4305_v13 = vpop.f32.mrf.mxu0  ;;  %v7618_v10 = vld [vmem:[%s11695_s2 + $0x3d0] ss:$24 sps:$4 sm:$0xff]  }
 0x6bd   :  { %v9893_v1 = vpop.f32.mrf.mxu1  ;;  %4820 = vmatmul.mubr.bf16.gmra.mxu1 %v7612_v51  ;;  %v7615_v13 = vld [vmem:[%s11695_s2 + $0x908] ss:$24 sps:$4 sm:$0xff]   ;;  %v7626_v51 = vld [vmem:[%s11695_s2 + $0x404] ss:$24 sps:$4 sm:$0xff]  }
 0x6be   :  { %12053 = vst [vmem:[#allocation167_spill] sm:$0xff] %v9893_v1  ;;  %v9895_v38 = vpop.f32.mrf.mxu0  ;;  %4499 = vmatmul.mubr.bf16.gmra.mxu0 %v7609_v46  ;;  %4827 = vmatprep.mubr.bf16.mxu1 %v7620_v42 }
 0x6bf   :  { %12054 = vst [vmem:[#allocation168_spill] sm:$0xff] %v9895_v38  ;;  %v4053_v24 = vpop.f32.mrf.mxu1  ;;  %4506 = vmatprep.mubr.bf16.mxu0 %v7617_v33 }
 0x6c0   :  { %v4310_v37 = vpop.f32.mrf.mxu0  ;;  %v7623_v24 = vld [vmem:[%s11695_s2 + $0x93c] ss:$24 sps:$4 sm:$0xff]  }
 0x6c1   :  { %v9897_v14 = vpop.f32.mrf.mxu1 }
 0x6c2   :  { %12055 = vst [vmem:[#allocation169_spill] sm:$0xff] %v9897_v14  ;;  %v9902_v30 = vpop.f32.mrf.mxu0 }
 0x6c3   :  { %12056 = vst [vmem:[#allocation170_spill] sm:$0xff] %v9902_v30  ;;  %v4056_v46 = vpop.f32.mrf.mxu1 }
 0x6c4   :  { %v4313_v37 = vpop.f32.mrf.mxu0  ;;  %v7624_v46 = vld [vmem:[%s11695_s2 + $0x400] ss:$24 sps:$4 sm:$0xff]  }
 0x6c5   :  { %v9913_v42 = vpop.f32.mrf.mxu1  ;;  %4828 = vmatmul.mubr.bf16.gmra.mxu1 %v7618_v10  ;;  %v7621_v37 = vld [vmem:[%s11695_s2 + $0x938] ss:$24 sps:$4 sm:$0xff]   ;;  %v7632_v10 = vld [vmem:[%s11695_s2 + $0x434] ss:$24 sps:$4 sm:$0xff]  }
 0x6c6   :  { %12057 = vst [vmem:[#allocation171_spill] sm:$0xff] %v9913_v42  ;;  %v9915_v33 = vpop.f32.mrf.mxu0  ;;  %4507 = vmatmul.mubr.bf16.gmra.mxu0 %v7615_v13  ;;  %4835 = vmatprep.mubr.bf16.mxu1 %v7626_v51 }
 0x6c7   :  { %12058 = vst [vmem:[#allocation172_spill] sm:$0xff] %v9915_v33  ;;  %v4061_v14 = vpop.f32.mrf.mxu1  ;;  %4514 = vmatprep.mubr.bf16.mxu0 %v7623_v24 }
 0x6c8   :  { %v4318_v1 = vpop.f32.mrf.mxu0  ;;  %v7629_v14 = vld [vmem:[%s11695_s2 + $0x96c] ss:$24 sps:$4 sm:$0xff]  }
 0x6c9   :  { %v9917_v30 = vpop.f32.mrf.mxu1 }
 0x6ca   :  { %12059 = vst [vmem:[#allocation173_spill] sm:$0xff] %v9917_v30  ;;  %v9922_v38 = vpop.f32.mrf.mxu0 }
 0x6cb   :  { %12060 = vst [vmem:[#allocation174_spill] sm:$0xff] %v9922_v38  ;;  %v4064_v13 = vpop.f32.mrf.mxu1 }
 0x6cc   :  { %v4321_v1 = vpop.f32.mrf.mxu0  ;;  %v7630_v13 = vld [vmem:[%s11695_s2 + $0x430] ss:$24 sps:$4 sm:$0xff]  }
 0x6cd   :  { %v9933_v51 = vpop.f32.mrf.mxu1  ;;  %4836 = vmatmul.mubr.bf16.gmra.mxu1 %v7624_v46  ;;  %v7627_v1 = vld [vmem:[%s11695_s2 + $0x968] ss:$24 sps:$4 sm:$0xff]   ;;  %v7638_v46 = vld [vmem:[%s11695_s2 + $0x464] ss:$24 sps:$4 sm:$0xff]  }
 0x6ce   :  { %12061 = vst [vmem:[#allocation175_spill] sm:$0xff] %v9933_v51  ;;  %v9935_v24 = vpop.f32.mrf.mxu0  ;;  %4515 = vmatmul.mubr.bf16.gmra.mxu0 %v7621_v37  ;;  %4843 = vmatprep.mubr.bf16.mxu1 %v7632_v10 }
 0x6cf   :  { %12062 = vst [vmem:[#allocation176_spill] sm:$0xff] %v9935_v24  ;;  %v4069_v30 = vpop.f32.mrf.mxu1  ;;  %4522 = vmatprep.mubr.bf16.mxu0 %v7629_v14 }
 0x6d0   :  { %v4326_v42 = vpop.f32.mrf.mxu0  ;;  %v7635_v30 = vld [vmem:[%s11695_s2 + $0x99c] ss:$24 sps:$4 sm:$0xff]  }
 0x6d1   :  { %v9937_v38 = vpop.f32.mrf.mxu1 }
 0x6d2   :  { %12063 = vst [vmem:[#allocation177_spill] sm:$0xff] %v9937_v38  ;;  %v9942_v33 = vpop.f32.mrf.mxu0 }
 0x6d3   :  { %12064 = vst [vmem:[#allocation178_spill] sm:$0xff] %v9942_v33  ;;  %v4072_v37 = vpop.f32.mrf.mxu1 }
 0x6d4   :  { %v4329_v42 = vpop.f32.mrf.mxu0  ;;  %v7636_v37 = vld [vmem:[%s11695_s2 + $0x460] ss:$24 sps:$4 sm:$0xff]  }
 0x6d5   :  { %v9953_v10 = vpop.f32.mrf.mxu1  ;;  %4844 = vmatmul.mubr.bf16.gmra.mxu1 %v7630_v13  ;;  %v7633_v42 = vld [vmem:[%s11695_s2 + $0x998] ss:$24 sps:$4 sm:$0xff]   ;;  %v7644_v13 = vld [vmem:[%s11695_s2 + $0x494] ss:$24 sps:$4 sm:$0xff]  }
 0x6d6   :  { %12065 = vst [vmem:[#allocation179_spill] sm:$0xff] %v9953_v10  ;;  %v9955_v14 = vpop.f32.mrf.mxu0  ;;  %4523 = vmatmul.mubr.bf16.gmra.mxu0 %v7627_v1  ;;  %4851 = vmatprep.mubr.bf16.mxu1 %v7638_v46 }
 0x6d7   :  { %12066 = vst [vmem:[#allocation180_spill] sm:$0xff] %v9955_v14  ;;  %v4077_v38 = vpop.f32.mrf.mxu1  ;;  %4530 = vmatprep.mubr.bf16.mxu0 %v7635_v30 }
 0x6d8   :  { %v4334_v51 = vpop.f32.mrf.mxu0  ;;  %v7641_v38 = vld [vmem:[%s11695_s2 + $0x9cc] ss:$24 sps:$4 sm:$0xff]  }
 0x6d9   :  { %v9957_v33 = vpop.f32.mrf.mxu1 }
 0x6da   :  { %12067 = vst [vmem:[#allocation181_spill] sm:$0xff] %v9957_v33  ;;  %v9962_v24 = vpop.f32.mrf.mxu0 }
 0x6db   :  { %12068 = vst [vmem:[#allocation182_spill] sm:$0xff] %v9962_v24  ;;  %v4080_v1 = vpop.f32.mrf.mxu1 }
 0x6dc   :  { %v4337_v51 = vpop.f32.mrf.mxu0  ;;  %v7642_v1 = vld [vmem:[%s11695_s2 + $0x490] ss:$24 sps:$4 sm:$0xff]  }
 0x6dd   :  { %v9973_v46 = vpop.f32.mrf.mxu1  ;;  %4852 = vmatmul.mubr.bf16.gmra.mxu1 %v7636_v37  ;;  %v7639_v51 = vld [vmem:[%s11695_s2 + $0x9c8] ss:$24 sps:$4 sm:$0xff]   ;;  %v7650_v37 = vld [vmem:[%s11695_s2 + $0x4c4] ss:$24 sps:$4 sm:$0xff]  }
 0x6de   :  { %12069 = vst [vmem:[#allocation183_spill] sm:$0xff] %v9973_v46  ;;  %v9975_v30 = vpop.f32.mrf.mxu0  ;;  %4531 = vmatmul.mubr.bf16.gmra.mxu0 %v7633_v42  ;;  %4859 = vmatprep.mubr.bf16.mxu1 %v7644_v13 }
 0x6df   :  { %12070 = vst [vmem:[#allocation184_spill] sm:$0xff] %v9975_v30  ;;  %v4085_v33 = vpop.f32.mrf.mxu1  ;;  %4538 = vmatprep.mubr.bf16.mxu0 %v7641_v38 }
 0x6e0   :  { %v4342_v10 = vpop.f32.mrf.mxu0  ;;  %v7647_v33 = vld [vmem:[%s11695_s2 + $0x9fc] ss:$24 sps:$4 sm:$0xff]  }
 0x6e1   :  { %v9977_v24 = vpop.f32.mrf.mxu1 }
 0x6e2   :  { %12071 = vst [vmem:[#allocation185_spill] sm:$0xff] %v9977_v24  ;;  %v9982_v14 = vpop.f32.mrf.mxu0 }
 0x6e3   :  { %12072 = vst [vmem:[#allocation186_spill] sm:$0xff] %v9982_v14  ;;  %v4088_v42 = vpop.f32.mrf.mxu1 }
 0x6e4   :  { %v4345_v10 = vpop.f32.mrf.mxu0  ;;  %v7648_v42 = vld [vmem:[%s11695_s2 + $0x4c0] ss:$24 sps:$4 sm:$0xff]  }
 0x6e5   :  { %v4669_v13 = vpop.f32.mrf.mxu1  ;;  %4860 = vmatmul.mubr.bf16.gmra.mxu1 %v7642_v1  ;;  %v7645_v1 = vld [vmem:[%s11695_s2 + $0x9f8] ss:$24 sps:$4 sm:$0xff]  }
 0x6e6   :  { %v9993_v38 = vpop.f32.mrf.mxu0  ;;  %4539 = vmatmul.mubr.bf16.gmra.mxu0 %v7639_v51  ;;  %v9996_v24 = vadd.f32 %v4669_v13, %v9420_v48  ;;  %4867 = vmatprep.mubr.bf16.mxu1 %v7650_v37  ;;  %v7656_v48 = vld [vmem:[%s11695_s2 + $0x4f4] ss:$24 sps:$4 sm:$0xff]  }
 0x6e7   :  { %12073 = vst [vmem:[#allocation187_spill] sm:$0xff] %v9993_v38  ;;  %v4671_v46 = vpop.f32.mrf.mxu1  ;;  %4546 = vmatprep.mubr.bf16.mxu0 %v7647_v33  ;;  %v7654_v38 = vld [vmem:[%s11695_s2 + $0x4f0] ss:$24 sps:$4 sm:$0xff]  }
 0x6e8   :  { %v4350_v14 = vpop.f32.mrf.mxu0 }
 0x6e9   :  { %v4672_v30 = vpop.f32.mrf.mxu1  ;;  %v7653_v14 = vld [vmem:[%s11695_s2 + $0xa2c] ss:$24 sps:$4 sm:$0xff]  }
 0x6ea   :  { %v10001_v20 = vpop.f32.mrf.mxu0  ;;  %v10004_v10 = vadd.f32 %v4672_v30, %v9428_v52 }
 0x6eb   :  { %12074 = vst [vmem:[#allocation188_spill] sm:$0xff] %v10001_v20  ;;  %v4674_v46 = vpop.f32.mrf.mxu1 }
 0x6ec   :  { %v4353_v37 = vpop.f32.mrf.mxu0 }
 0x6ed   :  { %v4677_v33 = vpop.f32.mrf.mxu1  ;;  %4868 = vmatmul.mubr.bf16.gmra.mxu1 %v7648_v42  ;;  %v7651_v42 = vld [vmem:[%s11695_s2 + $0xa28] ss:$24 sps:$4 sm:$0xff]  }
 0x6ee   :  { %v10017_v52 = vpop.f32.mrf.mxu0  ;;  %4547 = vmatmul.mubr.bf16.gmra.mxu0 %v7645_v1  ;;  %v10020_v30 = vadd.f32 %v4677_v33, %v9442_v6  ;;  %4875 = vmatprep.mubr.bf16.mxu1 %v7656_v48  ;;  %v7662_v6 = vld [vmem:[%s11695_s2 + $0x524] ss:$24 sps:$4 sm:$0xff]  }
 0x6ef   :  { %12075 = vst [vmem:[#allocation189_spill] sm:$0xff] %v10017_v52  ;;  %v4679_v13 = vpop.f32.mrf.mxu1  ;;  %4554 = vmatprep.mubr.bf16.mxu0 %v7653_v14  ;;  %v7659_v48 = vld [vmem:[%s11695_s2 + $0xa5c] ss:$24 sps:$4 sm:$0xff]  }
 0x6f0   :  { %v4358_v46 = vpop.f32.mrf.mxu0 }
 0x6f1   :  { %v4680_v20 = vpop.f32.mrf.mxu1 }
 0x6f2   :  { %v10025_v34 = vpop.f32.mrf.mxu0  ;;  %v10028_v37 = vadd.f32 %v4680_v20, %v9450_v49 }
 0x6f3   :  { %12076 = vst [vmem:[#allocation190_spill] sm:$0xff] %v10025_v34  ;;  %v4682_v1 = vpop.f32.mrf.mxu1  ;;  %v7660_v34 = vld [vmem:[%s11695_s2 + $0x520] ss:$24 sps:$4 sm:$0xff]  }
 0x6f4   :  { %v4361_v33 = vpop.f32.mrf.mxu0 }
 0x6f5   :  { %v4685_v13 = vpop.f32.mrf.mxu1  ;;  %4876 = vmatmul.mubr.bf16.gmra.mxu1 %v7654_v38  ;;  %v7657_v38 = vld [vmem:[%s11695_s2 + $0xa58] ss:$24 sps:$4 sm:$0xff]  }
 0x6f6   :  { %v10041_v20 = vpop.f32.mrf.mxu0  ;;  %4555 = vmatmul.mubr.bf16.gmra.mxu0 %v7651_v42  ;;  %v10044_v49 = vadd.f32 %v4685_v13, %v9464_v4  ;;  %4883 = vmatprep.mubr.bf16.mxu1 %v7662_v6  ;;  %v7668_v4 = vld [vmem:[%s11695_s2 + $0x554] ss:$24 sps:$4 sm:$0xff]  }
 0x6f7   :  { %12077 = vst [vmem:[#allocation191_spill] sm:$0xff] %v10041_v20  ;;  %v4687_v46 = vpop.f32.mrf.mxu1  ;;  %4562 = vmatprep.mubr.bf16.mxu0 %v7659_v48  ;;  %v7665_v6 = vld [vmem:[%s11695_s2 + $0xa8c] ss:$24 sps:$4 sm:$0xff]  }
 0x6f8   :  { %v4366_v1 = vpop.f32.mrf.mxu0 }
 0x6f9   :  { %v4688_v51 = vpop.f32.mrf.mxu1 }
 0x6fa   :  { %v10049_v52 = vpop.f32.mrf.mxu0  ;;  %v10052_v33 = vadd.f32 %v4688_v51, %v9478_v60 }
 0x6fb   :  { %12078 = vst [vmem:[#allocation192_spill] sm:$0xff] %v10049_v52  ;;  %v4690_v42 = vpop.f32.mrf.mxu1  ;;  %v7666_v52 = vld [vmem:[%s11695_s2 + $0x550] ss:$24 sps:$4 sm:$0xff]  }
 0x6fc   :  { %v4369_v13 = vpop.f32.mrf.mxu0 }
 0x6fd   :  { %v4693_v46 = vpop.f32.mrf.mxu1  ;;  %4884 = vmatmul.mubr.bf16.gmra.mxu1 %v7660_v34  ;;  %v7663_v34 = vld [vmem:[%s11695_s2 + $0xa88] ss:$24 sps:$4 sm:$0xff]  }
 0x6fe   :  { %v10065_v60 = vpop.f32.mrf.mxu0  ;;  %4563 = vmatmul.mubr.bf16.gmra.mxu0 %v7657_v38  ;;  %v10068_v51 = vadd.f32 %v4693_v46, %v9486_v18  ;;  %4891 = vmatprep.mubr.bf16.mxu1 %v7668_v4  ;;  %v7674_v18 = vld [vmem:[%s11695_s2 + $0x584] ss:$24 sps:$4 sm:$0xff]  }
 0x6ff   :  { %12079 = vst [vmem:[#allocation193_spill] sm:$0xff] %v10065_v60  ;;  %v4695_v1 = vpop.f32.mrf.mxu1  ;;  %4570 = vmatprep.mubr.bf16.mxu0 %v7665_v6  ;;  %v7671_v4 = vld [vmem:[%s11695_s2 + $0xabc] ss:$24 sps:$4 sm:$0xff]  }
 0x700   :  { %v4374_v42 = vpop.f32.mrf.mxu0 }
 0x701   :  { %v4696_v14 = vpop.f32.mrf.mxu1 }
 0x702   :  { %v10073_v20 = vpop.f32.mrf.mxu0  ;;  %v10076_v13 = vadd.f32 %v4696_v14, %v9500_v11 }
 0x703   :  { %12080 = vst [vmem:[#allocation194_spill] sm:$0xff] %v10073_v20  ;;  %v4698_v38 = vpop.f32.mrf.mxu1  ;;  %v7672_v20 = vld [vmem:[%s11695_s2 + $0x580] ss:$24 sps:$4 sm:$0xff]  }
 0x704   :  { %v4377_v46 = vpop.f32.mrf.mxu0 }
 0x705   :  { %v4701_v1 = vpop.f32.mrf.mxu1  ;;  %4892 = vmatmul.mubr.bf16.gmra.mxu1 %v7666_v52  ;;  %v7669_v52 = vld [vmem:[%s11695_s2 + $0xab8] ss:$24 sps:$4 sm:$0xff]  }
 0x706   :  { %v10089_v11 = vpop.f32.mrf.mxu0  ;;  %4571 = vmatmul.mubr.bf16.gmra.mxu0 %v7663_v34  ;;  %v10092_v14 = vadd.f32 %v4701_v1, %v9508_v53  ;;  %4899 = vmatprep.mubr.bf16.mxu1 %v7674_v18  ;;  %v7680_v53 = vld [vmem:[%s11695_s2 + $0x5b4] ss:$24 sps:$4 sm:$0xff]  }
 0x707   :  { %12081 = vst [vmem:[#allocation195_spill] sm:$0xff] %v10089_v11  ;;  %v4703_v42 = vpop.f32.mrf.mxu1  ;;  %4578 = vmatprep.mubr.bf16.mxu0 %v7671_v4  ;;  %v7677_v18 = vld [vmem:[%s11695_s2 + $0xaec] ss:$24 sps:$4 sm:$0xff]  }
 0x708   :  { %v4382_v38 = vpop.f32.mrf.mxu0 }
 0x709   :  { %v4704_v48 = vpop.f32.mrf.mxu1 }
 0x70a   :  { %v10097_v60 = vpop.f32.mrf.mxu0  ;;  %v10100_v46 = vadd.f32 %v4704_v48, %v9522_v43 }
 0x70b   :  { %12082 = vst [vmem:[#allocation196_spill] sm:$0xff] %v10097_v60  ;;  %v4706_v34 = vpop.f32.mrf.mxu1  ;;  %v7678_v60 = vld [vmem:[%s11695_s2 + $0x5b0] ss:$24 sps:$4 sm:$0xff]  }
 0x70c   :  { %v4385_v1 = vpop.f32.mrf.mxu0 }
 0x70d   :  { %v4709_v42 = vpop.f32.mrf.mxu1  ;;  %4900 = vmatmul.mubr.bf16.gmra.mxu1 %v7672_v20  ;;  %v7675_v20 = vld [vmem:[%s11695_s2 + $0xae8] ss:$24 sps:$4 sm:$0xff]  }
 0x70e   :  { %v10113_v43 = vpop.f32.mrf.mxu0  ;;  %4579 = vmatmul.mubr.bf16.gmra.mxu0 %v7669_v52  ;;  %v10116_v48 = vadd.f32 %v4709_v42, %v9530_v63  ;;  %4907 = vmatprep.mubr.bf16.mxu1 %v7680_v53  ;;  %v7686_v63 = vld [vmem:[%s11695_s2 + $0x5e4] ss:$24 sps:$4 sm:$0xff]  }
 0x70f   :  { %12083 = vst [vmem:[#allocation197_spill] sm:$0xff] %v10113_v43  ;;  %v4711_v38 = vpop.f32.mrf.mxu1  ;;  %4586 = vmatprep.mubr.bf16.mxu0 %v7677_v18  ;;  %v7683_v53 = vld [vmem:[%s11695_s2 + $0xb1c] ss:$24 sps:$4 sm:$0xff]  }
 0x710   :  { %v4390_v34 = vpop.f32.mrf.mxu0 }
 0x711   :  { %v4712_v6 = vpop.f32.mrf.mxu1 }
 0x712   :  { %v10121_v11 = vpop.f32.mrf.mxu0  ;;  %v10124_v1 = vadd.f32 %v4712_v6, %v9544_v12 }
 0x713   :  { %12084 = vst [vmem:[#allocation198_spill] sm:$0xff] %v10121_v11  ;;  %v4714_v52 = vpop.f32.mrf.mxu1  ;;  %v7684_v11 = vld [vmem:[%s11695_s2 + $0x5e0] ss:$24 sps:$4 sm:$0xff]  }
 0x714   :  { %v4393_v42 = vpop.f32.mrf.mxu0 }
 0x715   :  { %v4717_v38 = vpop.f32.mrf.mxu1  ;;  %4908 = vmatmul.mubr.bf16.gmra.mxu1 %v7678_v60  ;;  %v7681_v60 = vld [vmem:[%s11695_s2 + $0xb18] ss:$24 sps:$4 sm:$0xff]  }
 0x716   :  { %v10137_v12 = vpop.f32.mrf.mxu0  ;;  %4587 = vmatmul.mubr.bf16.gmra.mxu0 %v7675_v20  ;;  %v10140_v6 = vadd.f32 %v4717_v38, %v9552_v0  ;;  %4915 = vmatprep.mubr.bf16.mxu1 %v7686_v63  ;;  %v7692_v0 = vld [vmem:[%s11695_s2 + $0x614] ss:$24 sps:$4 sm:$0xff]  }
 0x717   :  { %12085 = vst [vmem:[#allocation199_spill] sm:$0xff] %v10137_v12  ;;  %v4719_v34 = vpop.f32.mrf.mxu1  ;;  %4594 = vmatprep.mubr.bf16.mxu0 %v7683_v53  ;;  %v7689_v63 = vld [vmem:[%s11695_s2 + $0xb4c] ss:$24 sps:$4 sm:$0xff]   ;;  %v4192_v53 = vadd.f32 %v9602_v40, %v8892_v47  ;;  %v4197_v40 = vadd.f32 %v9615_v41, %v8908_v35  ;;  %v7702_v35 = vld [vmem:[%s11695_s2 + $0x670] ss:$24 sps:$4 sm:$0xff]  }
 0x718   :  { %v4398_v52 = vpop.f32.mrf.mxu0  ;;  %v7701_v47 = vld [vmem:[%s11695_s2 + $0xbac] ss:$24 sps:$4 sm:$0xff]  }
 0x719   :  { %v4720_v4 = vpop.f32.mrf.mxu1 }
 0x71a   :  { %v10145_v43 = vpop.f32.mrf.mxu0  ;;  %v10148_v42 = vadd.f32 %v4720_v4, %v9566_v17 }
 0x71b   :  { %12086 = vst [vmem:[#allocation200_spill] sm:$0xff] %v10145_v43  ;;  %v4722_v20 = vpop.f32.mrf.mxu1  ;;  %v7690_v43 = vld [vmem:[%s11695_s2 + $0x610] ss:$24 sps:$4 sm:$0xff]  }
 0x71c   :  { %v4401_v38 = vpop.f32.mrf.mxu0 }
 0x71d   :  { %v4725_v34 = vpop.f32.mrf.mxu1  ;;  %4916 = vmatmul.mubr.bf16.gmra.mxu1 %v7684_v11  ;;  %v7687_v11 = vld [vmem:[%s11695_s2 + $0xb48] ss:$24 sps:$4 sm:$0xff]  }
 0x71e   :  { %v10161_v17 = vpop.f32.mrf.mxu0  ;;  %4595 = vmatmul.mubr.bf16.gmra.mxu0 %v7681_v60  ;;  %v10164_v4 = vadd.f32 %v4725_v34, %v9574_v8  ;;  %4923 = vmatprep.mubr.bf16.mxu1 %v7692_v0  ;;  %v7698_v8 = vld [vmem:[%s11695_s2 + $0x644] ss:$24 sps:$4 sm:$0xff]  }
 0x71f   :  { %12087 = vst [vmem:[#allocation201_spill] sm:$0xff] %v10161_v17  ;;  %v4727_v52 = vpop.f32.mrf.mxu1  ;;  %4602 = vmatprep.mubr.bf16.mxu0 %v7689_v63  ;;  %v7695_v0 = vld [vmem:[%s11695_s2 + $0xb7c] ss:$24 sps:$4 sm:$0xff]   ;;  %v4189_v63 = vadd.f32 %v9595_v19, %v8888_v58  ;;  %v7696_v58 = vld [vmem:[%s11695_s2 + $0x640] ss:$24 sps:$4 sm:$0xff]  }
 0x720   :  { %v4406_v20 = vpop.f32.mrf.mxu0 }
 0x721   :  { %v4728_v18 = vpop.f32.mrf.mxu1 }
 0x722   :  { %v10169_v12 = vpop.f32.mrf.mxu0  ;;  %v10172_v38 = vadd.f32 %v4728_v18, %v9588_v25 }
 0x723   :  { %12088 = vst [vmem:[#allocation202_spill] sm:$0xff] %v10169_v12  ;;  %v4730_v60 = vpop.f32.mrf.mxu1 }
 0x724   :  { %v4409_v18 = vpop.f32.mrf.mxu0 }
 0x725   :  { %v4733_v34 = vpop.f32.mrf.mxu1  ;;  %4924 = vmatmul.mubr.bf16.gmra.mxu1 %v7690_v43 }
 0x726   :  { %v10187_v52 = vpop.f32.mrf.mxu0  ;;  %4603 = vmatmul.mubr.bf16.gmra.mxu0 %v7687_v11  ;;  %v10189_v20 = vadd.f32 %v4733_v34, %v4189_v63  ;;  %4931 = vmatprep.mubr.bf16.mxu1 %v7698_v8  ;;  %v7693_v11 = vld [vmem:[%s11695_s2 + $0xb78] ss:$24 sps:$4 sm:$0xff]   ;;  %v7704_v8 = vld [vmem:[%s11695_s2 + $0x674] ss:$24 sps:$4 sm:$0xff]  }
 0x727   :  { %v4735_v60 = vpop.f32.mrf.mxu1  ;;  %4610 = vmatprep.mubr.bf16.mxu0 %v7695_v0 }
 0x728   :  { %v4414_v12 = vpop.f32.mrf.mxu0  ;;  %v4200_v60 = vadd.f32 %v9622_v27, %v8912_v59  ;;  %v7707_v59 = vld [vmem:[%s11695_s2 + $0xbdc] ss:$24 sps:$4 sm:$0xff]   ;;  %v4205_v27 = vadd.f32 %v9635_v62, %v8928_v39  ;;  %v10249_v62 = vld [vmem:[%s11696_s3] sm:$0x3f] }
 0x729   :  { %v4736_v17 = vpop.f32.mrf.mxu1  ;;  %v4208_v12 = vadd.f32 %v9642_v31, %v8932_v44  ;;  %v7713_v31 = vld [vmem:[%s11695_s2 + $0x6d4] ss:$24 sps:$4 sm:$0xff]  }
 0x72a   :  { %v10196_v19 = vpop.f32.mrf.mxu0  ;;  %v10198_v43 = vadd.f32 %v4736_v17, %v4192_v53 }
 0x72b   :  { %v4738_v0 = vpop.f32.mrf.mxu1 }
 0x72c   :  { %v4417_v53 = vpop.f32.mrf.mxu0 }
 0x72d   :  { %v4741_v17 = vpop.f32.mrf.mxu1  ;;  %4932 = vmatmul.mubr.bf16.gmra.mxu1 %v7696_v58 }
 0x72e   :  { %v10213_v63 = vpop.f32.mrf.mxu0  ;;  %4611 = vmatmul.mubr.bf16.gmra.mxu0 %v7693_v11  ;;  %v10215_v18 = vadd.f32 %v4741_v17, %v4197_v40  ;;  %4939 = vmatprep.mubr.bf16.mxu1 %v7704_v8  ;;  %v7699_v11 = vld [vmem:[%s11695_s2 + $0xba8] ss:$24 sps:$4 sm:$0xff]   ;;  %v7710_v8 = vld [vmem:[%s11695_s2 + $0x6a4] ss:$24 sps:$4 sm:$0xff]  }
 0x72f   :  { %v4743_v34 = vpop.f32.mrf.mxu1  ;;  %4618 = vmatprep.mubr.bf16.mxu0 %v7701_v47 }
 0x730   :  { %v4422_v0 = vpop.f32.mrf.mxu0 }
 0x731   :  { %v4744_v25 = vpop.f32.mrf.mxu1  ;;  %v12089_v0 = vld [vmem:[#allocation5_spill] sm:$0xff] }
 0x732   :  { %v10222_v41 = vpop.f32.mrf.mxu0  ;;  %v10224_v58 = vadd.f32 %v4744_v25, %v4200_v60 }
 0x733   :  { %v4746_v47 = vpop.f32.mrf.mxu1 }
 0x734   :  { %v4425_v40 = vpop.f32.mrf.mxu0  ;;  %v5188_v47 = vsub.s32 1, %v12089_v0 }
 0x735   :  { %v4749_v53 = vpop.f32.mrf.mxu1  ;;  %4940 = vmatmul.mubr.bf16.gmra.mxu1 %v7702_v35 }
 0x736   :  { %v10239_v17 = vpop.f32.mrf.mxu0  ;;  %4619 = vmatmul.mubr.bf16.gmra.mxu0 %v7699_v11  ;;  %v10241_v34 = vadd.f32 %v4749_v53, %v4205_v27  ;;  %4947 = vmatprep.mubr.bf16.mxu1 %v7710_v8  ;;  %v7708_v11 = vld [vmem:[%s11695_s2 + $0x6a0] ss:$24 sps:$4 sm:$0xff]   ;;  %v5189_v40 = vrot.slane %v10249_v62, %v5188_v47  ;;  %v4213_v53 = vadd.f32 %v9655_v61, %v8948_v16  ;;  %v5196_v47 = vsub.s32 3, %v12089_v0 }
 0x737   :  { %v4751_v60 = vpop.f32.mrf.mxu1  ;;  %4626 = vmatprep.mubr.bf16.mxu0 %v7707_v59  ;;  %v7705_v59 = vld [vmem:[%s11695_s2 + $0xbd8] ss:$24 sps:$4 sm:$0xff]   ;;  %v4216_v16 = vadd.f32 %v9662_v3, %v8952_v23  ;;  %v4221_v3 = vadd.f32 %v9675_v32, %v8968_v45 }
 0x738   :  { %v4430_v39 = vpop.f32.mrf.mxu0  ;;  %v5197_v23 = vrot.slane %v10249_v62, %v5196_v47  ;;  %v4224_v47 = vadd.f32 %v9682_v2, %v8973_v7  ;;  %v12093_v45 = vld [vmem:[#allocation34_spill] sm:$0xff]  ;;  %v12097_v7 = vld [vmem:[#allocation33_spill] sm:$0xff] }
 0x739   :  { %v4752_v35 = vpop.f32.mrf.mxu1  ;;  %v7719_v2 = vld [vmem:[%s11695_s2 + $0x734] ss:$24 sps:$4 sm:$0xff]  }
 0x73a   :  { %v10254_v27 = vpop.f32.mrf.mxu0  ;;  %v10256_v8 = vadd.f32 %v4752_v35, %v4208_v12 }
 0x73b   :  { %12090 = vst [vmem:[#allocation203_spill] sm:$0xff] %v10254_v27  ;;  %v4754_v44 = vpop.f32.mrf.mxu1  ;;  %v11808_v27 = vsub.s32 0, %v12089_v0 }
 0x73c   :  { %v4433_v39 = vpop.f32.mrf.mxu0 }
 0x73d   :  { %v4757_v12 = vpop.f32.mrf.mxu1  ;;  %4948 = vmatmul.mubr.bf16.gmra.mxu1 %v7708_v11  ;;  %v7711_v11 = vld [vmem:[%s11695_s2 + $0x6d0] ss:$24 sps:$4 sm:$0xff]  }
 0x73e   :  { %v10269_v35 = vpop.f32.mrf.mxu0  ;;  %4627 = vmatmul.mubr.bf16.gmra.mxu0 %v7705_v59  ;;  %v10271_v25 = vadd.f32 %v4757_v12, %v4213_v53  ;;  %4955 = vmatprep.mubr.bf16.mxu1 %v7713_v31  ;;  %v5185_v31 = vrot.slane %v10249_v62, %v11808_v27  ;;  %v12092_v27 = vld [vmem:[#allocation37_spill] sm:$0xff]  ;;  %v12094_v12 = vld [vmem:[#allocation35_spill] sm:$0xff] }
 0x73f   :  { %v4759_v44 = vpop.f32.mrf.mxu1  ;;  %5276 = vmatprep.mubr.f32.mxu0 %v5189_v40  ;;  %v7716_v40 = vld [vmem:[%s11695_s2 + $0x704] ss:$24 sps:$4 sm:$0xff]  }
 0x740   :  { %v4438_v61 = vpop.f32.mrf.mxu0 }
 0x741   :  { %v4760_v60 = vpop.f32.mrf.mxu1 }
 0x742   :  { %v10280_v39 = vpop.f32.mrf.mxu0  ;;  %v10282_v59 = vadd.f32 %v4760_v60, %v4216_v16 }
 0x743   :  { %v4762_v53 = vpop.f32.mrf.mxu1 }
 0x744   :  { %v4441_v44 = vpop.f32.mrf.mxu0 }
 0x745   :  { %v4765_v60 = vpop.f32.mrf.mxu1  ;;  %4956 = vmatmul.mubr.bf16.gmra.mxu1 %v7711_v11  ;;  %v7714_v11 = vld [vmem:[%s11695_s2 + $0x700] ss:$24 sps:$4 sm:$0xff]  }
 0x746   :  { %v10295_v16 = vpop.f32.mrf.mxu0  ;;  %v10297_v61 = vadd.f32 %v4765_v60, %v4221_v3  ;;  %5277 = vmatmul.mubr.f32.vlgmr.msra.gmra.mxu0 %v5185_v31  ;;  %4963 = vmatprep.mubr.bf16.mxu1 %v7716_v40  ;;  %v12095_v3 = vld [vmem:[#allocation32_spill] sm:$0xff] }
 0x747   :  { %12091 = vst [vmem:[#allocation204_spill] sm:$0xff] %v10295_v16  ;;  %6846 = vmatpush3.msra.mxu0 %v12092_v27  ;;  %v4767_v53 = vpop.f32.mrf.mxu1  ;;  %5346 = vmatprep.mubr.f32.mxu0 %v5197_v23 }
 0x748   :  { %6847 = vmatprep.subr.mxu0 %v12093_v45  ;;  %v4446_v32 = vpop.f32.mrf.mxu0  ;;  %v12099_v53 = vld [vmem:[#allocation31_spill] sm:$0xff] }
 0x749   :  { %6848 = vmatpush3.msra.mxu0 %v12094_v12  ;;  %v4768_v44 = vpop.f32.mrf.mxu1  ;;  %v12098_v12 = vld [vmem:[#allocation30_spill] sm:$0xff]  ;;  %v12100_v32 = vld [vmem:[#allocation28_spill] sm:$0xff] }
 0x74a   :  { %6849 = vmatprep.subr.mxu0 %v12095_v3  ;;  %v10308_v31 = vpop.f32.mrf.mxu0  ;;  %v10310_v27 = vadd.f32 %v4768_v44, %v4224_v47  ;;  %v12102_v44 = vld [vmem:[#allocation29_spill] sm:$0xff] }
 0x74b   :  { %12096 = vst [vmem:[#allocation37_spill] sm:$0xff] %v10308_v31  ;;  %6850 = vmatpush3.msra.mxu0 %v12097_v7  ;;  %v4770_v40 = vpop.f32.mrf.mxu1  ;;  %v4229_v7 = vadd.f32 %v9695_v55, %v8991_v36  ;;  %v12178_v31 = vld [vmem:[#allocation95_spill] sm:$0xff] }
 0x74c   :  { %6851 = vmatprep.subr.mxu0 %v12098_v12  ;;  %v4449_v60 = vpop.f32.mrf.mxu0  ;;  %v4232_v40 = vadd.f32 %v9702_v29, %v8997_v22  ;;  %v12103_v12 = vld [vmem:[#allocation26_spill] sm:$0xff]  ;;  %v7722_v22 = vld [vmem:[%s11695_s2 + $0x764] ss:$24 sps:$4 sm:$0xff]  }
 0x74d   :  { %6852 = vmatpush3.msra.mxu0 %v12099_v53  ;;  %v4773_v45 = vpop.f32.mrf.mxu1  ;;  %4964 = vmatmul.mubr.bf16.gmra.mxu1 %v7714_v11  ;;  %v12104_v53 = vld [vmem:[#allocation27_spill] sm:$0xff]  ;;  %v12107_v29 = vld [vmem:[#allocation25_spill] sm:$0xff] }
 0x74e   :  { %6853 = vmatprep.subr.mxu0 %v12100_v32  ;;  %v10321_v47 = vpop.f32.mrf.mxu0  ;;  %4971 = vmatprep.mubr.bf16.mxu1 %v7719_v2  ;;  %v7717_v32 = vld [vmem:[%s11695_s2 + $0x730] ss:$24 sps:$4 sm:$0xff]   ;;  %v10333_v2 = vadd.f32 %v4773_v45, %v4229_v7 }
 0x74f   :  { %12101 = vst [vmem:[#allocation34_spill] sm:$0xff] %v10321_v47  ;;  %6854 = vmatpush3.msra.mxu0 %v12102_v44  ;;  %v4775_v3 = vpop.f32.mrf.mxu1  ;;  %v12105_v44 = vld [vmem:[#allocation24_spill] sm:$0xff]  ;;  %v12109_v7 = vld [vmem:[#allocation23_spill] sm:$0xff] }
 0x750   :  { %6855 = vmatprep.subr.mxu0 %v12103_v12  ;;  %v4454_v60 = vpop.f32.mrf.mxu0  ;;  %v12122_v12 = vld [vmem:[#allocation13_spill] sm:$0xff] }
 0x751   :  { %6856 = vmatpush3.msra.mxu0 %v12104_v53  ;;  %v4776_v11 = vpop.f32.mrf.mxu1  ;;  %v12108_v60 = vld [vmem:[#allocation22_spill] sm:$0xff] }
 0x752   :  { %6857 = vmatprep.subr.mxu0 %v12105_v44  ;;  %v10336_v3 = vpop.f32.mrf.mxu0  ;;  %v10338_v36 = vadd.f32 %v4776_v11, %v4232_v40  ;;  %v12110_v44 = vld [vmem:[#allocation20_spill] sm:$0xff]  ;;  %v12112_v11 = vld [vmem:[#allocation21_spill] sm:$0xff] }
 0x753   :  { %12106 = vst [vmem:[#allocation35_spill] sm:$0xff] %v10336_v3  ;;  %6858 = vmatpush3.msra.mxu0 %v12107_v29  ;;  %v4778_v55 = vpop.f32.mrf.mxu1  ;;  %v4237_v29 = vadd.f32 %v9715_v54, %v9015_v50  ;;  %v12163_v3 = vld [vmem:[#allocation83_spill] sm:$0xff] }
 0x754   :  { %6859 = vmatprep.subr.mxu0 %v12108_v60  ;;  %v4457_v45 = vpop.f32.mrf.mxu0  ;;  %v4240_v55 = vadd.f32 %v9722_v26, %v9021_v28  ;;  %v12113_v60 = vld [vmem:[#allocation18_spill] sm:$0xff]  ;;  %v12117_v28 = vld [vmem:[#allocation17_spill] sm:$0xff] }
 0x755   :  { %6860 = vmatpush3.msra.mxu0 %v12109_v7  ;;  %v4781_v53 = vpop.f32.mrf.mxu1  ;;  %4972 = vmatmul.mubr.bf16.gmra.mxu1 %v7717_v32  ;;  %v12114_v7 = vld [vmem:[#allocation19_spill] sm:$0xff] }
 0x756   :  { %6861 = vmatprep.subr.mxu0 %v12110_v44  ;;  %v10349_v40 = vpop.f32.mrf.mxu0  ;;  %4979 = vmatprep.mubr.bf16.mxu1 %v7722_v22  ;;  %v7720_v44 = vld [vmem:[%s11695_s2 + $0x760] ss:$24 sps:$4 sm:$0xff]   ;;  %v10361_v22 = vadd.f32 %v4781_v53, %v4237_v29  ;;  %v7725_v26 = vld [vmem:[%s11695_s2 + $0x794] ss:$24 sps:$4 sm:$0xff]  }
 0x757   :  { %12111 = vst [vmem:[#allocation32_spill] sm:$0xff] %v10349_v40  ;;  %6862 = vmatpush3.msra.mxu0 %v12112_v11  ;;  %v4783_v23 = vpop.f32.mrf.mxu1  ;;  %v12115_v11 = vld [vmem:[#allocation16_spill] sm:$0xff]  ;;  %v12119_v29 = vld [vmem:[#allocation15_spill] sm:$0xff] }
 0x758   :  { %6863 = vmatprep.subr.mxu0 %v12113_v60  ;;  %v4462_v45 = vpop.f32.mrf.mxu0 }
 0x759   :  { %6864 = vmatpush3.msra.mxu0 %v12114_v7  ;;  %v4784_v32 = vpop.f32.mrf.mxu1  ;;  %v12118_v45 = vld [vmem:[#allocation14_spill] sm:$0xff] }
 0x75a   :  { %6865 = vmatprep.subr.mxu0 %v12115_v11  ;;  %v10364_v23 = vpop.f32.mrf.mxu0  ;;  %v10366_v50 = vadd.f32 %v4784_v32, %v4240_v55  ;;  %v12120_v11 = vld [vmem:[#allocation12_spill] sm:$0xff]  ;;  %v5192_v32 = vsub.s32 2, %v12089_v0 }
 0x75b   :  { %12116 = vst [vmem:[#allocation33_spill] sm:$0xff] %v10364_v23  ;;  %6866 = vmatpush3.msra.mxu0 %v12117_v28  ;;  %v4786_v54 = vpop.f32.mrf.mxu1  ;;  %v12149_v23 = vld [vmem:[#allocation87_spill] sm:$0xff] }
 0x75c   :  { %6867 = vmatprep.subr.mxu0 %v12118_v45  ;;  %v4465_v53 = vpop.f32.mrf.mxu0  ;;  %v4245_v54 = vadd.f32 %v9735_v57, %v9039_v21  ;;  %v4248_v45 = vadd.f32 %v9742_v9, %v9045_v15  ;;  %v5193_v15 = vrot.slane %v10249_v62, %v5192_v32  ;;  %v12127_v9 = vld [vmem:[#allocation9_spill] sm:$0xff] }
 0x75d   :  { %6868 = vmatpush3.msra.mxu0 %v12119_v29  ;;  %v4789_v7 = vpop.f32.mrf.mxu1  ;;  %4980 = vmatmul.mubr.bf16.gmra.mxu1 %v7720_v44  ;;  %v12123_v53 = vld [vmem:[#allocation10_spill] sm:$0xff]  ;;  %v5204_v44 = vsub.s32 5, %v12089_v0 }
 0x75e   :  { %6869 = vmatprep.subr.mxu0 %v12120_v11  ;;  %v10377_v55 = vpop.f32.mrf.mxu0  ;;  %4987 = vmatprep.mubr.bf16.mxu1 %v7725_v26  ;;  %v12124_v11 = vld [vmem:[#allocation11_spill] sm:$0xff] }
 0x75f   :  { %12121 = vst [vmem:[#allocation30_spill] sm:$0xff] %v10377_v55  ;;  %6870 = vmatpush3.msra.mxu0 %v12122_v12  ;;  %v4791_v28 = vpop.f32.mrf.mxu1  ;;  %v7723_v26 = vld [vmem:[%s11695_s2 + $0x790] ss:$24 sps:$4 sm:$0xff]   ;;  %v10391_v12 = vadd.f32 %v4789_v7, %v4245_v54 }
 0x760   :  { %6871 = vmatprep.subr.mxu0 %v12123_v53  ;;  %v4470_v29 = vpop.f32.mrf.mxu0  ;;  %v12125_v28 = vld [vmem:[#allocation8_spill] sm:$0xff]  ;;  %v12128_v54 = vld [vmem:[#allocation6_spill] sm:$0xff]  ;;  %v12135_v55 = vld [vmem:[#allocation91_spill] sm:$0xff] }
 0x761   :  { %6872 = vmatpush3.msra.mxu0 %v12124_v11  ;;  %v4792_v60 = vpop.f32.mrf.mxu1  ;;  %v7728_v29 = vld [vmem:[%s11695_s2 + $0x7c4] ss:$24 sps:$4 sm:$0xff]   ;;  %v4253_v11 = vadd.f32 %v9755_v56, %v9063_v5  ;;  %v12133_v7 = vld [vmem:[#allocation38_spill] sm:$0xff] }
 0x762   :  { %6873 = vmatprep.subr.mxu0 %v12125_v28  ;;  %v10394_v21 = vpop.f32.mrf.mxu0  ;;  %v10396_v57 = vadd.f32 %v4792_v60, %v4248_v45  ;;  %v5205_v60 = vrot.slane %v10249_v62, %v5204_v44  ;;  %v12129_v45 = vld [vmem:[#allocation7_spill] sm:$0xff]  ;;  %v12132_v5 = vld [vmem:[#allocation108_spill] sm:$0xff] }
 0x763   :  { %12126 = vst [vmem:[#allocation31_spill] sm:$0xff] %v10394_v21  ;;  %6874 = vmatpush3.msra.mxu0 %v12127_v9  ;;  %v4794_v53 = vpop.f32.mrf.mxu1  ;;  %v12130_v9 = vld [vmem:[#allocation92_spill] sm:$0xff] }
 0x764   :  { %6875 = vmatprep.subr.mxu0 %v12128_v54  ;;  %v4473_v28 = vpop.f32.mrf.mxu0  ;;  %v12134_v54 = vld [vmem:[#allocation142_spill] sm:$0xff] }
 0x765   :  { %6876 = vmatpush3.msra.mxu0 %v12129_v45  ;;  %v4797_v32 = vpop.f32.mrf.mxu1  ;;  %4988 = vmatmul.mubr.bf16.gmra.mxu1 %v7723_v26  ;;  %v4256_v28 = vadd.f32 %v12134_v54, %v12133_v7  ;;  %v12136_v45 = vld [vmem:[#allocation107_spill] sm:$0xff] }
 0x766   :  { %6880 = vmatprep.subr.mxu0 %v12130_v9  ;;  %v10411_v53 = vpop.f32.mrf.mxu0  ;;  %v10413_v21 = vadd.f32 %v4797_v32, %v4253_v11  ;;  %5347 = vmatmul.mubr.f32.vlgmr.msra.gmra.mxu0 %v5193_v15  ;;  %v7726_v11 = vld [vmem:[%s11695_s2 + $0x7c0] ss:$24 sps:$4 sm:$0xff]   ;;  %v12137_v32 = vld [vmem:[#allocation90_spill] sm:$0xff] }
 0x767   :  { %12131 = vst [vmem:[#allocation28_spill] sm:$0xff] %v10411_v53  ;;  %6881 = vmatpush3.msra.mxu0 %v12132_v5  ;;  %v4799_v56 = vpop.f32.mrf.mxu1  ;;  %4995 = vmatprep.mubr.bf16.mxu1 %v7728_v29  ;;  %v7731_v29 = vld [vmem:[%s11695_s2 + $0x7f4] ss:$24 sps:$4 sm:$0xff]   ;;  %v12141_v5 = vld [vmem:[#allocation144_spill] sm:$0xff] }
 0x768   :  { %6882 = vmatprep.subr.mxu0 %v12135_v55  ;;  %v4478_v44 = vpop.f32.mrf.mxu0  ;;  %5416 = vmatprep.mubr.f32.mxu0 %v5205_v60  ;;  %v12139_v55 = vld [vmem:[#allocation106_spill] sm:$0xff]  ;;  %v12140_v60 = vld [vmem:[#allocation41_spill] sm:$0xff] }
 0x769   :  { %6883 = vmatpush3.msra.mxu0 %v12136_v45  ;;  %v4800_v26 = vpop.f32.mrf.mxu1  ;;  %v4261_v56 = vadd.f32 %v12141_v5, %v12140_v60  ;;  %v12142_v44 = vld [vmem:[#allocation89_spill] sm:$0xff]  ;;  %v12147_v60 = vld [vmem:[#allocation44_spill] sm:$0xff]  ;;  %v12148_v5 = vld [vmem:[#allocation146_spill] sm:$0xff] }
 0x76a   :  { %6884 = vmatprep.subr.mxu0 %v12137_v32  ;;  %v10424_v15 = vpop.f32.mrf.mxu0  ;;  %v10426_v9 = vadd.f32 %v4800_v26, %v4256_v28  ;;  %v12143_v32 = vld [vmem:[#allocation105_spill] sm:$0xff]  ;;  %v12144_v26 = vld [vmem:[#allocation88_spill] sm:$0xff]  ;;  %v4264_v54 = vadd.f32 %v12148_v5, %v12147_v60 }
 0x76b   :  { %12138 = vst [vmem:[#allocation29_spill] sm:$0xff] %v10424_v15  ;;  %6885 = vmatpush3.msra.mxu0 %v12139_v55  ;;  %v4802_v7 = vpop.f32.mrf.mxu1  ;;  %v12146_v55 = vld [vmem:[#allocation104_spill] sm:$0xff] }
 0x76c   :  { %6886 = vmatprep.subr.mxu0 %v12142_v44  ;;  %v4481_v45 = vpop.f32.mrf.mxu0  ;;  %v12155_v60 = vld [vmem:[#allocation148_spill] sm:$0xff] }
 0x76d   :  { %6887 = vmatpush3.msra.mxu0 %v12143_v32  ;;  %v4805_v28 = vpop.f32.mrf.mxu1  ;;  %4996 = vmatmul.mubr.bf16.gmra.mxu1 %v7726_v11  ;;  %v12150_v45 = vld [vmem:[#allocation103_spill] sm:$0xff] }
 0x76e   :  { %6888 = vmatprep.subr.mxu0 %v12144_v26  ;;  %v10439_v15 = vpop.f32.mrf.mxu0  ;;  %v10441_v53 = vadd.f32 %v4805_v28, %v4261_v56  ;;  %5003 = vmatprep.mubr.bf16.mxu1 %v7731_v29  ;;  %v7729_v11 = vld [vmem:[%s11695_s2 + $0x7f0] ss:$24 sps:$4 sm:$0xff]   ;;  %v7734_v28 = vld [vmem:[%s11695_s2 + $0x824] ss:$24 sps:$4 sm:$0xff]  }
 0x76f   :  { %12145 = vst [vmem:[#allocation26_spill] sm:$0xff] %v10439_v15  ;;  %6889 = vmatpush3.msra.mxu0 %v12146_v55  ;;  %v4807_v7 = vpop.f32.mrf.mxu1  ;;  %v12151_v26 = vld [vmem:[#allocation86_spill] sm:$0xff]  ;;  %v12157_v15 = vld [vmem:[#allocation101_spill] sm:$0xff] }
 0x770   :  { %6890 = vmatprep.subr.mxu0 %v12149_v23  ;;  %v4486_v44 = vpop.f32.mrf.mxu0  ;;  %v12153_v55 = vld [vmem:[#allocation102_spill] sm:$0xff]  ;;  %v12154_v7 = vld [vmem:[#allocation47_spill] sm:$0xff] }
 0x771   :  { %6891 = vmatpush3.msra.mxu0 %v12150_v45  ;;  %v4808_v32 = vpop.f32.mrf.mxu1  ;;  %v4269_v5 = vadd.f32 %v12155_v60, %v12154_v7  ;;  %v12156_v45 = vld [vmem:[#allocation85_spill] sm:$0xff]  ;;  %v12161_v7 = vld [vmem:[#allocation50_spill] sm:$0xff] }
 0x772   :  { %6892 = vmatprep.subr.mxu0 %v12151_v26  ;;  %v10452_v56 = vpop.f32.mrf.mxu0  ;;  %v10454_v29 = vadd.f32 %v4808_v32, %v4264_v54  ;;  %v12158_v32 = vld [vmem:[#allocation84_spill] sm:$0xff]  ;;  %v12162_v60 = vld [vmem:[#allocation150_spill] sm:$0xff] }
 0x773   :  { %12152 = vst [vmem:[#allocation27_spill] sm:$0xff] %v10452_v56  ;;  %6893 = vmatpush3.msra.mxu0 %v12153_v55  ;;  %v4810_v23 = vpop.f32.mrf.mxu1  ;;  %v12160_v55 = vld [vmem:[#allocation100_spill] sm:$0xff]  ;;  %v4272_v44 = vadd.f32 %v12162_v60, %v12161_v7 }
 0x774   :  { %6894 = vmatprep.subr.mxu0 %v12156_v45  ;;  %v4489_v26 = vpop.f32.mrf.mxu0  ;;  %v12169_v7 = vld [vmem:[#allocation152_spill] sm:$0xff] }
 0x775   :  { %6895 = vmatpush3.msra.mxu0 %v12157_v15  ;;  %v4813_v54 = vpop.f32.mrf.mxu1  ;;  %5004 = vmatmul.mubr.bf16.gmra.mxu1 %v7729_v11  ;;  %v12164_v26 = vld [vmem:[#allocation99_spill] sm:$0xff] }
 0x776   :  { %6896 = vmatprep.subr.mxu0 %v12158_v32  ;;  %v10467_v56 = vpop.f32.mrf.mxu0  ;;  %v10469_v40 = vadd.f32 %v4813_v54, %v4269_v5  ;;  %5011 = vmatprep.mubr.bf16.mxu1 %v7734_v28  ;;  %v7732_v11 = vld [vmem:[%s11695_s2 + $0x820] ss:$24 sps:$4 sm:$0xff]   ;;  %v12165_v32 = vld [vmem:[#allocation82_spill] sm:$0xff] }
 0x777   :  { %12159 = vst [vmem:[#allocation24_spill] sm:$0xff] %v10467_v56  ;;  %6897 = vmatpush3.msra.mxu0 %v12160_v55  ;;  %v4815_v23 = vpop.f32.mrf.mxu1  ;;  %v7737_v54 = vld [vmem:[%s11695_s2 + $0x854] ss:$24 sps:$4 sm:$0xff]   ;;  %v12171_v56 = vld [vmem:[#allocation97_spill] sm:$0xff] }
 0x778   :  { %6898 = vmatprep.subr.mxu0 %v12163_v3  ;;  %v4494_v45 = vpop.f32.mrf.mxu0  ;;  %v12167_v55 = vld [vmem:[#allocation98_spill] sm:$0xff]  ;;  %v12168_v23 = vld [vmem:[#allocation53_spill] sm:$0xff] }
 0x779   :  { %6899 = vmatpush3.msra.mxu0 %v12164_v26  ;;  %v4816_v15 = vpop.f32.mrf.mxu1  ;;  %v4277_v60 = vadd.f32 %v12169_v7, %v12168_v23  ;;  %v12170_v26 = vld [vmem:[#allocation81_spill] sm:$0xff]  ;;  %v12175_v7 = vld [vmem:[#allocation56_spill] sm:$0xff]  ;;  %v12176_v45 = vld [vmem:[#allocation154_spill] sm:$0xff] }
 0x77a   :  { %6900 = vmatprep.subr.mxu0 %v12165_v32  ;;  %v10480_v5 = vpop.f32.mrf.mxu0  ;;  %v10482_v28 = vadd.f32 %v4816_v15, %v4272_v44  ;;  %v12172_v15 = vld [vmem:[#allocation80_spill] sm:$0xff] }
 0x77b   :  { %12166 = vst [vmem:[#allocation25_spill] sm:$0xff] %v10480_v5  ;;  %6901 = vmatpush3.msra.mxu0 %v12167_v55  ;;  %v4818_v3 = vpop.f32.mrf.mxu1  ;;  %v5200_v55 = vsub.s32 4, %v12089_v0  ;;  %v12183_v0 = vld [vmem:[#allocation156_spill] sm:$0xff] }
 0x77c   :  { %6902 = vmatprep.subr.mxu0 %v12170_v26  ;;  %v4497_v32 = vpop.f32.mrf.mxu0  ;;  %v12174_v3 = vld [vmem:[#allocation96_spill] sm:$0xff]  ;;  %v4280_v26 = vadd.f32 %v12176_v45, %v12175_v7  ;;  %v12179_v45 = vld [vmem:[#allocation78_spill] sm:$0xff] }
 0x77d   :  { %6903 = vmatpush3.msra.mxu0 %v12171_v56  ;;  %v4821_v44 = vpop.f32.mrf.mxu1  ;;  %5012 = vmatmul.mubr.bf16.gmra.mxu1 %v7732_v11  ;;  %v12177_v32 = vld [vmem:[#allocation79_spill] sm:$0xff] }
 0x77e   :  { %6904 = vmatprep.subr.mxu0 %v12172_v15  ;;  %v10495_v5 = vpop.f32.mrf.mxu0  ;;  %v10497_v47 = vadd.f32 %v4821_v44, %v4277_v60  ;;  %5019 = vmatprep.mubr.bf16.mxu1 %v7737_v54  ;;  %v7735_v60 = vld [vmem:[%s11695_s2 + $0x850] ss:$24 sps:$4 sm:$0xff]   ;;  %v10511_v54 = vld [vmem:[%s11698_s5] sm:$0xff] }
 0x77f   :  { %12173 = vst [vmem:[#allocation22_spill] sm:$0xff] %v10495_v5  ;;  %6905 = vmatpush3.msra.mxu0 %v12174_v3  ;;  %v4823_v23 = vpop.f32.mrf.mxu1  ;;  %v10516_v44 = vld [vmem:[%s11698_s5 + $0x20] sm:$0xff]  ;;  %v5201_v3 = vrot.slane %v10249_v62, %v5200_v55 }
 0x780   :  { %6906 = vmatprep.subr.mxu0 %v12177_v32  ;;  %v4502_v56 = vpop.f32.mrf.mxu0  ;;  %v12181_v23 = vld [vmem:[#allocation94_spill] sm:$0xff]  ;;  %v7740_v32 = vld [vmem:[%s11695_s2 + $0x884] ss:$24 sps:$4 sm:$0xff]  }
 0x781   :  { %6907 = vmatpush3.msra.mxu0 %v12178_v31  ;;  %v4824_v11 = vpop.f32.mrf.mxu1  ;;  %v12182_v56 = vld [vmem:[#allocation76_spill] sm:$0xff]  ;;  %v12185_v62 = vld [vmem:[#allocation93_spill] sm:$0xff] }
 0x782   :  { %6908 = vmatprep.subr.mxu0 %v12179_v45  ;;  %v10519_v15 = vpop.f32.mrf.mxu0  ;;  %v10521_v31 = vadd.f32 %v4824_v11, %v4280_v26  ;;  %v4285_v5 = vadd.f32 %v12183_v0, %v12182_v56  ;;  %v12184_v45 = vld [vmem:[#allocation77_spill] sm:$0xff]  ;;  %v6681_v26 = vcombine.high %v10511_v54, %v10516_v44  ;;  %v12186_v11 = vpack.c.bf16 %v10396_v57, %v10391_v12  ;;  %v12188_v56 = vld [vmem:[#allocation75_spill] sm:$0xff] }
 0x783   :  { %12180 = vst [vmem:[#allocation23_spill] sm:$0xff] %v10519_v15  ;;  %6909 = vmatpush3.msra.mxu0 %v12181_v23  ;;  %v4826_v7 = vpop.f32.mrf.mxu1 }
 0x784   :  { %6910 = vmatprep.subr.mxu0 %v12184_v45  ;;  %v4505_v15 = vpop.f32.mrf.mxu0  ;;  %v12187_v7 = vpack.c.bf16 %v10172_v38, %v10164_v4  ;;  %v12189_v45 = vld [vmem:[#allocation158_spill] sm:$0xff] }
 0x785   :  { %6911 = vmatpush3.msra.mxu0 %v12185_v62  ;;  %v4829_v55 = vpop.f32.mrf.mxu1  ;;  %5020 = vmatmul.mubr.bf16.gmra.mxu1 %v7735_v60  ;;  %v4288_v62 = vadd.f32 %v12189_v45, %v12188_v56  ;;  %v12190_v60 = vpack.c.bf16 %v10366_v50, %v10361_v22  ;;  %v7743_v38 = vld [vmem:[%s11695_s2 + $0x8b4] ss:$24 sps:$4 sm:$0xff]  }
 0x786   :  { %6915 = vmatprep.subr.bf16.mxu0 %v12186_v11  ;;  %v10539_v23 = vpop.f32.mrf.mxu0  ;;  %v10541_v0 = vadd.f32 %v4829_v55, %v4285_v5  ;;  %5417 = vmatmul.mubr.f32.vlgmr.msra.gmra.mxu0 %v5201_v3  ;;  %v7738_v5 = vld [vmem:[%s11695_s2 + $0x880] ss:$24 sps:$4 sm:$0xff]   ;;  %v12192_v50 = vld [vmem:[#allocation74_spill] sm:$0xff] }
 0x787   :  { %6916 = vmatpush3.bf16.msra.mxu0 %v12187_v7  ;;  %v4831_v15 = vpop.f32.mrf.mxu1  ;;  %5027 = vmatprep.mubr.bf16.mxu1 %v7740_v32  ;;  %v12191_v32 = vpack.c.bf16 %v10148_v42, %v10140_v6  ;;  %v12194_v7 = vpack.c.bf16 %v10338_v36, %v10333_v2  ;;  %v12195_v6 = vpack.c.bf16 %v10124_v1, %v10116_v48  ;;  %v7746_v48 = vld [vmem:[%s11695_s2 + $0x8e4] ss:$24 sps:$4 sm:$0xff]  }
 0x788   :  { %6917 = vmatprep.subr.bf16.mxu0 %v12190_v60  ;;  %v4510_v12 = vpop.f32.mrf.mxu0  ;;  %5906 = vmatprep.mubr.bf16.mxu0 %v6681_v26  ;;  %v12193_v26 = vld [vmem:[#allocation160_spill] sm:$0xff]  ;;  %v12196_v60 = vld [vmem:[#allocation73_spill] sm:$0xff]  ;;  %v12198_v2 = vpack.c.bf16 %v10310_v27, %v10297_v61  ;;  %v12199_v1 = vpack.c.bf16 %v10100_v46, %v10092_v14  ;;  %v12203_v14 = vpack.c.bf16 %v10076_v13, %v10068_v51  ;;  %v7749_v51 = vld [vmem:[%s11695_s2 + $0x914] ss:$24 sps:$4 sm:$0xff]  }
 0x789   :  { %v4832_v57 = vpop.f32.mrf.mxu1  ;;  %v4293_v55 = vadd.f32 %v12193_v26, %v12192_v50  ;;  %v12197_v12 = vld [vmem:[#allocation162_spill] sm:$0xff]  ;;  %v12200_v27 = vld [vmem:[#allocation72_spill] sm:$0xff]  ;;  %v12207_v13 = vpack.c.bf16 %v10052_v33, %v10044_v49  ;;  %v12211_v49 = vpack.c.bf16 %v10028_v37, %v10020_v30  ;;  %v12237_v11 = vld [vmem:[#allocation61_spill] sm:$0xff] }
 0x78a   :  { %v10554_v3 = vpop.f32.mrf.mxu0  ;;  %v10556_v4 = vadd.f32 %v4832_v57, %v4288_v62  ;;  %v4296_v57 = vadd.f32 %v12197_v12, %v12196_v60  ;;  %v12201_v50 = vld [vmem:[#allocation164_spill] sm:$0xff]  ;;  %v12204_v60 = vld [vmem:[#allocation71_spill] sm:$0xff]  ;;  %v12205_v12 = vld [vmem:[#allocation166_spill] sm:$0xff] }
 0x78b   :  { %6918 = vmatpush3.bf16.msra.mxu0 %v12191_v32  ;;  %v4834_v22 = vpop.f32.mrf.mxu1  ;;  %v4301_v26 = vadd.f32 %v12201_v50, %v12200_v27  ;;  %v12210_v27 = vpack.c.bf16 %v10224_v58, %v10215_v18  ;;  %v12214_v18 = vpack.c.bf16 %v10198_v43, %v10189_v20  ;;  %v7747_v30 = vld [vmem:[%s11695_s2 + $0x910] ss:$24 sps:$4 sm:$0xff]   ;;  %v7752_v20 = vld [vmem:[%s11695_s2 + $0x944] ss:$24 sps:$4 sm:$0xff]   ;;  %v6680_v43 = vcombine.low %v10511_v54, %v10516_v44 }
 0x78c   :  { %6919 = vmatprep.subr.bf16.mxu0 %v12194_v7  ;;  %v4513_v15 = vpop.f32.mrf.mxu0  ;;  %v12202_v7 = vpack.c.bf16 %v10282_v59, %v10271_v25  ;;  %v12206_v25 = vpack.c.bf16 %v10256_v8, %v10241_v34  ;;  %v12208_v8 = vld [vmem:[#allocation70_spill] sm:$0xff] }
 0x78d   :  { %v4837_v56 = vpop.f32.mrf.mxu1  ;;  %5028 = vmatmul.mubr.bf16.gmra.mxu1 %v7738_v5  ;;  %v7741_v5 = vld [vmem:[%s11695_s2 + $0x8b0] ss:$24 sps:$4 sm:$0xff]  }
 0x78e   :  { %v10571_v45 = vpop.f32.mrf.mxu0  ;;  %v10573_v62 = vadd.f32 %v4837_v56, %v4293_v55  ;;  %5035 = vmatprep.mubr.bf16.mxu1 %v7743_v38  ;;  %v12238_v55 = vld [vmem:[#allocation186_spill] sm:$0xff] }
 0x78f   :  { %6920 = vmatpush3.bf16.msra.mxu0 %v12195_v6  ;;  %v4839_v42 = vpop.f32.mrf.mxu1 }
 0x790   :  { %6921 = vmatprep.subr.bf16.mxu0 %v12198_v2  ;;  %v4518_v36 = vpop.f32.mrf.mxu0 }
 0x791   :  { %v4840_v32 = vpop.f32.mrf.mxu1  ;;  %v7744_v36 = vld [vmem:[%s11695_s2 + $0x8e0] ss:$24 sps:$4 sm:$0xff]  }
 0x792   :  { %v10586_v22 = vpop.f32.mrf.mxu0  ;;  %v10588_v38 = vadd.f32 %v4840_v32, %v4296_v57  ;;  %v4304_v57 = vadd.f32 %v12205_v12, %v12204_v60  ;;  %v5430_v60 = vld [vmem:[%s11698_s5 + $0x40] sm:$0xff] }
 0x793   :  { %6922 = vmatpush3.bf16.msra.mxu0 %v12199_v1  ;;  %v4842_v61 = vpop.f32.mrf.mxu1  ;;  %v5434_v12 = vld [vmem:[%s11698_s5 + $0x60] sm:$0xff] }
 0x794   :  { %6923 = vmatprep.subr.bf16.mxu0 %v12202_v7  ;;  %v4521_v15 = vpop.f32.mrf.mxu0 }
 0x795   :  { %v4845_v56 = vpop.f32.mrf.mxu1  ;;  %5036 = vmatmul.mubr.bf16.gmra.mxu1 %v7741_v5 }
 0x796   :  { %v10603_v6 = vpop.f32.mrf.mxu0  ;;  %v10605_v42 = vadd.f32 %v4845_v56, %v4301_v26  ;;  %5043 = vmatprep.mubr.bf16.mxu1 %v7746_v48  ;;  %v12209_v48 = vld [vmem:[#allocation168_spill] sm:$0xff]  ;;  %v12212_v56 = vld [vmem:[#allocation69_spill] sm:$0xff] }
 0x797   :  { %6924 = vmatpush3.bf16.msra.mxu0 %v12203_v14  ;;  %v4847_v46 = vpop.f32.mrf.mxu1  ;;  %v4309_v1 = vadd.f32 %v12209_v48, %v12208_v8  ;;  %v12213_v14 = vld [vmem:[#allocation170_spill] sm:$0xff] }
 0x798   :  { %6925 = vmatprep.subr.bf16.mxu0 %v12206_v25  ;;  %v4526_v59 = vpop.f32.mrf.mxu0  ;;  %v4312_v46 = vadd.f32 %v12213_v14, %v12212_v56  ;;  %v7750_v14 = vld [vmem:[%s11695_s2 + $0x940] ss:$24 sps:$4 sm:$0xff]  }
 0x799   :  { %v4848_v2 = vpop.f32.mrf.mxu1  ;;  %v12215_v59 = vpack.c.bf16 %v10004_v10, %v9996_v24  ;;  %v12219_v24 = vld [vmem:[#allocation67_spill] sm:$0xff]  ;;  %v12220_v10 = vld [vmem:[#allocation174_spill] sm:$0xff] }
 0x79a   :  { %v10618_v32 = vpop.f32.mrf.mxu0  ;;  %v10620_v5 = vadd.f32 %v4848_v2, %v4304_v57  ;;  %v4320_v44 = vadd.f32 %v12220_v10, %v12219_v24  ;;  %v5446_v10 = vld [vmem:[%s11698_s5 + $0xc0] sm:$0xff] }
 0x79b   :  { %6926 = vmatpush3.bf16.msra.mxu0 %v12207_v13  ;;  %v4850_v34 = vpop.f32.mrf.mxu1  ;;  %v12217_v13 = vld [vmem:[#allocation172_spill] sm:$0xff] }
 0x79c   :  { %6927 = vmatprep.subr.bf16.mxu0 %v12210_v27  ;;  %v4529_v50 = vpop.f32.mrf.mxu0 }
 0x79d   :  { %v4853_v26 = vpop.f32.mrf.mxu1  ;;  %5044 = vmatmul.mubr.bf16.gmra.mxu1 %v7744_v36  ;;  %v6689_v36 = vcombine.high %v5430_v60, %v5434_v12 }
 0x79e   :  { %v10635_v7 = vpop.f32.mrf.mxu0  ;;  %v10637_v15 = vadd.f32 %v4853_v26, %v4309_v1  ;;  %5051 = vmatprep.mubr.bf16.mxu1 %v7749_v51  ;;  %v12216_v51 = vld [vmem:[#allocation68_spill] sm:$0xff] }
 0x79f   :  { %6928 = vmatpush3.bf16.msra.mxu0 %v12211_v49  ;;  %v4855_v33 = vpop.f32.mrf.mxu1  ;;  %v4317_v34 = vadd.f32 %v12217_v13, %v12216_v51  ;;  %v5438_v49 = vld [vmem:[%s11698_s5 + $0x80] sm:$0xff] }
 0x7a0   :  { %6929 = vmatprep.subr.bf16.mxu0 %v12214_v18  ;;  %v4534_v58 = vpop.f32.mrf.mxu0  ;;  %v5442_v33 = vld [vmem:[%s11698_s5 + $0xa0] sm:$0xff] }
 0x7a1   :  { %v4856_v57 = vpop.f32.mrf.mxu1  ;;  %v7755_v58 = vld [vmem:[%s11695_s2 + $0x974] ss:$24 sps:$4 sm:$0xff]  }
 0x7a2   :  { %v10656_v37 = vpop.f32.mrf.mxu0  ;;  %v10658_v25 = vadd.f32 %v4856_v57, %v4312_v46  ;;  %v6688_v57 = vcombine.low %v5430_v60, %v5434_v12  ;;  %v12225_v60 = vld [vmem:[#allocation65_spill] sm:$0xff]  ;;  %v12226_v12 = vld [vmem:[#allocation178_spill] sm:$0xff] }
 0x7a3   :  { %6930 = vmatpush3.bf16.msra.mxu0 %v12215_v59  ;;  %v4858_v2 = vpop.f32.mrf.mxu1  ;;  %v12223_v59 = vld [vmem:[#allocation176_spill] sm:$0xff] }
 0x7a4   :  { %v4537_v48 = vpop.f32.mrf.mxu0 }
 0x7a5   :  { %v4861_v1 = vpop.f32.mrf.mxu1  ;;  %5052 = vmatmul.mubr.bf16.gmra.mxu1 %v7747_v30 }
 0x7a6   :  { %v10672_v27 = vpop.f32.mrf.mxu0  ;;  %v10674_v50 = vadd.f32 %v4861_v1, %v4317_v34  ;;  %5059 = vmatprep.mubr.bf16.mxu1 %v7752_v20  ;;  %5907 = vmatmul.mubr.bf16.vlgmr.msra.gmra.mxu0 %v6680_v43  ;;  %v6697_v20 = vcombine.high %v5438_v49, %v5442_v33  ;;  %v12222_v43 = vld [vmem:[#allocation66_spill] sm:$0xff] }
 0x7a7   :  { %12218 = vst [vmem:[#allocation20_spill] sm:$0xff] %v10672_v27  ;;  %v4863_v54 = vpop.f32.mrf.mxu1  ;;  %5914 = vmatprep.mubr.bf16.mxu0 %v6689_v36  ;;  %v4325_v2 = vadd.f32 %v12223_v59, %v12222_v43  ;;  %v12262_v27 = vld [vmem:[#allocation194_spill] sm:$0xff] }
 0x7a8   :  { %v4542_v26 = vpop.f32.mrf.mxu0  ;;  %v4328_v54 = vadd.f32 %v12226_v12, %v12225_v60  ;;  %v12229_v60 = vld [vmem:[#allocation64_spill] sm:$0xff] }
 0x7a9   :  { %v4864_v56 = vpop.f32.mrf.mxu1  ;;  %v12230_v12 = vld [vmem:[#allocation180_spill] sm:$0xff] }
 0x7aa   :  { %v10687_v46 = vpop.f32.mrf.mxu0  ;;  %v10689_v18 = vadd.f32 %v4864_v56, %v4320_v44  ;;  %v5450_v44 = vld [vmem:[%s11698_s5 + $0xe0] sm:$0xff]  ;;  %v7753_v56 = vld [vmem:[%s11695_s2 + $0x970] ss:$24 sps:$4 sm:$0xff]  }
 0x7ab   :  { %12221 = vst [vmem:[#allocation21_spill] sm:$0xff] %v10687_v46  ;;  %v4866_v30 = vpop.f32.mrf.mxu1  ;;  %v6705_v43 = vcombine.high %v5446_v10, %v5450_v44 }
 0x7ac   :  { %v4545_v51 = vpop.f32.mrf.mxu0  ;;  %v6696_v30 = vcombine.low %v5438_v49, %v5442_v33 }
 0x7ad   :  { %v4869_v13 = vpop.f32.mrf.mxu1  ;;  %5060 = vmatmul.mubr.bf16.gmra.mxu1 %v7750_v14 }
 0x7ae   :  { %v10698_v34 = vpop.f32.mrf.mxu0  ;;  %v10700_v48 = vadd.f32 %v4869_v13, %v4325_v2  ;;  %5067 = vmatprep.mubr.bf16.mxu1 %v7755_v58  ;;  %5915 = vmatmul.mubr.bf16.gmra.mxu0 %v6688_v57  ;;  %v7758_v57 = vld [vmem:[%s11695_s2 + $0x9a4] ss:$24 sps:$4 sm:$0xff]  }
 0x7af   :  { %12224 = vst [vmem:[#allocation18_spill] sm:$0xff] %v10698_v34  ;;  %v4871_v1 = vpop.f32.mrf.mxu1  ;;  %5922 = vmatprep.mubr.bf16.mxu0 %v6697_v20  ;;  %v12256_v34 = vld [vmem:[#allocation192_spill] sm:$0xff] }
 0x7b0   :  { %v4550_v24 = vpop.f32.mrf.mxu0 }
 0x7b1   :  { %v4872_v26 = vpop.f32.mrf.mxu1  ;;  %v12231_v24 = vld [vmem:[#allocation63_spill] sm:$0xff] }
 0x7b2   :  { %v10713_v14 = vpop.f32.mrf.mxu0  ;;  %v10715_v58 = vadd.f32 %v4872_v26, %v4328_v54  ;;  %v4333_v54 = vadd.f32 %v12230_v12, %v12229_v60  ;;  %v12232_v26 = vld [vmem:[#allocation182_spill] sm:$0xff]  ;;  %v6704_v12 = vcombine.low %v5446_v10, %v5450_v44  ;;  %v4344_v10 = vadd.f32 %v12238_v55, %v12237_v11  ;;  %v7764_v11 = vld [vmem:[%s11695_s2 + $0xa04] ss:$24 sps:$4 sm:$0xff]  }
 0x7b3   :  { %12227 = vst [vmem:[#allocation19_spill] sm:$0xff] %v10713_v14  ;;  %v4874_v20 = vpop.f32.mrf.mxu1  ;;  %v4336_v49 = vadd.f32 %v12232_v26, %v12231_v24  ;;  %v7761_v60 = vld [vmem:[%s11695_s2 + $0x9d4] ss:$24 sps:$4 sm:$0xff]  }
 0x7b4   :  { %v4553_v2 = vpop.f32.mrf.mxu0  ;;  %v5454_v20 = vld [vmem:[%s11698_s5 + $0x100] sm:$0xff] }
 0x7b5   :  { %v4877_v51 = vpop.f32.mrf.mxu1  ;;  %5068 = vmatmul.mubr.bf16.gmra.mxu1 %v7753_v56  ;;  %v5458_v56 = vld [vmem:[%s11698_s5 + $0x120] sm:$0xff] }
 0x7b6   :  { %v10722_v13 = vpop.f32.mrf.mxu0  ;;  %5075 = vmatprep.mubr.bf16.mxu1 %v7758_v57  ;;  %5923 = vmatmul.mubr.bf16.gmra.mxu0 %v6696_v30  ;;  %v7756_v57 = vld [vmem:[%s11695_s2 + $0x9a0] ss:$24 sps:$4 sm:$0xff]   ;;  %v10737_v30 = vadd.f32 %v4877_v51, %v4333_v54  ;;  %v6713_v26 = vcombine.high %v5454_v20, %v5458_v56  ;;  %v12235_v54 = vld [vmem:[#allocation62_spill] sm:$0xff]  ;;  %v6712_v55 = vcombine.low %v5454_v20, %v5458_v56 }
 0x7b7   :  { %12228 = vst [vmem:[#allocation16_spill] sm:$0xff] %v10722_v13  ;;  %v4879_v1 = vpop.f32.mrf.mxu1  ;;  %5930 = vmatprep.mubr.bf16.mxu0 %v6705_v43  ;;  %v12250_v13 = vld [vmem:[#allocation190_spill] sm:$0xff] }
 0x7b8   :  { %v4558_v33 = vpop.f32.mrf.mxu0 }
 0x7b9   :  { %v4880_v2 = vpop.f32.mrf.mxu1 }
 0x7ba   :  { %v10739_v43 = vpop.f32.mrf.mxu0  ;;  %v10741_v1 = vadd.f32 %v4880_v2, %v4336_v49  ;;  %v12236_v49 = vld [vmem:[#allocation184_spill] sm:$0xff] }
 0x7bb   :  { %12233 = vst [vmem:[#allocation17_spill] sm:$0xff] %v10739_v43  ;;  %v4882_v24 = vpop.f32.mrf.mxu1  ;;  %v4341_v2 = vadd.f32 %v12236_v49, %v12235_v54 }
 0x7bc   :  { %v4561_v36 = vpop.f32.mrf.mxu0  ;;  %v5462_v24 = vld [vmem:[%s11698_s5 + $0x140] sm:$0xff] }
 0x7bd   :  { %v4885_v59 = vpop.f32.mrf.mxu1  ;;  %5076 = vmatmul.mubr.bf16.gmra.mxu1 %v7756_v57  ;;  %v5466_v36 = vld [vmem:[%s11698_s5 + $0x160] sm:$0xff] }
 0x7be   :  { %v10748_v16 = vpop.f32.mrf.mxu0  ;;  %5083 = vmatprep.mubr.bf16.mxu1 %v7761_v60  ;;  %5931 = vmatmul.mubr.bf16.gmra.mxu0 %v6704_v12  ;;  %v7759_v60 = vld [vmem:[%s11695_s2 + $0x9d0] ss:$24 sps:$4 sm:$0xff]   ;;  %v10763_v12 = vadd.f32 %v4885_v59, %v4341_v2  ;;  %v6721_v49 = vcombine.high %v5462_v24, %v5466_v36  ;;  %v12241_v2 = vld [vmem:[#allocation60_spill] sm:$0xff] }
 0x7bf   :  { %12234 = vst [vmem:[#allocation14_spill] sm:$0xff] %v10748_v16  ;;  %v4887_v51 = vpop.f32.mrf.mxu1  ;;  %5938 = vmatprep.mubr.bf16.mxu0 %v6713_v26  ;;  %v12244_v16 = vld [vmem:[#allocation188_spill] sm:$0xff] }
 0x7c0   :  { %v4566_v44 = vpop.f32.mrf.mxu0 }
 0x7c1   :  { %v4888_v57 = vpop.f32.mrf.mxu1 }
 0x7c2   :  { %v10765_v26 = vpop.f32.mrf.mxu0  ;;  %v10767_v51 = vadd.f32 %v4888_v57, %v4344_v10  ;;  %v12242_v10 = vld [vmem:[#allocation187_spill] sm:$0xff] }
 0x7c3   :  { %12239 = vst [vmem:[#allocation15_spill] sm:$0xff] %v10765_v26  ;;  %v4890_v54 = vpop.f32.mrf.mxu1  ;;  %v4349_v57 = vadd.f32 %v12242_v10, %v12241_v2  ;;  %v12243_v26 = vld [vmem:[#allocation59_spill] sm:$0xff] }
 0x7c4   :  { %v4569_v33 = vpop.f32.mrf.mxu0  ;;  %v4352_v20 = vadd.f32 %v12244_v16, %v12243_v26  ;;  %v5470_v54 = vld [vmem:[%s11698_s5 + $0x180] sm:$0xff]  ;;  %v7767_v16 = vld [vmem:[%s11695_s2 + $0xa34] ss:$24 sps:$4 sm:$0xff]   ;;  %v6720_v26 = vcombine.low %v5462_v24, %v5466_v36 }
 0x7c5   :  { %v4893_v61 = vpop.f32.mrf.mxu1  ;;  %5084 = vmatmul.mubr.bf16.gmra.mxu1 %v7759_v60  ;;  %v5474_v33 = vld [vmem:[%s11698_s5 + $0x1a0] sm:$0xff] }
 0x7c6   :  { %v10774_v8 = vpop.f32.mrf.mxu0  ;;  %5091 = vmatprep.mubr.bf16.mxu1 %v7764_v11  ;;  %5939 = vmatmul.mubr.bf16.gmra.mxu0 %v6712_v55  ;;  %v7762_v11 = vld [vmem:[%s11695_s2 + $0xa00] ss:$24 sps:$4 sm:$0xff]   ;;  %v10789_v55 = vadd.f32 %v4893_v61, %v4349_v57  ;;  %v6729_v10 = vcombine.high %v5470_v54, %v5474_v33  ;;  %v12247_v57 = vld [vmem:[#allocation58_spill] sm:$0xff] }
 0x7c7   :  { %12240 = vst [vmem:[#allocation12_spill] sm:$0xff] %v10774_v8  ;;  %v4895_v59 = vpop.f32.mrf.mxu1  ;;  %5946 = vmatprep.mubr.bf16.mxu0 %v6721_v49 }
 0x7c8   :  { %v4574_v56 = vpop.f32.mrf.mxu0 }
 0x7c9   :  { %v4896_v60 = vpop.f32.mrf.mxu1 }
 0x7ca   :  { %v10791_v49 = vpop.f32.mrf.mxu0  ;;  %v10793_v59 = vadd.f32 %v4896_v60, %v4352_v20  ;;  %v12248_v20 = vld [vmem:[#allocation189_spill] sm:$0xff] }
 0x7cb   :  { %12245 = vst [vmem:[#allocation13_spill] sm:$0xff] %v10791_v49  ;;  %v4898_v2 = vpop.f32.mrf.mxu1  ;;  %v4357_v60 = vadd.f32 %v12248_v20, %v12247_v57  ;;  %v12249_v49 = vld [vmem:[#allocation57_spill] sm:$0xff] }
 0x7cc   :  { %v4577_v44 = vpop.f32.mrf.mxu0  ;;  %v4360_v24 = vadd.f32 %v12250_v13, %v12249_v49  ;;  %v5478_v2 = vld [vmem:[%s11698_s5 + $0x1c0] sm:$0xff]  ;;  %v6728_v49 = vcombine.low %v5470_v54, %v5474_v33 }
 0x7cd   :  { %v4901_v8 = vpop.f32.mrf.mxu1  ;;  %5092 = vmatmul.mubr.bf16.gmra.mxu1 %v7762_v11  ;;  %v5482_v44 = vld [vmem:[%s11698_s5 + $0x1e0] sm:$0xff] }
 0x7ce   :  { %v10800_v43 = vpop.f32.mrf.mxu0  ;;  %5099 = vmatprep.mubr.bf16.mxu1 %v7767_v16  ;;  %5947 = vmatmul.mubr.bf16.gmra.mxu0 %v6720_v26  ;;  %v7765_v16 = vld [vmem:[%s11695_s2 + $0xa30] ss:$24 sps:$4 sm:$0xff]   ;;  %v10815_v26 = vadd.f32 %v4901_v8, %v4357_v60  ;;  %v7770_v13 = vld [vmem:[%s11695_s2 + $0xa64] ss:$24 sps:$4 sm:$0xff]   ;;  %v6737_v20 = vcombine.high %v5478_v2, %v5482_v44 }
 0x7cf   :  { %12246 = vst [vmem:[#allocation10_spill] sm:$0xff] %v10800_v43  ;;  %v4903_v61 = vpop.f32.mrf.mxu1  ;;  %5954 = vmatprep.mubr.bf16.mxu0 %v6729_v10  ;;  %v12253_v60 = vld [vmem:[#allocation55_spill] sm:$0xff] }
 0x7d0   :  { %v4582_v36 = vpop.f32.mrf.mxu0 }
 0x7d1   :  { %v4904_v11 = vpop.f32.mrf.mxu1 }
 0x7d2   :  { %v10817_v10 = vpop.f32.mrf.mxu0  ;;  %v10819_v61 = vadd.f32 %v4904_v11, %v4360_v24  ;;  %v12254_v24 = vld [vmem:[#allocation191_spill] sm:$0xff] }
 0x7d3   :  { %12251 = vst [vmem:[#allocation11_spill] sm:$0xff] %v10817_v10  ;;  %v4906_v57 = vpop.f32.mrf.mxu1  ;;  %v4365_v11 = vadd.f32 %v12254_v24, %v12253_v60  ;;  %v12255_v10 = vld [vmem:[#allocation54_spill] sm:$0xff] }
 0x7d4   :  { %v4585_v56 = vpop.f32.mrf.mxu0  ;;  %v4368_v54 = vadd.f32 %v12256_v34, %v12255_v10  ;;  %v10835_v57 = vld [vmem:[%s11698_s5 + $0x8] sm:$0xff] }
 0x7d5   :  { %v4909_v43 = vpop.f32.mrf.mxu1  ;;  %5100 = vmatmul.mubr.bf16.gmra.mxu1 %v7765_v16  ;;  %v10840_v56 = vld [vmem:[%s11698_s5 + $0x28] sm:$0xff] }
 0x7d6   :  { %v10826_v14 = vpop.f32.mrf.mxu0  ;;  %5107 = vmatprep.mubr.bf16.mxu1 %v7770_v13  ;;  %5955 = vmatmul.mubr.bf16.gmra.mxu0 %v6728_v49  ;;  %v7768_v13 = vld [vmem:[%s11695_s2 + $0xa60] ss:$24 sps:$4 sm:$0xff]   ;;  %v4910_v49 = vadd.f32 %v4909_v43, %v4365_v11  ;;  %v7773_v10 = vld [vmem:[%s11695_s2 + $0xa94] ss:$24 sps:$4 sm:$0xff]   ;;  %v6683_v24 = vcombine.high %v10835_v57, %v10840_v56 }
 0x7d7   :  { %12252 = vst [vmem:[#allocation8_spill] sm:$0xff] %v10826_v14  ;;  %v4911_v8 = vpop.f32.mrf.mxu1  ;;  %5962 = vmatprep.mubr.bf16.mxu0 %v6737_v20  ;;  %v12259_v11 = vld [vmem:[#allocation52_spill] sm:$0xff] }
 0x7d8   :  { %v4590_v33 = vpop.f32.mrf.mxu0  ;;  %v6736_v8 = vcombine.low %v5478_v2, %v5482_v44 }
 0x7d9   :  { %v4912_v16 = vpop.f32.mrf.mxu1 }
 0x7da   :  { %v10845_v20 = vpop.f32.mrf.mxu0  ;;  %v4913_v34 = vadd.f32 %v4912_v16, %v4368_v54  ;;  %v12260_v54 = vld [vmem:[#allocation193_spill] sm:$0xff] }
 0x7db   :  { %12257 = vst [vmem:[#allocation9_spill] sm:$0xff] %v10845_v20  ;;  %v4914_v60 = vpop.f32.mrf.mxu1  ;;  %v4373_v16 = vadd.f32 %v12260_v54, %v12259_v11  ;;  %v12261_v20 = vld [vmem:[#allocation51_spill] sm:$0xff] }
 0x7dc   :  { %v5516_v33 = vpack.c.bf16 %v4913_v34, %v4910_v49  ;;  %v4593_v36 = vpop.f32.mrf.mxu0  ;;  %v4376_v2 = vadd.f32 %v12262_v27, %v12261_v20 }
 0x7dd   :  { %v4917_v14 = vpop.f32.mrf.mxu1  ;;  %5108 = vmatmul.mubr.bf16.gmra.mxu1 %v7768_v13  ;;  %v7771_v36 = vld [vmem:[%s11695_s2 + $0xa90] ss:$24 sps:$4 sm:$0xff]  }
 0x7de   :  { %v10852_v46 = vpop.f32.mrf.mxu0  ;;  %5115 = vmatprep.mubr.bf16.mxu1 %v7773_v10  ;;  %5963 = vmatmul.mubr.bf16.gmra.mxu0 %v6736_v8  ;;  %v4918_v49 = vadd.f32 %v4917_v14, %v4373_v16  ;;  %v7776_v10 = vld [vmem:[%s11695_s2 + $0xac4] ss:$24 sps:$4 sm:$0xff]   ;;  %v12266_v16 = vpack.c.bf16 %v10658_v25, %v10637_v15  ;;  %v12269_v25 = vpack.c.bf16 %v10620_v5, %v10605_v42 }
 0x7df   :  { %12258 = vst [vmem:[#allocation6_spill] sm:$0xff] %v10852_v46  ;;  %v4919_v43 = vpop.f32.mrf.mxu1  ;;  %6003 = vmatprep.mubr.bf16.mxu0 %v6683_v24  ;;  %v12264_v24 = vld [vmem:[#allocation49_spill] sm:$0xff]  ;;  %v12273_v5 = vpack.c.bf16 %v10588_v38, %v10573_v62 }
 0x7e0   :  { %v4598_v44 = vpop.f32.mrf.mxu0  ;;  %v12265_v43 = vld [vmem:[#allocation195_spill] sm:$0xff]  ;;  %v7782_v62 = vld [vmem:[%s11695_s2 + $0xb24] ss:$24 sps:$4 sm:$0xff]  }
 0x7e1   :  { %v4920_v60 = vpop.f32.mrf.mxu1  ;;  %v4381_v11 = vadd.f32 %v12265_v43, %v12264_v24 }
 0x7e2   :  { %v10861_v13 = vpop.f32.mrf.mxu0  ;;  %v4921_v34 = vadd.f32 %v4920_v60, %v4376_v2  ;;  %v12267_v2 = vld [vmem:[#allocation48_spill] sm:$0xff] }
 0x7e3   :  { %12263 = vst [vmem:[#allocation7_spill] sm:$0xff] %v10861_v13  ;;  %v4922_v8 = vpop.f32.mrf.mxu1  ;;  %v12268_v60 = vld [vmem:[#allocation196_spill] sm:$0xff] }
 0x7e4   :  { %v5517_v54 = vpack.c.bf16 %v4921_v34, %v4918_v49  ;;  %v4601_v27 = vpop.f32.mrf.mxu0  ;;  %v4384_v8 = vadd.f32 %v12268_v60, %v12267_v2  ;;  %v12274_v2 = vld [vmem:[#allocation45_spill] sm:$0xff]  ;;  %v12275_v60 = vld [vmem:[#allocation198_spill] sm:$0xff] }
 0x7e5   :  { %v4925_v20 = vpop.f32.mrf.mxu1  ;;  %5116 = vmatmul.mubr.bf16.gmra.mxu1 %v7771_v36  ;;  %v7774_v36 = vld [vmem:[%s11695_s2 + $0xac0] ss:$24 sps:$4 sm:$0xff]   ;;  %v12272_v27 = vpack.c.bf16 %v10819_v61, %v10815_v26  ;;  %v12276_v26 = vpack.c.bf16 %v10793_v59, %v10789_v55 }
 0x7e6   :  { %v10868_v44 = vpop.f32.mrf.mxu0  ;;  %v10870_v46 = vadd.f32 %v4925_v20, %v4381_v11  ;;  %6979 = vmatprep.subr.bf16.mxu0 %v5517_v54  ;;  %5123 = vmatprep.mubr.bf16.mxu1 %v7776_v10  ;;  %v7779_v10 = vld [vmem:[%s11695_s2 + $0xaf4] ss:$24 sps:$4 sm:$0xff]  }
 0x7e7   :  { %v4927_v14 = vpop.f32.mrf.mxu1  ;;  %6980 = vmatpush3.bf16.msra.mxu0 %v12266_v16  ;;  %v12279_v55 = vld [vmem:[#allocation43_spill] sm:$0xff] }
 0x7e8   :  { %v4606_v13 = vpop.f32.mrf.mxu0  ;;  %6981 = vmatprep.subr.bf16.mxu0 %v5516_v33  ;;  %v12271_v33 = vld [vmem:[#allocation197_spill] sm:$0xff]  ;;  %v12280_v59 = vld [vmem:[#allocation199_spill] sm:$0xff] }
 0x7e9   :  { %v4928_v49 = vpop.f32.mrf.mxu1  ;;  %v12270_v13 = vld [vmem:[#allocation46_spill] sm:$0xff] }
 0x7ea   :  { %v10880_v34 = vpop.f32.mrf.mxu0  ;;  %v10882_v24 = vadd.f32 %v4928_v49, %v4384_v8  ;;  %v4389_v43 = vadd.f32 %v12271_v33, %v12270_v13  ;;  %v4392_v8 = vadd.f32 %v12275_v60, %v12274_v2  ;;  %v4397_v13 = vadd.f32 %v12280_v59, %v12279_v55  ;;  %v12285_v2 = vld [vmem:[#allocation200_spill] sm:$0xff]  ;;  %v12314_v33 = vld [vmem:[#allocation119_spill] sm:$0xff] }
 0x7eb   :  { %v4930_v15 = vpop.f32.mrf.mxu1  ;;  %6982 = vmatpush3.bf16.msra.mxu0 %v12269_v25  ;;  %v12278_v25 = vpack.c.bf16 %v10556_v4, %v10541_v0  ;;  %v12283_v4 = vpack.c.bf16 %v10521_v31, %v10497_v47  ;;  %v7785_v47 = vld [vmem:[%s11695_s2 + $0xb54] ss:$24 sps:$4 sm:$0xff]   ;;  %v12291_v55 = vpack.c.bf16 %v10715_v58, %v10700_v48  ;;  %v12296_v48 = vpack.c.bf16 %v10689_v18, %v10674_v50  ;;  %v7788_v18 = vld [vmem:[%s11695_s2 + $0xb84] ss:$24 sps:$4 sm:$0xff]  }
 0x7ec   :  { %v4609_v54 = vpop.f32.mrf.mxu0  ;;  %6983 = vmatprep.subr.bf16.mxu0 %v12272_v27  ;;  %v5431_v58 = vld [vmem:[%s11698_s5 + $0x48] sm:$0xff]  ;;  %v6682_v50 = vcombine.low %v10835_v57, %v10840_v56  ;;  %v11001_v57 = vld [vmem:[%s11698_s5 + $0x10] sm:$0xff] }
 0x7ed   :  { %v4933_v20 = vpop.f32.mrf.mxu1  ;;  %5124 = vmatmul.mubr.bf16.gmra.mxu1 %v7774_v36  ;;  %v7777_v36 = vld [vmem:[%s11695_s2 + $0xaf0] ss:$24 sps:$4 sm:$0xff]   ;;  %v12281_v54 = vpack.c.bf16 %v10767_v51, %v10763_v12  ;;  %v12286_v12 = vpack.c.bf16 %v10741_v1, %v10737_v30  ;;  %v12289_v30 = vld [vmem:[#allocation40_spill] sm:$0xff] }
 0x7ee   :  { %v10897_v14 = vpop.f32.mrf.mxu0  ;;  %v10899_v16 = vadd.f32 %v4933_v20, %v4389_v43  ;;  %5131 = vmatprep.mubr.bf16.mxu1 %v7779_v10  ;;  %v12290_v1 = vld [vmem:[#allocation201_spill] sm:$0xff]  ;;  %v11006_v56 = vld [vmem:[%s11698_s5 + $0x30] sm:$0xff] }
 0x7ef   :  { %v4935_v42 = vpop.f32.mrf.mxu1  ;;  %6984 = vmatpush3.bf16.msra.mxu0 %v12273_v5  ;;  %v12284_v5 = vld [vmem:[#allocation42_spill] sm:$0xff] }
 0x7f0   :  { %v4614_v49 = vpop.f32.mrf.mxu0  ;;  %6985 = vmatprep.subr.bf16.mxu0 %v12276_v26  ;;  %v4400_v60 = vadd.f32 %v12285_v2, %v12284_v5  ;;  %v5435_v5 = vld [vmem:[%s11698_s5 + $0x68] sm:$0xff] }
 0x7f1   :  { %v4936_v61 = vpop.f32.mrf.mxu1  ;;  %v7780_v49 = vld [vmem:[%s11695_s2 + $0xb20] ss:$24 sps:$4 sm:$0xff]  }
 0x7f2   :  { %v10912_v15 = vpop.f32.mrf.mxu0  ;;  %v10914_v10 = vadd.f32 %v4936_v61, %v4392_v8 }
 0x7f3   :  { %12277 = vst [vmem:[#allocation92_spill] sm:$0xff] %v10912_v15  ;;  %v4938_v38 = vpop.f32.mrf.mxu1  ;;  %6986 = vmatpush3.bf16.msra.mxu0 %v12278_v25 }
 0x7f4   :  { %v4617_v43 = vpop.f32.mrf.mxu0  ;;  %6987 = vmatprep.subr.bf16.mxu0 %v12281_v54  ;;  %v12294_v54 = vld [vmem:[#allocation39_spill] sm:$0xff] }
 0x7f5   :  { %v4941_v27 = vpop.f32.mrf.mxu1  ;;  %5132 = vmatmul.mubr.bf16.gmra.mxu1 %v7777_v36  ;;  %v12288_v36 = vpack.c.bf16 %v10482_v28, %v10469_v40  ;;  %v12293_v28 = vpack.c.bf16 %v10454_v29, %v10441_v53  ;;  %v7783_v53 = vld [vmem:[%s11695_s2 + $0xb50] ss:$24 sps:$4 sm:$0xff]  }
 0x7f6   :  { %v10929_v20 = vpop.f32.mrf.mxu0  ;;  %v10931_v42 = vadd.f32 %v4941_v27, %v4397_v13  ;;  %5139 = vmatprep.mubr.bf16.mxu1 %v7782_v62  ;;  %v4405_v62 = vadd.f32 %v12290_v1, %v12289_v30  ;;  %v12295_v27 = vld [vmem:[#allocation202_spill] sm:$0xff]  ;;  %v12300_v1 = vld [vmem:[#allocation109_spill] sm:$0xff] }
 0x7f7   :  { %12282 = vst [vmem:[#allocation108_spill] sm:$0xff] %v10929_v20  ;;  %v4943_v0 = vpop.f32.mrf.mxu1  ;;  %6988 = vmatpush3.bf16.msra.mxu0 %v12283_v4 }
 0x7f8   :  { %v4622_v8 = vpop.f32.mrf.mxu0  ;;  %6989 = vmatprep.subr.bf16.mxu0 %v12286_v12  ;;  %v4408_v0 = vadd.f32 %v12295_v27, %v12294_v54  ;;  %v12298_v12 = vpack.c.bf16 %v10426_v9, %v10413_v21  ;;  %v6690_v54 = vcombine.low %v5431_v58, %v5435_v5 }
 0x7f9   :  { %v4944_v51 = vpop.f32.mrf.mxu1 }
 0x7fa   :  { %v10944_v26 = vpop.f32.mrf.mxu0  ;;  %v10946_v61 = vadd.f32 %v4944_v51, %v4400_v60  ;;  %v6691_v51 = vcombine.high %v5431_v58, %v5435_v5  ;;  %v12302_v58 = vld [vmem:[#allocation111_spill] sm:$0xff] }
 0x7fb   :  { %12287 = vst [vmem:[#allocation38_spill] sm:$0xff] %v10944_v26  ;;  %v4946_v31 = vpop.f32.mrf.mxu1  ;;  %6990 = vmatpush3.bf16.msra.mxu0 %v12288_v36  ;;  %v4424_v5 = vadd.f32 %v10222_v41, %v12302_v58  ;;  %v7794_v41 = vld [vmem:[%s11695_s2 + $0xbe4] ss:$24 sps:$4 sm:$0xff]  }
 0x7fc   :  { %v4625_v25 = vpop.f32.mrf.mxu0  ;;  %6991 = vmatprep.subr.bf16.mxu0 %v12291_v55  ;;  %v5443_v55 = vld [vmem:[%s11698_s5 + $0xa8] sm:$0xff] }
 0x7fd   :  { %v4949_v59 = vpop.f32.mrf.mxu1  ;;  %5140 = vmatmul.mubr.bf16.gmra.mxu1 %v7780_v49  ;;  %v12299_v49 = vld [vmem:[#allocation36_spill] sm:$0xff]  ;;  %v5439_v25 = vld [vmem:[%s11698_s5 + $0x88] sm:$0xff] }
 0x7fe   :  { %v10961_v13 = vpop.f32.mrf.mxu0  ;;  %v10963_v43 = vadd.f32 %v4949_v59, %v4405_v62  ;;  %5147 = vmatprep.mubr.bf16.mxu1 %v7785_v47  ;;  %v4413_v47 = vadd.f32 %v10187_v52, %v12299_v49  ;;  %v4416_v62 = vadd.f32 %v10196_v19, %v12300_v1  ;;  %v7791_v19 = vld [vmem:[%s11695_s2 + $0xbb4] ss:$24 sps:$4 sm:$0xff]   ;;  %v12326_v31 = vld [vmem:[#allocation125_spill] sm:$0xff] }
 0x7ff   :  { %12292 = vst [vmem:[#allocation142_spill] sm:$0xff] %v10961_v13  ;;  %v4951_v40 = vpop.f32.mrf.mxu1  ;;  %6992 = vmatpush3.bf16.msra.mxu0 %v12293_v28  ;;  %v12331_v13 = vld [vmem:[#allocation27_spill] sm:$0xff] }
 0x800   :  { %v4630_v4 = vpop.f32.mrf.mxu0  ;;  %6993 = vmatprep.subr.bf16.mxu0 %v12296_v48  ;;  %v7786_v40 = vld [vmem:[%s11695_s2 + $0xb80] ss:$24 sps:$4 sm:$0xff]  }
 0x801   :  { %v4952_v2 = vpop.f32.mrf.mxu1  ;;  %v12301_v4 = vld [vmem:[#allocation110_spill] sm:$0xff] }
 0x802   :  { %v10982_v29 = vpop.f32.mrf.mxu0  ;;  %v10984_v60 = vadd.f32 %v4952_v2, %v4408_v0  ;;  %v6699_v0 = vcombine.high %v5439_v25, %v5443_v55  ;;  %v4421_v48 = vadd.f32 %v10213_v63, %v12301_v4  ;;  %v5451_v63 = vld [vmem:[%s11698_s5 + $0xe8] sm:$0xff]  ;;  %v7792_v4 = vld [vmem:[%s11695_s2 + $0xbe0] ss:$24 sps:$4 sm:$0xff]  }
 0x803   :  { %12297 = vst [vmem:[#allocation91_spill] sm:$0xff] %v10982_v29  ;;  %v4954_v8 = vpop.f32.mrf.mxu1  ;;  %6994 = vmatpush3.bf16.msra.mxu0 %v12298_v12 }
 0x804   :  { %v4633_v36 = vpop.f32.mrf.mxu0  ;;  %v5447_v8 = vld [vmem:[%s11698_s5 + $0xc8] sm:$0xff] }
 0x805   :  { %v4957_v21 = vpop.f32.mrf.mxu1  ;;  %5148 = vmatmul.mubr.bf16.gmra.mxu1 %v7783_v53 }
 0x806   :  { %v11008_v9 = vadd.f32 %v4957_v21, %v4413_v47  ;;  %6004 = vmatmul.mubr.bf16.vlgmr.msra.gmra.mxu0 %v6682_v50  ;;  %5155 = vmatprep.mubr.bf16.mxu1 %v7788_v18  ;;  %v6698_v47 = vcombine.low %v5439_v25, %v5443_v55  ;;  %v6707_v21 = vcombine.high %v5447_v8, %v5451_v63  ;;  %v12304_v25 = vld [vmem:[#allocation113_spill] sm:$0xff]  ;;  %v12305_v55 = vld [vmem:[#allocation203_spill] sm:$0xff] }
 0x807   :  { %v4959_v30 = vpop.f32.mrf.mxu1  ;;  %6011 = vmatprep.mubr.bf16.mxu0 %v6691_v51  ;;  %v7789_v51 = vld [vmem:[%s11695_s2 + $0xbb0] ss:$24 sps:$4 sm:$0xff]  }
 0x808   :  { %v12303_v30 = vld [vmem:[#allocation112_spill] sm:$0xff] }
 0x809   :  { %v4960_v59 = vpop.f32.mrf.mxu1  ;;  %v4429_v1 = vadd.f32 %v10239_v17, %v12303_v30  ;;  %v5459_v17 = vld [vmem:[%s11698_s5 + $0x128] sm:$0xff]  ;;  %v12307_v30 = vld [vmem:[#allocation115_spill] sm:$0xff] }
 0x80a   :  { %v11023_v28 = vadd.f32 %v4960_v59, %v4416_v62 }
 0x80b   :  { %v4962_v27 = vpop.f32.mrf.mxu1 }
 0x80c   :  { %v5455_v27 = vld [vmem:[%s11698_s5 + $0x108] sm:$0xff] }
 0x80d   :  { %v4965_v53 = vpop.f32.mrf.mxu1  ;;  %5156 = vmatmul.mubr.bf16.gmra.mxu1 %v7786_v40  ;;  %v6715_v58 = vcombine.high %v5455_v27, %v5459_v17 }
 0x80e   :  { %v11032_v50 = vadd.f32 %v4965_v53, %v4421_v48  ;;  %6012 = vmatmul.mubr.bf16.gmra.mxu0 %v6690_v54  ;;  %5163 = vmatprep.mubr.bf16.mxu1 %v7791_v19  ;;  %v4432_v19 = vadd.f32 %v12305_v55, %v12304_v25  ;;  %v6706_v53 = vcombine.low %v5447_v8, %v5451_v63  ;;  %v5463_v8 = vld [vmem:[%s11698_s5 + $0x148] sm:$0xff] }
 0x80f   :  { %v4967_v18 = vpop.f32.mrf.mxu1  ;;  %6019 = vmatprep.mubr.bf16.mxu0 %v6699_v0 }
 0x811   :  { %v4968_v12 = vpop.f32.mrf.mxu1 }
 0x812   :  { %v11045_v49 = vadd.f32 %v4968_v12, %v4424_v5  ;;  %v12306_v5 = vld [vmem:[#allocation114_spill] sm:$0xff] }
 0x813   :  { %v4970_v36 = vpop.f32.mrf.mxu1  ;;  %v4437_v12 = vadd.f32 %v10269_v35, %v12306_v5  ;;  %v5467_v35 = vld [vmem:[%s11698_s5 + $0x168] sm:$0xff] }
 0x814   :  { %v6842_v36 = vpop.f32.mrf.mxu0 }
 0x815   :  { %v4973_v59 = vpop.f32.mrf.mxu1  ;;  %5164 = vmatmul.mubr.bf16.gmra.mxu1 %v7789_v51 }
 0x816   :  { %v11054_v40 = vadd.f32 %v4973_v59, %v4429_v1  ;;  %6020 = vmatmul.mubr.bf16.gmra.mxu0 %v6698_v47  ;;  %5171 = vmatprep.mubr.bf16.mxu1 %v7794_v41  ;;  %v4440_v1 = vadd.f32 %v10280_v39, %v12307_v30  ;;  %v6843_v25 = vpop.f32.mrf.mxu0  ;;  %v12311_v30 = vld [vmem:[#allocation37_spill] sm:$0xff]  ;;  %v12329_v39 = vld [vmem:[#allocation26_spill] sm:$0xff] }
 0x817   :  { %v4975_v54 = vpop.f32.mrf.mxu1  ;;  %6027 = vmatprep.mubr.bf16.mxu0 %v6707_v21 }
 0x818   :  { %v6714_v54 = vcombine.low %v5455_v27, %v5459_v17  ;;  %v5471_v17 = vld [vmem:[%s11698_s5 + $0x188] sm:$0xff] }
 0x819   :  { %v4976_v0 = vpop.f32.mrf.mxu1 }
 0x81a   :  { %v11067_v48 = vadd.f32 %v4976_v0, %v4432_v19  ;;  %v6723_v19 = vcombine.high %v5463_v8, %v5467_v35  ;;  %v12308_v0 = vld [vmem:[#allocation116_spill] sm:$0xff] }
 0x81b   :  { %v4978_v18 = vpop.f32.mrf.mxu1 }
 0x81d   :  { %v4981_v47 = vpop.f32.mrf.mxu1  ;;  %5172 = vmatmul.mubr.bf16.gmra.mxu1 %v7792_v4  ;;  %v12309_v4 = vld [vmem:[#allocation204_spill] sm:$0xff] }
 0x81e   :  { %v11073_v41 = vadd.f32 %v4981_v47, %v4437_v12  ;;  %6028 = vmatmul.mubr.bf16.gmra.mxu0 %v6706_v53  ;;  %v4445_v53 = vadd.f32 %v12309_v4, %v12308_v0  ;;  %v6844_v47 = vadd.f32 %v6843_v25, %v6842_v36  ;;  %v12312_v25 = vld [vmem:[#allocation118_spill] sm:$0xff] }
 0x81f   :  { %v4983_v21 = vpop.f32.mrf.mxu1  ;;  %6035 = vmatprep.mubr.bf16.mxu0 %v6715_v58 }
 0x820   :  { %v12310_v21 = vld [vmem:[#allocation117_spill] sm:$0xff] }
 0x821   :  { %v4984_v63 = vpop.f32.mrf.mxu1  ;;  %v4448_v27 = vadd.f32 %v12311_v30, %v12310_v21 }
 0x822   :  { %v11083_v59 = vadd.f32 %v4984_v63, %v4440_v1  ;;  %v5475_v1 = vld [vmem:[%s11698_s5 + $0x1a8] sm:$0xff] }
 0x823   :  { %v4986_v55 = vpop.f32.mrf.mxu1 }
 0x825   :  { %v4989_v18 = vpop.f32.mrf.mxu1 }
 0x826   :  { %v11089_v58 = vadd.f32 %v4989_v18, %v4445_v53  ;;  %6036 = vmatmul.mubr.bf16.gmra.mxu0 %v6714_v54  ;;  %v6877_v5 = vpop.f32.mrf.mxu0  ;;  %v6722_v54 = vcombine.low %v5463_v8, %v5467_v35  ;;  %v12313_v18 = vld [vmem:[#allocation34_spill] sm:$0xff] }
 0x827   :  { %v4991_v12 = vpop.f32.mrf.mxu1  ;;  %6043 = vmatprep.mubr.bf16.mxu0 %v6723_v19  ;;  %v6731_v19 = vcombine.high %v5471_v17, %v5475_v1  ;;  %v5479_v8 = vld [vmem:[%s11698_s5 + $0x1c8] sm:$0xff] }
 0x828   :  { %v6878_v63 = vpop.f32.mrf.mxu0  ;;  %v4453_v12 = vadd.f32 %v12313_v18, %v12312_v25  ;;  %v5483_v35 = vld [vmem:[%s11698_s5 + $0x1e8] sm:$0xff]  ;;  %v12317_v25 = vld [vmem:[#allocation32_spill] sm:$0xff] }
 0x829   :  { %v4992_v55 = vpop.f32.mrf.mxu1  ;;  %v6879_v0 = vadd.f32 %v6878_v63, %v6877_v5  ;;  %v12315_v5 = vld [vmem:[#allocation35_spill] sm:$0xff] }
 0x82a   :  { %v11099_v4 = vadd.f32 %v4992_v55, %v4448_v27  ;;  %v4456_v27 = vadd.f32 %v12315_v5, %v12314_v33  ;;  %v6730_v55 = vcombine.low %v5471_v17, %v5475_v1  ;;  %v6738_v17 = vcombine.low %v5479_v8, %v5483_v35 }
 0x82b   :  { %v4994_v53 = vpop.f32.mrf.mxu1  ;;  %v5349_v36 = vadd.f32 %v6879_v0, %v6844_v47 }
 0x82c   :  { %v6739_v53 = vcombine.high %v5479_v8, %v5483_v35 }
 0x82d   :  { %v4997_v30 = vpop.f32.mrf.mxu1 }
 0x82e   :  { %v11105_v52 = vadd.f32 %v4997_v30, %v4453_v12  ;;  %6044 = vmatmul.mubr.bf16.gmra.mxu0 %v6722_v54  ;;  %v12318_v12 = vld [vmem:[#allocation121_spill] sm:$0xff] }
 0x82f   :  { %v4999_v11 = vpop.f32.mrf.mxu1  ;;  %6051 = vmatprep.mubr.bf16.mxu0 %v6731_v19  ;;  %v12316_v19 = vld [vmem:[#allocation120_spill] sm:$0xff]  ;;  %v12319_v30 = vld [vmem:[#allocation33_spill] sm:$0xff] }
 0x830   :  { %v4461_v18 = vadd.f32 %v12317_v25, %v12316_v19  ;;  %v4464_v5 = vadd.f32 %v12319_v30, %v12318_v12  ;;  %v12321_v19 = vld [vmem:[#allocation30_spill] sm:$0xff]  ;;  %v12322_v12 = vld [vmem:[#allocation123_spill] sm:$0xff] }
 0x831   :  { %v5000_v47 = vpop.f32.mrf.mxu1 }
 0x832   :  { %v11115_v63 = vadd.f32 %v5000_v47, %v4456_v27  ;;  %v6685_v47 = vcombine.high %v11001_v57, %v11006_v56 }
 0x833   :  { %v5002_v0 = vpop.f32.mrf.mxu1 }
 0x835   :  { %v5005_v54 = vpop.f32.mrf.mxu1 }
 0x836   :  { %6052 = vmatmul.mubr.bf16.gmra.mxu0 %v6730_v55  ;;  %v11123_v38 = vadd.f32 %v5005_v54, %v4461_v18  ;;  %v12323_v54 = vld [vmem:[#allocation31_spill] sm:$0xff] }
 0x837   :  { %v5007_v33 = vpop.f32.mrf.mxu1  ;;  %6059 = vmatprep.mubr.bf16.mxu0 %v6739_v53  ;;  %v4472_v18 = vadd.f32 %v12323_v54, %v12322_v12 }
 0x838   :  { %v12320_v33 = vld [vmem:[#allocation122_spill] sm:$0xff] }
 0x839   :  { %v5008_v21 = vpop.f32.mrf.mxu1  ;;  %v4469_v25 = vadd.f32 %v12321_v19, %v12320_v33  ;;  %v12327_v33 = vld [vmem:[#allocation29_spill] sm:$0xff] }
 0x83a   :  { %v11125_v27 = vadd.f32 %v5008_v21, %v4464_v5  ;;  %v4480_v19 = vadd.f32 %v12327_v33, %v12326_v31  ;;  %v12328_v5 = vld [vmem:[#allocation126_spill] sm:$0xff] }
 0x83b   :  { %v5010_v1 = vpop.f32.mrf.mxu1  ;;  %v4485_v29 = vadd.f32 %v12329_v39, %v12328_v5 }
 0x83d   :  { %v5013_v0 = vpop.f32.mrf.mxu1 }
 0x83e   :  { %6060 = vmatmul.mubr.bf16.gmra.mxu0 %v6738_v17  ;;  %v11135_v30 = vadd.f32 %v5013_v0, %v4469_v25 }
 0x83f   :  { %v5015_v53 = vpop.f32.mrf.mxu1  ;;  %6100 = vmatprep.mubr.bf16.mxu0 %v6685_v47  ;;  %v12325_v47 = vld [vmem:[#allocation28_spill] sm:$0xff] }
 0x840   :  { %v12324_v53 = vld [vmem:[#allocation124_spill] sm:$0xff] }
 0x841   :  { %v5016_v21 = vpop.f32.mrf.mxu1  ;;  %v4477_v55 = vadd.f32 %v12325_v47, %v12324_v53 }
 0x842   :  { %v11137_v8 = vadd.f32 %v5016_v21, %v4472_v18 }
 0x843   :  { %v5018_v35 = vpop.f32.mrf.mxu1 }
 0x845   :  { %v5021_v1 = vpop.f32.mrf.mxu1 }
 0x846   :  { %v6912_v11 = vpop.f32.mrf.mxu0  ;;  %v5022_v0 = vadd.f32 %v5021_v1, %v4477_v55  ;;  %v12333_v55 = vld [vmem:[#allocation24_spill] sm:$0xff] }
 0x847   :  { %v5023_v17 = vpop.f32.mrf.mxu1 }
 0x848   :  { %v6913_v2 = vpop.f32.mrf.mxu0  ;;  %v12330_v17 = vld [vmem:[#allocation127_spill] sm:$0xff] }
 0x849   :  { %v5024_v12 = vpop.f32.mrf.mxu1  ;;  %v6914_v54 = vadd.f32 %v6913_v2, %v6912_v11  ;;  %v4488_v26 = vadd.f32 %v12331_v13, %v12330_v17  ;;  %v12332_v11 = vld [vmem:[#allocation128_spill] sm:$0xff] }
 0x84a   :  { %v5025_v25 = vadd.f32 %v5024_v12, %v4480_v19  ;;  %v4493_v1 = vadd.f32 %v12333_v55, %v12332_v11  ;;  %v12335_v19 = vld [vmem:[#allocation25_spill] sm:$0xff]  ;;  %v12340_v11 = vld [vmem:[#allocation132_spill] sm:$0xff] }
 0x84b   :  { %v5026_v18 = vpop.f32.mrf.mxu1  ;;  %v5419_v21 = vadd.f32 %v6914_v54, %v5349_v36  ;;  %v12334_v36 = vld [vmem:[#allocation129_spill] sm:$0xff]  ;;  %v4509_v55 = vadd.f32 %v10539_v23, %v12340_v11 }
 0x84c   :  { %v5530_v35 = vpack.c.bf16 %v5025_v25, %v5022_v0  ;;  %v4496_v12 = vadd.f32 %v12335_v19, %v12334_v36  ;;  %v12336_v18 = vld [vmem:[#allocation130_spill] sm:$0xff] }
 0x84d   :  { %v5029_v62 = vpop.f32.mrf.mxu1 }
 0x84e   :  { %v5030_v47 = vadd.f32 %v5029_v62, %v4485_v29  ;;  %v12337_v29 = vld [vmem:[#allocation22_spill] sm:$0xff]  ;;  %v12338_v62 = vld [vmem:[#allocation131_spill] sm:$0xff] }
 0x84f   :  { %v5031_v51 = vpop.f32.mrf.mxu1 }
 0x851   :  { %v5032_v53 = vpop.f32.mrf.mxu1 }
 0x852   :  { %v5033_v20 = vadd.f32 %v5032_v53, %v4488_v26  ;;  %v4501_v26 = vadd.f32 %v12337_v29, %v12336_v18 }
 0x853   :  { %v5034_v31 = vpop.f32.mrf.mxu1 }
 0x854   :  { %v5531_v33 = vpack.c.bf16 %v5033_v20, %v5030_v47  ;;  %v12339_v20 = vld [vmem:[#allocation23_spill] sm:$0xff] }
 0x855   :  { %v5037_v15 = vpop.f32.mrf.mxu1  ;;  %v4504_v17 = vadd.f32 %v12339_v20, %v12338_v62 }
 0x856   :  { %v5038_v54 = vadd.f32 %v5037_v15, %v4493_v1 }
 0x857   :  { %v5039_v2 = vpop.f32.mrf.mxu1 }
 0x859   :  { %v5040_v51 = vpop.f32.mrf.mxu1 }
 0x85a   :  { %v5041_v0 = vadd.f32 %v5040_v51, %v4496_v12  ;;  %v12341_v51 = vpack.c.bf16 %v11083_v59, %v11073_v41  ;;  %v12346_v59 = vld [vmem:[#allocation134_spill] sm:$0xff] }
 0x85b   :  { %v5042_v39 = vpop.f32.mrf.mxu1 }
 0x85c   :  { %v5532_v5 = vpack.c.bf16 %v5041_v0, %v5038_v54  ;;  %v12342_v54 = vld [vmem:[#allocation5_spill] sm:$0xff] }
 0x85d   :  { %v5045_v25 = vpop.f32.mrf.mxu1  ;;  %v12343_v0 = vsub.s32 0, %v12342_v54  ;;  %v12349_v54 = vpack.c.bf16 %v11023_v28, %v11008_v9 }
 0x85e   :  { %v5046_v47 = vadd.f32 %v5045_v25, %v4501_v26  ;;  %v12344_v25 = vld [vmem:[#allocation133_spill] sm:$0xff] }
 0x85f   :  { %v5047_v13 = vpop.f32.mrf.mxu1  ;;  %v11166_v39 = vrot.slane %v5419_v21, %v12343_v0  ;;  %v4517_v21 = vadd.f32 %v10571_v45, %v12346_v59 }
 0x860   :  { %v4512_v13 = vadd.f32 %v10554_v3, %v12344_v25 }
 0x861   :  { %v5048_v53 = vpop.f32.mrf.mxu1 }
 0x862   :  { %v5049_v31 = vadd.f32 %v5048_v53, %v4504_v17  ;;  %v12345_v17 = vpack.c.bf16 %v11067_v48, %v11054_v40  ;;  %v12347_v40 = vpack.c.bf16 %v11045_v49, %v11032_v50  ;;  %v12350_v49 = vld [vmem:[#allocation136_spill] sm:$0xff] }
 0x863   :  { %v5050_v2 = vpop.f32.mrf.mxu1  ;;  %v4525_v0 = vadd.f32 %v10603_v6, %v12350_v49 }
 0x864   :  { %v5533_v36 = vpack.c.bf16 %v5049_v31, %v5046_v47 }
 0x865   :  { %v5053_v15 = vpop.f32.mrf.mxu1 }
 0x866   :  { %v11159_v1 = vadd.f32 %v5053_v15, %v4509_v55  ;;  %7043 = vmatprep.subr.bf16.mxu0 %v5533_v36  ;;  %v6931_v19 = vpop.f32.mrf.mxu0  ;;  %v12348_v55 = vld [vmem:[#allocation135_spill] sm:$0xff] }
 0x867   :  { %v5055_v12 = vpop.f32.mrf.mxu1  ;;  %7044 = vmatpush3.bf16.msra.mxu0 %v12341_v51  ;;  %v4520_v45 = vadd.f32 %v10586_v22, %v12348_v55 }
 0x868   :  { %7045 = vmatprep.subr.bf16.mxu0 %v5532_v5  ;;  %v6932_v23 = vpop.f32.mrf.mxu0 }
 0x869   :  { %v5056_v18 = vpop.f32.mrf.mxu1  ;;  %v6933_v29 = vadd.f32 %v6932_v23, %v6931_v19 }
 0x86a   :  { %v11170_v26 = vadd.f32 %v5056_v18, %v4512_v13  ;;  %v6934_v62 = vpop.f32.mrf.mxu0 }
 0x86b   :  { %v5058_v20 = vpop.f32.mrf.mxu1  ;;  %7046 = vmatpush3.bf16.msra.mxu0 %v12345_v17  ;;  %v11176_v41 = vadd.f32 %v6933_v29, %v11166_v39  ;;  %v12352_v29 = vpack.c.bf16 %v10984_v60, %v10963_v43  ;;  %v12355_v43 = vpack.c.bf16 %v10946_v61, %v10931_v42 }
 0x86c   :  { %7047 = vmatprep.subr.bf16.mxu0 %v5531_v33  ;;  %v6935_v5 = vpop.f32.mrf.mxu0 }
 0x86d   :  { %v5061_v53 = vpop.f32.mrf.mxu1  ;;  %v6936_v47 = vadd.f32 %v6935_v5, %v6934_v62  ;;  %v12353_v62 = vld [vmem:[#allocation137_spill] sm:$0xff] }
 0x86e   :  { %v11182_v31 = vadd.f32 %v5061_v53, %v4517_v21  ;;  %v6937_v2 = vpop.f32.mrf.mxu0  ;;  %v4528_v20 = vadd.f32 %v10618_v32, %v12353_v62  ;;  %v12364_v62 = vcombine.low %v11001_v57, %v11006_v56  ;;  %v5444_v57 = vld [vmem:[%s11698_s5 + $0xb0] sm:$0xff] }
 0x86f   :  { %v5063_v11 = vpop.f32.mrf.mxu1  ;;  %7048 = vmatpush3.bf16.msra.mxu0 %v12347_v40  ;;  %v11188_v48 = vadd.f32 %v6936_v47, %v11166_v39  ;;  %v12356_v47 = vld [vmem:[#allocation138_spill] sm:$0xff] }
 0x870   :  { %7049 = vmatprep.subr.bf16.mxu0 %v5530_v35  ;;  %v6938_v36 = vpop.f32.mrf.mxu0  ;;  %v12351_v35 = vpack.c.bf16 %v11137_v8, %v11135_v30  ;;  %v12354_v30 = vpack.c.bf16 %v11125_v27, %v11123_v38  ;;  %v4533_v32 = vadd.f32 %v10635_v7, %v12356_v47  ;;  %v12357_v27 = vpack.c.bf16 %v11115_v63, %v11105_v52  ;;  %v5432_v63 = vld [vmem:[%s11698_s5 + $0x50] sm:$0xff] }
 0x871   :  { %v5064_v33 = vpop.f32.mrf.mxu1  ;;  %v6939_v15 = vadd.f32 %v6938_v36, %v6937_v2  ;;  %v12359_v36 = vld [vmem:[#allocation139_spill] sm:$0xff]  ;;  %v12360_v52 = vpack.c.bf16 %v11099_v4, %v11089_v58 }
 0x872   :  { %v11192_v19 = vadd.f32 %v5064_v33, %v4520_v45  ;;  %v6940_v12 = vpop.f32.mrf.mxu0  ;;  %v12358_v45 = vpack.c.bf16 %v10914_v10, %v10899_v16  ;;  %v4536_v33 = vadd.f32 %v10656_v37, %v12359_v36  ;;  %v12361_v37 = vpack.c.bf16 %v10882_v24, %v10870_v46  ;;  %v11274_v46 = vld [vmem:[%s11698_s5 + $0x38] sm:$0xff]  ;;  %v12368_v36 = vld [vmem:[#allocation18_spill] sm:$0xff] }
 0x873   :  { %v5066_v51 = vpop.f32.mrf.mxu1  ;;  %7050 = vmatpush3.bf16.msra.mxu0 %v12349_v54  ;;  %v11198_v50 = vadd.f32 %v6939_v15, %v11166_v39  ;;  %v5436_v15 = vld [vmem:[%s11698_s5 + $0x70] sm:$0xff] }
 0x874   :  { %7051 = vmatprep.subr.bf16.mxu0 %v12351_v35  ;;  %v6941_v25 = vpop.f32.mrf.mxu0  ;;  %v6693_v58 = vcombine.high %v5432_v63, %v5436_v15  ;;  %v12363_v35 = vld [vmem:[#allocation20_spill] sm:$0xff] }
 0x875   :  { %v5069_v13 = vpop.f32.mrf.mxu1  ;;  %v6942_v23 = vadd.f32 %v6941_v25, %v6940_v12 }
 0x876   :  { %v11207_v18 = vadd.f32 %v5069_v13, %v4525_v0  ;;  %v6943_v9 = vpop.f32.mrf.mxu0  ;;  %v12362_v0 = vld [vmem:[#allocation140_spill] sm:$0xff] }
 0x877   :  { %v5071_v28 = vpop.f32.mrf.mxu1  ;;  %7052 = vmatpush3.bf16.msra.mxu0 %v12352_v29  ;;  %v11213_v6 = vadd.f32 %v6942_v23, %v11166_v39  ;;  %v4541_v25 = vadd.f32 %v12363_v35, %v12362_v0  ;;  %v5448_v35 = vld [vmem:[%s11698_s5 + $0xd0] sm:$0xff] }
 0x878   :  { %7053 = vmatprep.subr.bf16.mxu0 %v12354_v30  ;;  %v6944_v8 = vpop.f32.mrf.mxu0 }
 0x879   :  { %v5072_v17 = vpop.f32.mrf.mxu1  ;;  %v6945_v59 = vadd.f32 %v6944_v8, %v6943_v9  ;;  %v11269_v9 = vld [vmem:[%s11698_s5 + $0x18] sm:$0xff] }
 0x87a   :  { %v11220_v21 = vadd.f32 %v5072_v17, %v4528_v20  ;;  %v6946_v5 = vpop.f32.mrf.mxu0 }
 0x87b   :  { %v5074_v53 = vpop.f32.mrf.mxu1  ;;  %7054 = vmatpush3.bf16.msra.mxu0 %v12355_v43  ;;  %v11226_v60 = vadd.f32 %v6945_v59, %v11166_v39  ;;  %v12365_v59 = vld [vmem:[#allocation141_spill] sm:$0xff]  ;;  %v5440_v43 = vld [vmem:[%s11698_s5 + $0x90] sm:$0xff] }
 0x87c   :  { %7055 = vmatprep.subr.bf16.mxu0 %v12357_v27  ;;  %v6947_v2 = vpop.f32.mrf.mxu0 }
 0x87d   :  { %v5077_v11 = vpop.f32.mrf.mxu1  ;;  %v6948_v40 = vadd.f32 %v6947_v2, %v6946_v5  ;;  %v12366_v5 = vld [vmem:[#allocation21_spill] sm:$0xff]  ;;  %v6692_v2 = vcombine.low %v5432_v63, %v5436_v15 }
 0x87e   :  { %v11235_v55 = vadd.f32 %v5077_v11, %v4533_v32  ;;  %v6949_v42 = vpop.f32.mrf.mxu0  ;;  %v4544_v53 = vadd.f32 %v12366_v5, %v12365_v59 }
 0x87f   :  { %v5079_v61 = vpop.f32.mrf.mxu1  ;;  %7056 = vmatpush3.bf16.msra.mxu0 %v12358_v45  ;;  %v11241_v7 = vadd.f32 %v6948_v40, %v11166_v39  ;;  %v12367_v45 = vld [vmem:[#allocation143_spill] sm:$0xff] }
 0x880   :  { %7057 = vmatprep.subr.bf16.mxu0 %v12360_v52  ;;  %v6950_v16 = vpop.f32.mrf.mxu0 }
 0x881   :  { %v5080_v10 = vpop.f32.mrf.mxu1  ;;  %v6951_v12 = vadd.f32 %v6950_v16, %v6949_v42  ;;  %v6701_v42 = vcombine.high %v5440_v43, %v5444_v57 }
 0x882   :  { %v11254_v51 = vadd.f32 %v5080_v10, %v4536_v33  ;;  %v6952_v54 = vpop.f32.mrf.mxu0  ;;  %v4549_v33 = vadd.f32 %v12368_v36, %v12367_v45 }
 0x883   :  { %v5082_v49 = vpop.f32.mrf.mxu1  ;;  %7058 = vmatpush3.bf16.msra.mxu0 %v12361_v37  ;;  %v11260_v4 = vadd.f32 %v6951_v12, %v11166_v39  ;;  %v12369_v37 = vld [vmem:[#allocation145_spill] sm:$0xff] }
 0x884   :  { %v6953_v23 = vpop.f32.mrf.mxu0 }
 0x885   :  { %v5085_v24 = vpop.f32.mrf.mxu1  ;;  %v6954_v28 = vadd.f32 %v6953_v23, %v6952_v54 }
 0x886   :  { %v11276_v29 = vadd.f32 %v5085_v24, %v4541_v25  ;;  %6101 = vmatmul.mubr.bf16.vlgmr.msra.gmra.mxu0 %v12364_v62  ;;  %v6955_v20 = vpop.f32.mrf.mxu0  ;;  %v5452_v25 = vld [vmem:[%s11698_s5 + $0xf0] sm:$0xff] }
 0x887   :  { %v5087_v8 = vpop.f32.mrf.mxu1  ;;  %6108 = vmatprep.mubr.bf16.mxu0 %v6693_v58  ;;  %v11284_v17 = vadd.f32 %v6954_v28, %v11166_v39  ;;  %v12370_v58 = vld [vmem:[#allocation19_spill] sm:$0xff]  ;;  %v6709_v5 = vcombine.high %v5448_v35, %v5452_v25 }
 0x888   :  { %v6956_v56 = vpop.f32.mrf.mxu0  ;;  %v4552_v0 = vadd.f32 %v12370_v58, %v12369_v37 }
 0x889   :  { %v5088_v47 = vpop.f32.mrf.mxu1  ;;  %v6957_v32 = vadd.f32 %v6956_v56, %v6955_v20  ;;  %v6700_v20 = vcombine.low %v5440_v43, %v5444_v57  ;;  %v12371_v56 = vld [vmem:[#allocation147_spill] sm:$0xff] }
 0x88a   :  { %v11294_v27 = vadd.f32 %v5088_v47, %v4544_v53  ;;  %v6958_v11 = vpop.f32.mrf.mxu0  ;;  %v12372_v47 = vld [vmem:[#allocation16_spill] sm:$0xff] }
 0x88b   :  { %v5090_v40 = vpop.f32.mrf.mxu1  ;;  %v11297_v61 = vadd.f32 %v6957_v32, %v11166_v39  ;;  %v4557_v32 = vadd.f32 %v12372_v47, %v12371_v56 }
 0x88c   :  { %v6959_v16 = vpop.f32.mrf.mxu0 }
 0x88d   :  { %v5093_v10 = vpop.f32.mrf.mxu1  ;;  %v6960_v12 = vadd.f32 %v6959_v16, %v6958_v11  ;;  %v12374_v16 = vld [vmem:[#allocation17_spill] sm:$0xff] }
 0x88e   :  { %v11303_v54 = vadd.f32 %v5093_v10, %v4549_v33  ;;  %6109 = vmatmul.mubr.bf16.gmra.mxu0 %v6692_v2  ;;  %v6961_v49 = vpop.f32.mrf.mxu0  ;;  %v12373_v33 = vld [vmem:[#allocation149_spill] sm:$0xff] }
 0x88f   :  { %v5095_v63 = vpop.f32.mrf.mxu1  ;;  %6116 = vmatprep.mubr.bf16.mxu0 %v6701_v42  ;;  %v11306_v15 = vadd.f32 %v6960_v12, %v11166_v39  ;;  %v4560_v10 = vadd.f32 %v12374_v16, %v12373_v33  ;;  %v5456_v12 = vld [vmem:[%s11698_s5 + $0x110] sm:$0xff] }
 0x890   :  { %v6962_v23 = vpop.f32.mrf.mxu0  ;;  %v12378_v33 = vld [vmem:[#allocation15_spill] sm:$0xff] }
 0x891   :  { %v5096_v24 = vpop.f32.mrf.mxu1  ;;  %v6963_v28 = vadd.f32 %v6962_v23, %v6961_v49  ;;  %v5460_v49 = vld [vmem:[%s11698_s5 + $0x130] sm:$0xff]  ;;  %v6708_v23 = vcombine.low %v5448_v35, %v5452_v25 }
 0x892   :  { %v11316_v62 = vadd.f32 %v5096_v24, %v4552_v0  ;;  %v6964_v8 = vpop.f32.mrf.mxu0 }
 0x893   :  { %v5098_v59 = vpop.f32.mrf.mxu1  ;;  %v11319_v53 = vadd.f32 %v6963_v28, %v11166_v39 }
 0x894   :  { %v6965_v11 = vpop.f32.mrf.mxu0  ;;  %v12375_v59 = vld [vmem:[#allocation151_spill] sm:$0xff] }
 0x895   :  { %v5101_v40 = vpop.f32.mrf.mxu1  ;;  %v6966_v42 = vadd.f32 %v6965_v11, %v6964_v8 }
 0x896   :  { %v11325_v45 = vadd.f32 %v5101_v40, %v4557_v32  ;;  %6117 = vmatmul.mubr.bf16.gmra.mxu0 %v6700_v20  ;;  %v6967_v36 = vpop.f32.mrf.mxu0  ;;  %v6717_v20 = vcombine.high %v5456_v12, %v5460_v49 }
 0x897   :  { %v5103_v43 = vpop.f32.mrf.mxu1  ;;  %6124 = vmatprep.mubr.bf16.mxu0 %v6709_v5  ;;  %v11328_v57 = vadd.f32 %v6966_v42, %v11166_v39  ;;  %v12376_v5 = vld [vmem:[#allocation14_spill] sm:$0xff] }
 0x898   :  { %v6968_v63 = vpop.f32.mrf.mxu0  ;;  %v4565_v56 = vadd.f32 %v12376_v5, %v12375_v59  ;;  %v12377_v43 = vld [vmem:[#allocation153_spill] sm:$0xff] }
 0x899   :  { %v5104_v37 = vpop.f32.mrf.mxu1  ;;  %v6969_v58 = vadd.f32 %v6968_v63, %v6967_v36  ;;  %v4568_v16 = vadd.f32 %v12378_v33, %v12377_v43  ;;  %v5468_v63 = vld [vmem:[%s11698_s5 + $0x170] sm:$0xff] }
 0x89a   :  { %v11338_v0 = vadd.f32 %v5104_v37, %v4560_v10  ;;  %v6970_v24 = vpop.f32.mrf.mxu0  ;;  %v5464_v10 = vld [vmem:[%s11698_s5 + $0x150] sm:$0xff] }
 0x89b   :  { %v5106_v28 = vpop.f32.mrf.mxu1  ;;  %v11341_v8 = vadd.f32 %v6969_v58, %v11166_v39  ;;  %v6725_v5 = vcombine.high %v5464_v10, %v5468_v63 }
 0x89c   :  { %v6971_v32 = vpop.f32.mrf.mxu0  ;;  %v6716_v28 = vcombine.low %v5456_v12, %v5460_v49  ;;  %v12381_v49 = vld [vmem:[#allocation157_spill] sm:$0xff] }
 0x89d   :  { %v5109_v11 = vpop.f32.mrf.mxu1  ;;  %v6972_v40 = vadd.f32 %v6971_v32, %v6970_v24  ;;  %v12379_v32 = vld [vmem:[#allocation155_spill] sm:$0xff] }
 0x89e   :  { %v11347_v42 = vadd.f32 %v5109_v11, %v4565_v56  ;;  %6125 = vmatmul.mubr.bf16.gmra.mxu0 %v6708_v23  ;;  %v6973_v36 = vpop.f32.mrf.mxu0  ;;  %v12380_v11 = vld [vmem:[#allocation12_spill] sm:$0xff] }
 0x89f   :  { %v5111_v35 = vpop.f32.mrf.mxu1  ;;  %6132 = vmatprep.mubr.bf16.mxu0 %v6717_v20  ;;  %v11350_v25 = vadd.f32 %v6972_v40, %v11166_v39  ;;  %v4573_v40 = vadd.f32 %v12380_v11, %v12379_v32  ;;  %v12383_v11 = vld [vmem:[#allocation159_spill] sm:$0xff] }
 0x8a0   :  { %v6974_v37 = vpop.f32.mrf.mxu0 }
 0x8a1   :  { %v5112_v58 = vpop.f32.mrf.mxu1  ;;  %v6975_v23 = vadd.f32 %v6974_v37, %v6973_v36 }
 0x8a2   :  { %v11360_v24 = vadd.f32 %v5112_v58, %v4568_v16  ;;  %v6976_v20 = vpop.f32.mrf.mxu0  ;;  %v12382_v16 = vld [vmem:[#allocation13_spill] sm:$0xff]  ;;  %v5472_v58 = vld [vmem:[%s11698_s5 + $0x190] sm:$0xff] }
 0x8a3   :  { %v5114_v59 = vpop.f32.mrf.mxu1  ;;  %v11363_v56 = vadd.f32 %v6975_v23, %v11166_v39  ;;  %v4576_v37 = vadd.f32 %v12382_v16, %v12381_v49  ;;  %v5476_v23 = vld [vmem:[%s11698_s5 + $0x1b0] sm:$0xff]  ;;  %v12385_v49 = vld [vmem:[#allocation161_spill] sm:$0xff] }
 0x8a4   :  { %v6977_v43 = vpop.f32.mrf.mxu0  ;;  %v12386_v16 = vld [vmem:[#allocation11_spill] sm:$0xff] }
 0x8a5   :  { %v5117_v33 = vpop.f32.mrf.mxu1  ;;  %v6978_v30 = vadd.f32 %v6977_v43, %v6976_v20  ;;  %v4584_v22 = vadd.f32 %v12386_v16, %v12385_v49  ;;  %v12389_v16 = vld [vmem:[#allocation165_spill] sm:$0xff] }
 0x8a6   :  { %v11369_v3 = vadd.f32 %v5117_v33, %v4573_v40  ;;  %6133 = vmatmul.mubr.bf16.gmra.mxu0 %v6716_v28  ;;  %v6724_v28 = vcombine.low %v5464_v10, %v5468_v63  ;;  %v5480_v10 = vld [vmem:[%s11698_s5 + $0x1d0] sm:$0xff]  ;;  %v12390_v40 = vld [vmem:[#allocation9_spill] sm:$0xff] }
 0x8a7   :  { %v5119_v36 = vpop.f32.mrf.mxu1  ;;  %6140 = vmatprep.mubr.bf16.mxu0 %v6725_v5  ;;  %v11372_v12 = vadd.f32 %v6978_v30, %v11166_v39  ;;  %v6733_v5 = vcombine.high %v5472_v58, %v5476_v23  ;;  %v12384_v39 = vld [vmem:[#allocation10_spill] sm:$0xff]  ;;  %v4592_v38 = vadd.f32 %v12390_v40, %v12389_v16 }
 0x8a8   :  { %v4581_v30 = vadd.f32 %v12384_v39, %v12383_v11  ;;  %v5484_v63 = vld [vmem:[%s11698_s5 + $0x1f0] sm:$0xff] }
 0x8a9   :  { %v5120_v20 = vpop.f32.mrf.mxu1  ;;  %v6741_v39 = vcombine.high %v5480_v10, %v5484_v63 }
 0x8aa   :  { %v11382_v59 = vadd.f32 %v5120_v20, %v4576_v37 }
 0x8ab   :  { %v5122_v32 = vpop.f32.mrf.mxu1 }
 0x8ac   :  { %v6732_v32 = vcombine.low %v5472_v58, %v5476_v23  ;;  %v6740_v58 = vcombine.low %v5480_v10, %v5484_v63 }
 0x8ad   :  { %v5125_v43 = vpop.f32.mrf.mxu1 }
 0x8ae   :  { %v11388_v33 = vadd.f32 %v5125_v43, %v4581_v30  ;;  %6141 = vmatmul.mubr.bf16.gmra.mxu0 %v6724_v28  ;;  %v12387_v43 = vld [vmem:[#allocation163_spill] sm:$0xff] }
 0x8af   :  { %v5127_v36 = vpop.f32.mrf.mxu1  ;;  %6148 = vmatprep.mubr.bf16.mxu0 %v6733_v5 }
 0x8b0   :  { %v12388_v36 = vld [vmem:[#allocation8_spill] sm:$0xff] }
 0x8b1   :  { %v5128_v37 = vpop.f32.mrf.mxu1  ;;  %v4589_v49 = vadd.f32 %v12388_v36, %v12387_v43  ;;  %v12392_v43 = vld [vmem:[#allocation6_spill] sm:$0xff]  ;;  %v12393_v36 = vld [vmem:[#allocation169_spill] sm:$0xff] }
 0x8b2   :  { %v11398_v20 = vadd.f32 %v5128_v37, %v4584_v22  ;;  %v6687_v37 = vcombine.high %v11269_v9, %v11274_v46 }
 0x8b3   :  { %v5130_v11 = vpop.f32.mrf.mxu1 }
 0x8b5   :  { %v5133_v5 = vpop.f32.mrf.mxu1 }
 0x8b6   :  { %6149 = vmatmul.mubr.bf16.gmra.mxu0 %v6732_v32  ;;  %v11406_v52 = vadd.f32 %v5133_v5, %v4589_v49  ;;  %v12394_v5 = vld [vmem:[#allocation7_spill] sm:$0xff]  ;;  %v12396_v32 = vld [vmem:[#allocation173_spill] sm:$0xff] }
 0x8b7   :  { %v5135_v30 = vpop.f32.mrf.mxu1  ;;  %6156 = vmatprep.mubr.bf16.mxu0 %v6741_v39  ;;  %v4600_v49 = vadd.f32 %v12394_v5, %v12393_v36 }
 0x8b8   :  { %v12391_v30 = vld [vmem:[#allocation167_spill] sm:$0xff] }
 0x8b9   :  { %v5136_v13 = vpop.f32.mrf.mxu1  ;;  %v4597_v40 = vadd.f32 %v12392_v43, %v12391_v30  ;;  %v4608_v30 = vadd.f32 %v10880_v34, %v12396_v32  ;;  %v12398_v32 = vld [vmem:[#allocation175_spill] sm:$0xff] }
 0x8ba   :  { %v11408_v22 = vadd.f32 %v5136_v13, %v4592_v38 }
 0x8bb   :  { %v5138_v23 = vpop.f32.mrf.mxu1 }
 0x8bd   :  { %v5141_v11 = vpop.f32.mrf.mxu1 }
 0x8be   :  { %6157 = vmatmul.mubr.bf16.gmra.mxu0 %v6740_v58  ;;  %v11418_v13 = vadd.f32 %v5141_v11, %v4597_v40 }
 0x8bf   :  { %v5143_v39 = vpop.f32.mrf.mxu1  ;;  %6197 = vmatprep.mubr.bf16.mxu0 %v6687_v37 }
 0x8c0   :  { %v12395_v39 = vld [vmem:[#allocation171_spill] sm:$0xff] }
 0x8c1   :  { %v5144_v38 = vpop.f32.mrf.mxu1  ;;  %v4605_v37 = vadd.f32 %v10868_v44, %v12395_v39 }
 0x8c2   :  { %v11420_v10 = vadd.f32 %v5144_v38, %v4600_v49 }
 0x8c3   :  { %v5146_v63 = vpop.f32.mrf.mxu1 }
 0x8c5   :  { %v5149_v23 = vpop.f32.mrf.mxu1 }
 0x8c6   :  { %v6995_v28 = vpop.f32.mrf.mxu0  ;;  %v11428_v11 = vadd.f32 %v5149_v23, %v4605_v37  ;;  %v4613_v23 = vadd.f32 %v10897_v14, %v12398_v32  ;;  %v12399_v37 = vld [vmem:[#allocation177_spill] sm:$0xff] }
 0x8c7   :  { %v5151_v58 = vpop.f32.mrf.mxu1 }
 0x8c8   :  { %v6996_v43 = vpop.f32.mrf.mxu0 }
 0x8c9   :  { %v6997_v36 = vadd.f32 %v6996_v43, %v6995_v28  ;;  %v5152_v5 = vpop.f32.mrf.mxu1 }
 0x8ca   :  { %v11430_v40 = vadd.f32 %v5152_v5, %v4608_v30  ;;  %v6998_v49 = vpop.f32.mrf.mxu0  ;;  %v12400_v30 = vld [vmem:[#allocation92_spill] sm:$0xff] }
 0x8cb   :  { %v11433_v38 = vadd.f32 %v6997_v36, %v11176_v41  ;;  %v5154_v63 = vpop.f32.mrf.mxu1  ;;  %v4616_v43 = vadd.f32 %v12400_v30, %v12399_v37  ;;  %v12402_v37 = vld [vmem:[#allocation179_spill] sm:$0xff]  ;;  %v12403_v30 = vld [vmem:[#allocation108_spill] sm:$0xff] }
 0x8cc   :  { %v6999_v16 = vpop.f32.mrf.mxu0 }
 0x8cd   :  { %v7000_v44 = vadd.f32 %v6999_v16, %v6998_v49  ;;  %v5157_v39 = vpop.f32.mrf.mxu1 }
 0x8ce   :  { %v7001_v2 = vpop.f32.mrf.mxu0  ;;  %v5158_v63 = vadd.f32 %v5157_v39, %v4613_v23  ;;  %v12405_v39 = vld [vmem:[#allocation38_spill] sm:$0xff] }
 0x8cf   :  { %v11438_v34 = vadd.f32 %v7000_v44, %v11188_v48  ;;  %v5159_v28 = vpop.f32.mrf.mxu1 }
 0x8d0   :  { %v7002_v41 = vpop.f32.mrf.mxu0 }
 0x8d1   :  { %12397 = vst [vmem:[#allocation107_spill] sm:$0xff] %v11438_v34  ;;  %v7003_v36 = vadd.f32 %v7002_v41, %v7001_v2  ;;  %v5160_v5 = vpop.f32.mrf.mxu1  ;;  %v4621_v2 = vadd.f32 %v12403_v30, %v12402_v37  ;;  %v12404_v41 = vld [vmem:[#allocation181_spill] sm:$0xff] }
 0x8d2   :  { %v5161_v47 = vadd.f32 %v5160_v5, %v4616_v43  ;;  %v7004_v58 = vpop.f32.mrf.mxu0  ;;  %v4624_v23 = vadd.f32 %v12405_v39, %v12404_v41  ;;  %v12406_v41 = vld [vmem:[#allocation183_spill] sm:$0xff]  ;;  %v12407_v39 = vld [vmem:[#allocation142_spill] sm:$0xff] }
 0x8d3   :  { %v11445_v16 = vadd.f32 %v7003_v36, %v11198_v50  ;;  %v5162_v49 = vpop.f32.mrf.mxu1 }
 0x8d4   :  { %v5547_v35 = vpack.c.bf16 %v5161_v47, %v5158_v63  ;;  %v7005_v48 = vpop.f32.mrf.mxu0 }
 0x8d5   :  { %v7006_v44 = vadd.f32 %v7005_v48, %v7004_v58  ;;  %v5165_v28 = vpop.f32.mrf.mxu1 }
 0x8d6   :  { %v7007_v34 = vpop.f32.mrf.mxu0  ;;  %v5166_v36 = vadd.f32 %v5165_v28, %v4621_v2  ;;  %v12409_v28 = vld [vmem:[#allocation91_spill] sm:$0xff] }
 0x8d7   :  { %v11448_v14 = vadd.f32 %v7006_v44, %v11213_v6  ;;  %v5167_v32 = vpop.f32.mrf.mxu1 }
 0x8d8   :  { %v7008_v43 = vpop.f32.mrf.mxu0 }
 0x8d9   :  { %12401 = vst [vmem:[#allocation90_spill] sm:$0xff] %v11448_v14  ;;  %v7009_v5 = vadd.f32 %v7008_v43, %v7007_v34  ;;  %v5168_v50 = vpop.f32.mrf.mxu1  ;;  %v4629_v34 = vadd.f32 %v12407_v39, %v12406_v41  ;;  %v12408_v43 = vld [vmem:[#allocation185_spill] sm:$0xff]  ;;  %v12410_v39 = vpack.c.bf16 %v11360_v24, %v11347_v42  ;;  %v12412_v42 = vpack.c.bf16 %v11316_v62, %v11303_v54 }
 0x8da   :  { %v5169_v49 = vadd.f32 %v5168_v50, %v4624_v23  ;;  %v7010_v47 = vpop.f32.mrf.mxu0  ;;  %v4632_v2 = vadd.f32 %v12409_v28, %v12408_v43  ;;  %v12411_v43 = vpack.c.bf16 %v11338_v0, %v11325_v45  ;;  %v12414_v0 = vpack.c.bf16 %v11294_v27, %v11276_v29 }
 0x8db   :  { %v11455_v58 = vadd.f32 %v7009_v5, %v11226_v60  ;;  %v5170_v63 = vpop.f32.mrf.mxu1 }
 0x8dc   :  { %v5548_v48 = vpack.c.bf16 %v5169_v49, %v5166_v36  ;;  %v7011_v6 = vpop.f32.mrf.mxu0 }
 0x8dd   :  { %v7012_v44 = vadd.f32 %v7011_v6, %v7010_v47  ;;  %v5173_v32 = vpop.f32.mrf.mxu1 }
 0x8de   :  { %v7013_v14 = vpop.f32.mrf.mxu0  ;;  %v5174_v5 = vadd.f32 %v5173_v32, %v4629_v34 }
 0x8df   :  { %v11458_v37 = vadd.f32 %v7012_v44, %v11241_v7  ;;  %v5175_v30 = vpop.f32.mrf.mxu1 }
 0x8e0   :  { %v7014_v23 = vpop.f32.mrf.mxu0 }
 0x8e1   :  { %v7015_v50 = vadd.f32 %v7014_v23, %v7013_v14  ;;  %v5176_v60 = vpop.f32.mrf.mxu1 }
 0x8e2   :  { %v5177_v63 = vadd.f32 %v5176_v60, %v4632_v2  ;;  %v7016_v36 = vpop.f32.mrf.mxu0 }
 0x8e3   :  { %v11465_v49 = vadd.f32 %v7015_v50, %v11260_v4  ;;  %v5178_v47 = vpop.f32.mrf.mxu1 }
 0x8e4   :  { %v5549_v6 = vpack.c.bf16 %v5177_v63, %v5174_v5  ;;  %v7017_v7 = vpop.f32.mrf.mxu0 }
 0x8e5   :  { %v7018_v44 = vadd.f32 %v7017_v7, %v7016_v36  ;;  %v12423_v36 = vcombine.low %v11269_v9, %v11274_v46  ;;  %v5449_v9 = vld [vmem:[%s11698_s5 + $0xd8] sm:$0xff] }
 0x8e6   :  { %v7019_v30 = vpop.f32.mrf.mxu0  ;;  %7107 = vmatprep.subr.bf16.mxu0 %v5549_v6  ;;  %v5453_v46 = vld [vmem:[%s11698_s5 + $0xf8] sm:$0xff] }
 0x8e7   :  { %v11468_v41 = vadd.f32 %v7018_v44, %v11284_v17  ;;  %7108 = vmatpush3.bf16.msra.mxu0 %v12410_v39  ;;  %v6711_v7 = vcombine.high %v5449_v9, %v5453_v46  ;;  %v5457_v44 = vld [vmem:[%s11698_s5 + $0x118] sm:$0xff]  ;;  %v6710_v39 = vcombine.low %v5449_v9, %v5453_v46 }
 0x8e8   :  { %v7020_v14 = vpop.f32.mrf.mxu0  ;;  %7109 = vmatprep.subr.bf16.mxu0 %v5548_v48 }
 0x8e9   :  { %v7021_v32 = vadd.f32 %v7020_v14, %v7019_v30  ;;  %v5461_v30 = vld [vmem:[%s11698_s5 + $0x138] sm:$0xff] }
 0x8ea   :  { %v7022_v34 = vpop.f32.mrf.mxu0  ;;  %v6719_v14 = vcombine.high %v5457_v44, %v5461_v30 }
 0x8eb   :  { %v11474_v4 = vadd.f32 %v7021_v32, %v11297_v61  ;;  %7110 = vmatpush3.bf16.msra.mxu0 %v12411_v43  ;;  %v12413_v61 = vpack.c.bf16 %v11430_v40, %v11428_v11  ;;  %v12416_v11 = vpack.c.bf16 %v11254_v51, %v11235_v55  ;;  %v12417_v40 = vpack.c.bf16 %v11408_v22, %v11406_v52  ;;  %v5465_v32 = vld [vmem:[%s11698_s5 + $0x158] sm:$0xff] }
 0x8ec   :  { %v7023_v28 = vpop.f32.mrf.mxu0  ;;  %7111 = vmatprep.subr.bf16.mxu0 %v5547_v35  ;;  %v12415_v35 = vpack.c.bf16 %v11420_v10, %v11418_v13  ;;  %v12418_v13 = vpack.c.bf16 %v11220_v21, %v11207_v18  ;;  %v12419_v10 = vpack.c.bf16 %v11398_v20, %v11388_v33  ;;  %v12420_v52 = vpack.c.bf16 %v11192_v19, %v11182_v31  ;;  %v5433_v18 = vld [vmem:[%s11698_s5 + $0x58] sm:$0xff] }
 0x8ed   :  { %v7024_v2 = vadd.f32 %v7023_v28, %v7022_v34  ;;  %v12421_v22 = vpack.c.bf16 %v11382_v59, %v11369_v3  ;;  %v5437_v21 = vld [vmem:[%s11698_s5 + $0x78] sm:$0xff]  ;;  %v12422_v31 = vpack.c.bf16 %v11170_v26, %v11159_v1  ;;  %v6718_v43 = vcombine.low %v5457_v44, %v5461_v30 }
 0x8ee   :  { %v7025_v17 = vpop.f32.mrf.mxu0  ;;  %v6695_v19 = vcombine.high %v5433_v18, %v5437_v21  ;;  %v5445_v1 = vld [vmem:[%s11698_s5 + $0xb8] sm:$0xff]  ;;  %v6694_v26 = vcombine.low %v5433_v18, %v5437_v21  ;;  %v12425_v21 = vld [vmem:[#allocation90_spill] sm:$0xff] }
 0x8ef   :  { %v11480_v23 = vadd.f32 %v7024_v2, %v11306_v15  ;;  %7112 = vmatpush3.bf16.msra.mxu0 %v12412_v42  ;;  %v5469_v34 = vld [vmem:[%s11698_s5 + $0x178] sm:$0xff] }
 0x8f0   :  { %v7026_v24 = vpop.f32.mrf.mxu0  ;;  %7113 = vmatprep.subr.bf16.mxu0 %v12413_v61  ;;  %v6727_v28 = vcombine.high %v5465_v32, %v5469_v34  ;;  %v5473_v2 = vld [vmem:[%s11698_s5 + $0x198] sm:$0xff]  ;;  %v6726_v42 = vcombine.low %v5465_v32, %v5469_v34 }
 0x8f1   :  { %v7027_v48 = vadd.f32 %v7026_v24, %v7025_v17  ;;  %v5477_v17 = vld [vmem:[%s11698_s5 + $0x1b8] sm:$0xff] }
 0x8f2   :  { %v7028_v50 = vpop.f32.mrf.mxu0  ;;  %v6735_v24 = vcombine.high %v5473_v2, %v5477_v17  ;;  %v5481_v61 = vld [vmem:[%s11698_s5 + $0x1d8] sm:$0xff] }
 0x8f3   :  { %v11489_v45 = vadd.f32 %v7027_v48, %v11319_v53  ;;  %7114 = vmatpush3.bf16.msra.mxu0 %v12414_v0  ;;  %v5485_v48 = vld [vmem:[%s11698_s5 + $0x1f8] sm:$0xff] }
 0x8f4   :  { %v7029_v15 = vpop.f32.mrf.mxu0  ;;  %7115 = vmatprep.subr.bf16.mxu0 %v12415_v35  ;;  %v6743_v0 = vcombine.high %v5481_v61, %v5485_v48 }
 0x8f5   :  { %v7030_v54 = vadd.f32 %v7029_v15, %v7028_v50  ;;  %v6734_v50 = vcombine.low %v5473_v2, %v5477_v17  ;;  %v6742_v15 = vcombine.low %v5481_v61, %v5485_v48 }
 0x8f6   :  { %v7031_v62 = vpop.f32.mrf.mxu0 }
 0x8f7   :  { %v11498_v60 = vadd.f32 %v7030_v54, %v11328_v57  ;;  %7116 = vmatpush3.bf16.msra.mxu0 %v12416_v11 }
 0x8f8   :  { %v7032_v53 = vpop.f32.mrf.mxu0  ;;  %7117 = vmatprep.subr.bf16.mxu0 %v12417_v40 }
 0x8f9   :  { %v7033_v29 = vadd.f32 %v7032_v53, %v7031_v62 }
 0x8fa   :  { %v7034_v27 = vpop.f32.mrf.mxu0 }
 0x8fb   :  { %v11507_v5 = vadd.f32 %v7033_v29, %v11341_v8  ;;  %7118 = vmatpush3.bf16.msra.mxu0 %v12418_v13  ;;  %v12424_v13 = vld [vmem:[#allocation107_spill] sm:$0xff] }
 0x8fc   :  { %v7035_v57 = vpop.f32.mrf.mxu0  ;;  %7119 = vmatprep.subr.bf16.mxu0 %v12419_v10 }
 0x8fd   :  { %v7036_v55 = vadd.f32 %v7035_v57, %v7034_v27 }
 0x8fe   :  { %v7037_v51 = vpop.f32.mrf.mxu0 }
 0x8ff   :  { %v11516_v63 = vadd.f32 %v7036_v55, %v11350_v25  ;;  %7120 = vmatpush3.bf16.msra.mxu0 %v12420_v52 }
 0x900   :  { %v7038_v8 = vpop.f32.mrf.mxu0  ;;  %7121 = vmatprep.subr.bf16.mxu0 %v12421_v22 }
 0x901   :  { %v7039_v33 = vadd.f32 %v7038_v8, %v7037_v51 }
 0x902   :  { %v7040_v25 = vpop.f32.mrf.mxu0 }
 0x903   :  { %v11531_v20 = vadd.f32 %v7039_v33, %v11363_v56  ;;  %7122 = vmatpush3.bf16.msra.mxu0 %v12422_v31  ;;  %v5441_v56 = vld [vmem:[%s11698_s5 + $0x98] sm:$0xff]  ;;  %s7832_s5 = smov [#allocation2]  }
 0x904   :  { %v7041_v3 = vpop.f32.mrf.mxu0  ;;  %v6703_v6 = vcombine.high %v5441_v56, %v5445_v1  ;;  %s6284_s11 = sshll.u32 %s7832_s5, 4  ;;  %s6285_s11 = int_to_ptr.vmem [resolvable:$true] %s6284_s11 }
 0x905   :  { %v7042_v59 = vadd.f32 %v7041_v3, %v7040_v25  ;;  %s7807_s12 = scalar_lea.vmem %s6285_s11, 32  ;;  %p7812_p1 = scmp.lt.s32.totalorder %s6285_s11, %s6285_s11 }
 0x906   :  { %6198 = vmatmul.mubr.bf16.vlgmr.msra.gmra.mxu0 %v12423_v36  ;;  %p7808_p0 = scmp.ne.s32.totalorder %s6285_s11, %s7807_s12  ;;  %p7813_p2 = scmp.lt.s32.totalorder %s7807_s12, %s7807_s12 }
 0x907   :  { %v11540_v47 = vadd.f32 %v7042_v59, %v11372_v12  ;;  %6205 = vmatprep.mubr.bf16.mxu0 %v6695_v19  ;;  %v6702_v12 = vcombine.low %v5441_v56, %v5445_v1 }
 0x908   :  { %p7814_p3 = por %p7813_p2, %p7812_p1 }
 0x90a   :  { %p7815_p4 = pnand %p7814_p3, %p7808_p0 }
 0x90e   :  { %6206 = vmatmul.mubr.bf16.gmra.mxu0 %v6694_v26 }
 0x90f   :  { %6213 = vmatprep.mubr.bf16.mxu0 %v6703_v6 }
 0x916   :  { %6214 = vmatmul.mubr.bf16.gmra.mxu0 %v6702_v12 }
 0x917   :  { %6221 = vmatprep.mubr.bf16.mxu0 %v6711_v7 }
 0x91e   :  { %6222 = vmatmul.mubr.bf16.gmra.mxu0 %v6710_v39 }
 0x91f   :  { %6229 = vmatprep.mubr.bf16.mxu0 %v6719_v14 }
 0x926   :  { %6230 = vmatmul.mubr.bf16.gmra.mxu0 %v6718_v43 }
 0x927   :  { %6237 = vmatprep.mubr.bf16.mxu0 %v6727_v28 }
 0x92e   :  { %6238 = vmatmul.mubr.bf16.gmra.mxu0 %v6726_v42 }
 0x92f   :  { %6245 = vmatprep.mubr.bf16.mxu0 %v6735_v24 }
 0x936   :  { %6246 = vmatmul.mubr.bf16.gmra.mxu0 %v6734_v50 }
 0x937   :  { %6253 = vmatprep.mubr.bf16.mxu0 %v6743_v0 }
 0x93e   :  { %6254 = vmatmul.mubr.bf16.gmra.mxu0 %v6742_v15 }
 0x946   :  { %v7059_v35 = vpop.f32.mrf.mxu0 }
 0x948   :  { %v7060_v54 = vpop.f32.mrf.mxu0 }
 0x949   :  { %v7061_v62 = vadd.f32 %v7060_v54, %v7059_v35 }
 0x94a   :  { %v7062_v11 = vpop.f32.mrf.mxu0 }
 0x94b   :  { %v11579_v53 = vadd.f32 %v7061_v62, %v11433_v38 }
 0x94c   :  { %v7063_v40 = vpop.f32.mrf.mxu0 }
 0x94d   :  { %v7064_v29 = vadd.f32 %v7063_v40, %v7062_v11 }
 0x94e   :  { %v7065_v27 = vpop.f32.mrf.mxu0 }
 0x94f   :  { %v11582_v57 = vadd.f32 %v7064_v29, %v12424_v13 }
 0x950   :  { %v7066_v10 = vpop.f32.mrf.mxu0 }
 0x951   :  { %v7067_v55 = vadd.f32 %v7066_v10, %v7065_v27 }
 0x952   :  { %v7068_v51 = vpop.f32.mrf.mxu0 }
 0x953   :  { %v11585_v52 = vadd.f32 %v7067_v55, %v11445_v16 }
 0x954   :  { %v7069_v8 = vpop.f32.mrf.mxu0 }
 0x955   :  { %v7070_v22 = vadd.f32 %v7069_v8, %v7068_v51 }
 0x956   :  { %v7071_v18 = vpop.f32.mrf.mxu0 }
 0x957   :  { %v11588_v33 = vadd.f32 %v7070_v22, %v12425_v21 }
 0x958   :  { %v7072_v38 = vpop.f32.mrf.mxu0 }
 0x959   :  { %v7073_v25 = vadd.f32 %v7072_v38, %v7071_v18 }
 0x95a   :  { %v7074_v31 = vpop.f32.mrf.mxu0 }
 0x95b   :  { %v11591_v19 = vadd.f32 %v7073_v25, %v11455_v58 }
 0x95c   :  { %v7075_v3 = vpop.f32.mrf.mxu0 }
 0x95d   :  { %v7076_v59 = vadd.f32 %v7075_v3, %v7074_v31 }
 0x95e   :  { %v7077_v36 = vpop.f32.mrf.mxu0 }
 0x95f   :  { %v11594_v56 = vadd.f32 %v7076_v59, %v11458_v37 }
 0x960   :  { %v7078_v16 = vpop.f32.mrf.mxu0 }
 0x961   :  { %v7079_v1 = vadd.f32 %v7078_v16, %v7077_v36 }
 0x962   :  { %v7080_v26 = vpop.f32.mrf.mxu0 }
 0x963   :  { %v11597_v6 = vadd.f32 %v7079_v1, %v11465_v49 }
 0x964   :  { %v7081_v9 = vpop.f32.mrf.mxu0 }
 0x965   :  { %v7082_v46 = vadd.f32 %v7081_v9, %v7080_v26 }
 0x966   :  { %v7083_v12 = vpop.f32.mrf.mxu0 }
 0x967   :  { %v11600_v7 = vadd.f32 %v7082_v46, %v11468_v41 }
 0x968   :  { %v7084_v58 = vpop.f32.mrf.mxu0 }
 0x969   :  { %v7085_v44 = vadd.f32 %v7084_v58, %v7083_v12 }
 0x96a   :  { %v7086_v30 = vpop.f32.mrf.mxu0 }
 0x96b   :  { %v11603_v39 = vadd.f32 %v7085_v44, %v11474_v4 }
 0x96c   :  { %v7087_v37 = vpop.f32.mrf.mxu0 }
 0x96d   :  { %v7088_v14 = vadd.f32 %v7087_v37, %v7086_v30 }
 0x96e   :  { %v7089_v32 = vpop.f32.mrf.mxu0 }
 0x96f   :  { %v11606_v34 = vadd.f32 %v7088_v14, %v11480_v23 }
 0x970   :  { %v7090_v49 = vpop.f32.mrf.mxu0 }
 0x971   :  { %v7091_v43 = vadd.f32 %v7090_v49, %v7089_v32 }
 0x972   :  { %v7092_v28 = vpop.f32.mrf.mxu0 }
 0x973   :  { %v11609_v2 = vadd.f32 %v7091_v43, %v11489_v45 }
 0x974   :  { %v7093_v41 = vpop.f32.mrf.mxu0 }
 0x975   :  { %v7094_v17 = vadd.f32 %v7093_v41, %v7092_v28 }
 0x976   :  { %v7095_v42 = vpop.f32.mrf.mxu0 }
 0x977   :  { %v11612_v24 = vadd.f32 %v7094_v17, %v11498_v60 }
 0x978   :  { %v7096_v4 = vpop.f32.mrf.mxu0 }
 0x979   :  { %v7097_v61 = vadd.f32 %v7096_v4, %v7095_v42 }
 0x97a   :  { %v7098_v48 = vpop.f32.mrf.mxu0 }
 0x97b   :  { %v11615_v50 = vadd.f32 %v7097_v61, %v11507_v5 }
 0x97c   :  { %v7099_v23 = vpop.f32.mrf.mxu0 }
 0x97d   :  { %v7100_v0 = vadd.f32 %v7099_v23, %v7098_v48 }
 0x97e   :  { %v7101_v15 = vpop.f32.mrf.mxu0 }
 0x97f   :  { %v11618_v35 = vadd.f32 %v7100_v0, %v11516_v63 }
 0x980   :  { %v7102_v45 = vpop.f32.mrf.mxu0 }
 0x981   :  { %v7103_v54 = vadd.f32 %v7102_v45, %v7101_v15 }
 0x982   :  { %v7104_v62 = vpop.f32.mrf.mxu0 }
 0x983   :  { %v11621_v11 = vadd.f32 %v7103_v54, %v11531_v20 }
 0x984   :  { %v7105_v60 = vpop.f32.mrf.mxu0 }
 0x985   :  { %v7106_v40 = vadd.f32 %v7105_v60, %v7104_v62 }
 0x987   :  { %v11624_v29 = vadd.f32 %v7106_v40, %v11540_v47 }
 0x988   :  { %7818 = shalt.err (!%p7815_p4)
}
 0x989   :  { %6287 = dma.vmem_to_hbm [thread:$0]  %s6285_s11, 32, %s11699_s6, [#allocation3]  }
 0x9c6   :  { %v7123_v5 = vpop.f32.mrf.mxu0 }
 0x9c8   :  { %v7124_v63 = vpop.f32.mrf.mxu0 }
 0x9c9   :  { %v7125_v20 = vadd.f32 %v7124_v63, %v7123_v5 }
 0x9ca   :  { %v7126_v27 = vpop.f32.mrf.mxu0 }
 0x9cb   :  { %v6200_v47 = vadd.f32 %v7125_v20, %v11579_v53 }
 0x9cc   :  { %v7127_v13 = vpop.f32.mrf.mxu0 }
 0x9cd   :  { %6262 = vst [vmem:[%s11700_s7] sm:$0xff] %v6200_v47  ;;  %v7128_v10 = vadd.f32 %v7127_v13, %v7126_v27 }
 0x9ce   :  { %v7129_v55 = vpop.f32.mrf.mxu0 }
 0x9cf   :  { %v6203_v51 = vadd.f32 %v7128_v10, %v11582_v57 }
 0x9d0   :  { %v7130_v8 = vpop.f32.mrf.mxu0 }
 0x9d1   :  { %6263 = vst [vmem:[%s11700_s7 + $0x8] sm:$0xff] %v6203_v51  ;;  %v7131_v22 = vadd.f32 %v7130_v8, %v7129_v55 }
 0x9d2   :  { %v7132_v18 = vpop.f32.mrf.mxu0 }
 0x9d3   :  { %v6208_v21 = vadd.f32 %v7131_v22, %v11585_v52 }
 0x9d4   :  { %v7133_v38 = vpop.f32.mrf.mxu0 }
 0x9d5   :  { %6264 = vst [vmem:[%s11700_s7 + $0x10] sm:$0xff] %v6208_v21  ;;  %v7134_v53 = vadd.f32 %v7133_v38, %v7132_v18 }
 0x9d6   :  { %v7135_v25 = vpop.f32.mrf.mxu0 }
 0x9d7   :  { %v6211_v31 = vadd.f32 %v7134_v53, %v11588_v33 }
 0x9d8   :  { %v7136_v3 = vpop.f32.mrf.mxu0 }
 0x9d9   :  { %6265 = vst [vmem:[%s11700_s7 + $0x18] sm:$0xff] %v6211_v31  ;;  %v7137_v57 = vadd.f32 %v7136_v3, %v7135_v25 }
 0x9da   :  { %v7138_v59 = vpop.f32.mrf.mxu0 }
 0x9db   :  { %v6216_v36 = vadd.f32 %v7137_v57, %v11591_v19 }
 0x9dc   :  { %v7139_v16 = vpop.f32.mrf.mxu0 }
 0x9dd   :  { %6266 = vst [vmem:[%s11700_s7 + $0x20] sm:$0xff] %v6216_v36  ;;  %v7140_v52 = vadd.f32 %v7139_v16, %v7138_v59 }
 0x9de   :  { %v7141_v1 = vpop.f32.mrf.mxu0 }
 0x9df   :  { %v6219_v26 = vadd.f32 %v7140_v52, %v11594_v56 }
 0x9e0   :  { %v7142_v9 = vpop.f32.mrf.mxu0 }
 0x9e1   :  { %6267 = vst [vmem:[%s11700_s7 + $0x28] sm:$0xff] %v6219_v26  ;;  %v7143_v33 = vadd.f32 %v7142_v9, %v7141_v1 }
 0x9e2   :  { %v7144_v46 = vpop.f32.mrf.mxu0 }
 0x9e3   :  { %v6224_v12 = vadd.f32 %v7143_v33, %v11597_v6 }
 0x9e4   :  { %v7145_v58 = vpop.f32.mrf.mxu0 }
 0x9e5   :  { %6268 = vst [vmem:[%s11700_s7 + $0x30] sm:$0xff] %v6224_v12  ;;  %v7146_v19 = vadd.f32 %v7145_v58, %v7144_v46 }
 0x9e6   :  { %v7147_v44 = vpop.f32.mrf.mxu0 }
 0x9e7   :  { %v6227_v30 = vadd.f32 %v7146_v19, %v11600_v7 }
 0x9e8   :  { %v7148_v37 = vpop.f32.mrf.mxu0 }
 0x9e9   :  { %6269 = vst [vmem:[%s11700_s7 + $0x38] sm:$0xff] %v6227_v30  ;;  %v7149_v56 = vadd.f32 %v7148_v37, %v7147_v44 }
 0x9ea   :  { %v7150_v14 = vpop.f32.mrf.mxu0 }
 0x9eb   :  { %v6232_v32 = vadd.f32 %v7149_v56, %v11603_v39 }
 0x9ec   :  { %v7151_v49 = vpop.f32.mrf.mxu0 }
 0x9ed   :  { %6270 = vst [vmem:[%s11700_s7 + $0x40] sm:$0xff] %v6232_v32  ;;  %v7152_v6 = vadd.f32 %v7151_v49, %v7150_v14 }
 0x9ee   :  { %v7153_v43 = vpop.f32.mrf.mxu0 }
 0x9ef   :  { %v6235_v28 = vadd.f32 %v7152_v6, %v11606_v34 }
 0x9f0   :  { %v7154_v41 = vpop.f32.mrf.mxu0 }
 0x9f1   :  { %6271 = vst [vmem:[%s11700_s7 + $0x48] sm:$0xff] %v6235_v28  ;;  %v7155_v7 = vadd.f32 %v7154_v41, %v7153_v43 }
 0x9f2   :  { %v7156_v17 = vpop.f32.mrf.mxu0 }
 0x9f3   :  { %v6240_v42 = vadd.f32 %v7155_v7, %v11609_v2 }
 0x9f4   :  { %v7157_v4 = vpop.f32.mrf.mxu0 }
 0x9f5   :  { %6272 = vst [vmem:[%s11700_s7 + $0x50] sm:$0xff] %v6240_v42  ;;  %v7158_v39 = vadd.f32 %v7157_v4, %v7156_v17 }
 0x9f6   :  { %v7159_v61 = vpop.f32.mrf.mxu0 }
 0x9f7   :  { %v6243_v48 = vadd.f32 %v7158_v39, %v11612_v24 }
 0x9f8   :  { %v7160_v23 = vpop.f32.mrf.mxu0 }
 0x9f9   :  { %6273 = vst [vmem:[%s11700_s7 + $0x58] sm:$0xff] %v6243_v48  ;;  %v7161_v34 = vadd.f32 %v7160_v23, %v7159_v61 }
 0x9fa   :  { %v7162_v0 = vpop.f32.mrf.mxu0 }
 0x9fb   :  { %v6248_v15 = vadd.f32 %v7161_v34, %v11615_v50 }
 0x9fc   :  { %v7163_v45 = vpop.f32.mrf.mxu0 }
 0x9fd   :  { %6274 = vst [vmem:[%s11700_s7 + $0x60] sm:$0xff] %v6248_v15  ;;  %v7164_v2 = vadd.f32 %v7163_v45, %v7162_v0 }
 0x9fe   :  { %v7165_v54 = vpop.f32.mrf.mxu0 }
 0x9ff   :  { %v6251_v62 = vadd.f32 %v7164_v2, %v11618_v35 }
 0xa00   :  { %v7166_v60 = vpop.f32.mrf.mxu0 }
 0xa01   :  { %6275 = vst [vmem:[%s11700_s7 + $0x68] sm:$0xff] %v6251_v62  ;;  %v7167_v24 = vadd.f32 %v7166_v60, %v7165_v54 }
 0xa02   :  { %v7168_v40 = vpop.f32.mrf.mxu0 }
 0xa03   :  { %v6256_v5 = vadd.f32 %v7167_v24, %v11621_v11 }
 0xa04   :  { %v7169_v63 = vpop.f32.mrf.mxu0 }
 0xa05   :  { %6276 = vst [vmem:[%s11700_s7 + $0x70] sm:$0xff] %v6256_v5  ;;  %v7170_v50 = vadd.f32 %v7169_v63, %v7168_v40 }
 0xa07   :  { %v6259_v20 = vadd.f32 %v7170_v50, %v11624_v29 }
 0xa09   :  { %6277 = vst [vmem:[%s11700_s7 + $0x78] sm:$0xff] %v6259_v20 }
 0xa0a   :  { %7827 = dma.done.wait [#allocation3], 32  }
 0xa0b   :  { %7828 = vsyncadd [#allocation3], 4294967264 }
 0xa0c   :  { %6295 = vsyncpa [#allocation3], 1 }

</bundles_post_ra>
